<compile_context>
chip_gen: v6e
topology: v6e:2x2x1
jax: 0.10.0
libtpu: 0.0.40
codegen_flags: <defaults>
</compile_context>

<pallas_src>
import functools

import jax
import jax.numpy as jnp
from jax.experimental import pallas as pl
from jax.experimental.pallas import tpu as pltpu


def _block_kernel(x_ref, w_ref, p_ref, o_ref, *, H, W, k, pad, eps):
    """Fused conv (in-VMEM im2col -> one MXU matmul) + LayerNorm + ReLU for one image.

    x_ref : (H*W + 2*pad, Cin)  bf16  flattened NHWC image, zero rows top/bottom
    w_ref : (k*k*Cin, Cout)     bf16  conv weight, flattened HWIO (dy, dx, ci)
    p_ref : (3, Cout)           f32   rows = [conv bias, LN gamma, LN beta]
    o_ref : (H*W, Cout)               output pixels x channels
    """
    M = H * W
    r = k // 2

    # Column index of every flattened pixel (for horizontal-boundary masking:
    # a +-dx tap wraps into the neighbouring row in the flat layout).
    col = jax.lax.broadcasted_iota(jnp.int32, (M, 1), 0) % W

    pieces = []
    for dy in range(k):
        for dx in range(k):
            s = (dy - r) * W + (dx - r)
            piece = x_ref[pad + s: pad + s + M, :]          # (M, Cin) bf16
            off = dx - r
            if off < 0:                                      # needs w + off >= 0
                piece = jnp.where(col >= -off, piece, jnp.zeros_like(piece))
            elif off > 0:                                    # needs w + off < W
                piece = jnp.where(col < W - off, piece, jnp.zeros_like(piece))
            pieces.append(piece)
    patches = jnp.concatenate(pieces, axis=-1)               # (M, k*k*Cin) bf16

    # Single MXU matmul, f32 accumulation, + conv bias.
    y = jnp.dot(patches, w_ref[...], preferred_element_type=jnp.float32)
    y = y + p_ref[0:1, :]

    # Channel LayerNorm per pixel (biased variance, torch var(unbiased=False));
    # centered value reused for variance and normalization, rsqrt on the EUP.
    mean = jnp.mean(y, axis=-1, keepdims=True)
    d = y - mean
    var = jnp.mean(d * d, axis=-1, keepdims=True)
    yn = d * jax.lax.rsqrt(var + eps)
    yn = yn * p_ref[1:2, :] + p_ref[2:3, :]

    # ReLU + store.
    o_ref[...] = jnp.maximum(yn, 0.0).astype(o_ref.dtype)


def block_forward(x_nchw, weight_oihw, bias, g, b, *, eps=1e-5):
    """Block.forward.  x: (B, Cin, H, W) NCHW, weight: (Cout, Cin, k, k) OIHW,
    bias/g/b: (Cout,).  Returns (B, Cout, H, W)."""
    B, Cin, H, W = x_nchw.shape
    Cout, _, k, _ = weight_oihw.shape
    M = H * W
    K = k * k * Cin
    r = k // 2
    # Zero rows above/below each flat image; must cover the largest vertical
    # tap (r*W + r).  Rounded to a sublane multiple.
    pad = ((r * W + r + 7) // 8) * 8

    # Layout plumbing (required by the module's NCHW contract): NCHW -> flat
    # NHWC pixels x channels, bf16 for the MXU / halved activation DMA.
    xf = jnp.transpose(x_nchw, (0, 2, 3, 1)).reshape(B, M, Cin)
    xf = jnp.pad(xf.astype(jnp.bfloat16), ((0, 0), (pad, pad), (0, 0)))

    # OIHW -> (dy, dx, ci, co) flattened to (K, Cout), matching the patch order.
    w2 = jnp.transpose(weight_oihw, (2, 3, 1, 0)).reshape(K, Cout)
    w2 = w2.astype(jnp.bfloat16)

    # Pack conv bias + LN gamma + LN beta into a single small operand.
    params = jnp.stack([bias, g, b], axis=0).astype(jnp.float32)   # (3, Cout)

    kernel = functools.partial(_block_kernel, H=H, W=W, k=k, pad=pad, eps=eps)

    out_itemsize = jnp.dtype(x_nchw.dtype).itemsize
    cost = pl.CostEstimate(
        flops=B * (2 * M * K * Cout + 10 * M * Cout),
        transcendentals=B * M,
        bytes_accessed=int(xf.size * 2 + w2.size * 2 + params.size * 4
                           + B * M * Cout * out_itemsize))

    out = pl.pallas_call(
        kernel,
        out_shape=jax.ShapeDtypeStruct((B, M, Cout), x_nchw.dtype),
        grid=(B,),
        in_specs=[
            pl.BlockSpec((None, M + 2 * pad, Cin), lambda bb: (bb, 0, 0)),
            pl.BlockSpec((K, Cout), lambda bb: (0, 0)),
            pl.BlockSpec((3, Cout), lambda bb: (0, 0)),
        ],
        out_specs=pl.BlockSpec((None, M, Cout), lambda bb: (bb, 0, 0)),
        compiler_params=pltpu.CompilerParams(
            dimension_semantics=("parallel",)),
        cost_estimate=cost,
    )(xf, w2, params)

    # (B, H*W, Cout) -> (B, Cout, H, W)  (NCHW contract of the module).
    return jnp.transpose(out.reshape(B, H, W, Cout), (0, 3, 1, 2))


def _reference_block(x_nchw, weight_oihw, bias, g, b, eps=1e-5):
    """Pure-JAX f32 reference with the PyTorch module's semantics (NCHW)."""
    k = weight_oihw.shape[-1]
    p = k // 2
    y = jax.lax.conv_general_dilated(
        x_nchw, weight_oihw, window_strides=(1, 1), padding=[(p, p), (p, p)],
        dimension_numbers=("NCHW", "OIHW", "NCHW"))
    y = y + bias[None, :, None, None]
    mean = jnp.mean(y, axis=1, keepdims=True)
    var = jnp.mean(jnp.square(y - mean), axis=1, keepdims=True)
    yn = (y - mean) / jnp.sqrt(var + eps) * g[None, :, None, None] \
        + b[None, :, None, None]
    return jnp.maximum(yn, 0.0)


if __name__ == "__main__":
    # Block(dim=4, dim_out=32, large=False): Conv2d(4, 32, 3, padding=1).
    dim, dim_out, kernel_size = 4, 32, 3
    B, H, W = 2, 16, 16
    eps = 1e-5

    key = jax.random.PRNGKey(0)
    kx, kw, kb, kg, kbe = jax.random.split(key, 5)

    # Deterministic synthetic parameters (PyTorch Conv2d OIHW layout).
    fan_in = dim * kernel_size * kernel_size
    scale = 1.0 / jnp.sqrt(jnp.float32(fan_in))
    weight = scale * jax.random.normal(
        kw, (dim_out, dim, kernel_size, kernel_size), dtype=jnp.float32)
    bias = scale * jax.random.normal(kb, (dim_out,), dtype=jnp.float32)
    # LayerNorm params (module init is ones/zeros; perturb to exercise them).
    g = 1.0 + 0.1 * jax.random.normal(kg, (dim_out,), dtype=jnp.float32)
    b = 0.1 * jax.random.normal(kbe, (dim_out,), dtype=jnp.float32)

    x = jax.random.normal(kx, (B, dim, H, W), dtype=jnp.float32)

    out = block_forward(x, weight, bias, g, b, eps=eps)
    out = jax.block_until_ready(out)

    ref = _reference_block(x, weight, bias, g, b, eps=eps)
    assert out.shape == (B, dim_out, H, W)
    # bf16 matmul operands (f32 accumulate) -> looser tolerance vs f32 reference.
    assert jnp.allclose(out, ref, atol=7.5e-2, rtol=5e-2)

    print("KERNEL_OK")
</pallas_src>

<mosaic_0001>
module attributes {stable_mosaic.version = 11 : i64} {
  func.func @_block_kernel(%arg0: i32, %arg1: memref<1x304x4xbf16, #tpu.memory_space<vmem>>, %arg2: memref<36x32xbf16, #tpu.memory_space<vmem>>, %arg3: memref<3x32xf32, #tpu.memory_space<vmem>>, %arg4: memref<1x256x32xf32, #tpu.memory_space<vmem>>) attributes {dimension_semantics = [#tpu.dimension_semantics<parallel>], iteration_bounds = array<i64: 2>, scalar_prefetch = 0 : i64, scratch_operands = 0 : i64, tpu.core_type = #tpu.core_type<tc>, window_params = [{transform_indices = @transform_0, window_bounds = array<i64: 1, 304, 4>}, {pipeline_mode = #tpu.pipeline_mode<synchronous>, transform_indices = @transform_1, window_bounds = array<i64: 36, 32>}, {pipeline_mode = #tpu.pipeline_mode<synchronous>, transform_indices = @transform_2, window_bounds = array<i64: 3, 32>}, {transform_indices = @transform_3, window_bounds = array<i64: 1, 256, 32>}]} {
    %0 = tpu.iota {dimensions = array<i32: 0>} : vector<256x1xi32>
    %c16_i32 = arith.constant 16 : i32
    %c0_i32 = arith.constant 0 : i32
    %1 = arith.cmpi eq, %c16_i32, %c0_i32 : i32
    %c1_i32 = arith.constant 1 : i32
    %2 = arith.select %1, %c1_i32, %c16_i32 : i32
    %3 = vector.broadcast %2 : i32 to vector<256x1xi32>
    %4 = arith.remsi %0, %3 : vector<256x1xi32>
    %c0_i32_0 = arith.constant 0 : i32
    %5 = vector.broadcast %c0_i32_0 : i32 to vector<256x1xi32>
    %6 = arith.cmpi ne, %4, %5 : vector<256x1xi32>
    %c0_i32_1 = arith.constant 0 : i32
    %7 = vector.broadcast %c0_i32_1 : i32 to vector<256x1xi32>
    %8 = arith.cmpi slt, %4, %7 : vector<256x1xi32>
    %c0_i32_2 = arith.constant 0 : i32
    %9 = arith.cmpi slt, %2, %c0_i32_2 : i32
    %10 = vector.broadcast %9 : i1 to vector<256x1xi1>
    %11 = vector.broadcast %10 : vector<256x1xi1> to vector<256x1xi1>
    %12 = arith.xori %8, %11 : vector<256x1xi1>
    %13 = arith.andi %12, %6 : vector<256x1xi1>
    %14 = vector.broadcast %2 : i32 to vector<256x1xi32>
    %15 = arith.addi %4, %14 : vector<256x1xi32>
    %16 = arith.select %13, %15, %4 : vector<256x1xi1>, vector<256x1xi32>
    %c0 = arith.constant 0 : index
    %c7 = arith.constant 7 : index
    %c0_3 = arith.constant 0 : index
    %17 = vector.load %arg1[%c0, %c7, %c0_3] : memref<1x304x4xbf16, #tpu.memory_space<vmem>>, vector<1x256x4xbf16>
    %18 = vector.shape_cast %17 : vector<1x256x4xbf16> to vector<256x4xbf16>
    %c1_i32_4 = arith.constant 1 : i32
    %19 = vector.broadcast %c1_i32_4 : i32 to vector<256x1xi32>
    %20 = arith.cmpi sge, %16, %19 : vector<256x1xi32>
    %cst = arith.constant 0.000000e+00 : bf16
    %21 = vector.broadcast %cst : bf16 to vector<256x4xbf16>
    %22 = vector.shape_cast %20 : vector<256x1xi1> to vector<256x1xi1>
    %23 = vector.broadcast %22 : vector<256x1xi1> to vector<256x4xi1>
    %24 = arith.select %23, %18, %21 : vector<256x4xi1>, vector<256x4xbf16>
    %c0_5 = arith.constant 0 : index
    %c8 = arith.constant 8 : index
    %c0_6 = arith.constant 0 : index
    %25 = vector.load %arg1[%c0_5, %c8, %c0_6] : memref<1x304x4xbf16, #tpu.memory_space<vmem>>, vector<1x256x4xbf16>
    %26 = vector.shape_cast %25 : vector<1x256x4xbf16> to vector<256x4xbf16>
    %c0_7 = arith.constant 0 : index
    %c9 = arith.constant 9 : index
    %c0_8 = arith.constant 0 : index
    %27 = vector.load %arg1[%c0_7, %c9, %c0_8] : memref<1x304x4xbf16, #tpu.memory_space<vmem>>, vector<1x256x4xbf16>
    %28 = vector.shape_cast %27 : vector<1x256x4xbf16> to vector<256x4xbf16>
    %c15_i32 = arith.constant 15 : i32
    %29 = vector.broadcast %c15_i32 : i32 to vector<256x1xi32>
    %30 = arith.cmpi slt, %16, %29 : vector<256x1xi32>
    %cst_9 = arith.constant 0.000000e+00 : bf16
    %31 = vector.broadcast %cst_9 : bf16 to vector<256x4xbf16>
    %32 = vector.shape_cast %30 : vector<256x1xi1> to vector<256x1xi1>
    %33 = vector.broadcast %32 : vector<256x1xi1> to vector<256x4xi1>
    %34 = arith.select %33, %28, %31 : vector<256x4xi1>, vector<256x4xbf16>
    %c0_10 = arith.constant 0 : index
    %c23 = arith.constant 23 : index
    %c0_11 = arith.constant 0 : index
    %35 = vector.load %arg1[%c0_10, %c23, %c0_11] : memref<1x304x4xbf16, #tpu.memory_space<vmem>>, vector<1x256x4xbf16>
    %36 = vector.shape_cast %35 : vector<1x256x4xbf16> to vector<256x4xbf16>
    %c1_i32_12 = arith.constant 1 : i32
    %37 = vector.broadcast %c1_i32_12 : i32 to vector<256x1xi32>
    %38 = arith.cmpi sge, %16, %37 : vector<256x1xi32>
    %cst_13 = arith.constant 0.000000e+00 : bf16
    %39 = vector.broadcast %cst_13 : bf16 to vector<256x4xbf16>
    %40 = vector.shape_cast %38 : vector<256x1xi1> to vector<256x1xi1>
    %41 = vector.broadcast %40 : vector<256x1xi1> to vector<256x4xi1>
    %42 = arith.select %41, %36, %39 : vector<256x4xi1>, vector<256x4xbf16>
    %c0_14 = arith.constant 0 : index
    %c24 = arith.constant 24 : index
    %c0_15 = arith.constant 0 : index
    %43 = vector.load %arg1[%c0_14, %c24, %c0_15] : memref<1x304x4xbf16, #tpu.memory_space<vmem>>, vector<1x256x4xbf16>
    %44 = vector.shape_cast %43 : vector<1x256x4xbf16> to vector<256x4xbf16>
    %c0_16 = arith.constant 0 : index
    %c25 = arith.constant 25 : index
    %c0_17 = arith.constant 0 : index
    %45 = vector.load %arg1[%c0_16, %c25, %c0_17] : memref<1x304x4xbf16, #tpu.memory_space<vmem>>, vector<1x256x4xbf16>
    %46 = vector.shape_cast %45 : vector<1x256x4xbf16> to vector<256x4xbf16>
    %c15_i32_18 = arith.constant 15 : i32
    %47 = vector.broadcast %c15_i32_18 : i32 to vector<256x1xi32>
    %48 = arith.cmpi slt, %16, %47 : vector<256x1xi32>
    %cst_19 = arith.constant 0.000000e+00 : bf16
    %49 = vector.broadcast %cst_19 : bf16 to vector<256x4xbf16>
    %50 = vector.shape_cast %48 : vector<256x1xi1> to vector<256x1xi1>
    %51 = vector.broadcast %50 : vector<256x1xi1> to vector<256x4xi1>
    %52 = arith.select %51, %46, %49 : vector<256x4xi1>, vector<256x4xbf16>
    %c0_20 = arith.constant 0 : index
    %c39 = arith.constant 39 : index
    %c0_21 = arith.constant 0 : index
    %53 = vector.load %arg1[%c0_20, %c39, %c0_21] : memref<1x304x4xbf16, #tpu.memory_space<vmem>>, vector<1x256x4xbf16>
    %54 = vector.shape_cast %53 : vector<1x256x4xbf16> to vector<256x4xbf16>
    %c1_i32_22 = arith.constant 1 : i32
    %55 = vector.broadcast %c1_i32_22 : i32 to vector<256x1xi32>
    %56 = arith.cmpi sge, %16, %55 : vector<256x1xi32>
    %cst_23 = arith.constant 0.000000e+00 : bf16
    %57 = vector.broadcast %cst_23 : bf16 to vector<256x4xbf16>
    %58 = vector.shape_cast %56 : vector<256x1xi1> to vector<256x1xi1>
    %59 = vector.broadcast %58 : vector<256x1xi1> to vector<256x4xi1>
    %60 = arith.select %59, %54, %57 : vector<256x4xi1>, vector<256x4xbf16>
    %c0_24 = arith.constant 0 : index
    %c40 = arith.constant 40 : index
    %c0_25 = arith.constant 0 : index
    %61 = vector.load %arg1[%c0_24, %c40, %c0_25] : memref<1x304x4xbf16, #tpu.memory_space<vmem>>, vector<1x256x4xbf16>
    %62 = vector.shape_cast %61 : vector<1x256x4xbf16> to vector<256x4xbf16>
    %c0_26 = arith.constant 0 : index
    %c41 = arith.constant 41 : index
    %c0_27 = arith.constant 0 : index
    %63 = vector.load %arg1[%c0_26, %c41, %c0_27] : memref<1x304x4xbf16, #tpu.memory_space<vmem>>, vector<1x256x4xbf16>
    %64 = vector.shape_cast %63 : vector<1x256x4xbf16> to vector<256x4xbf16>
    %c15_i32_28 = arith.constant 15 : i32
    %65 = vector.broadcast %c15_i32_28 : i32 to vector<256x1xi32>
    %66 = arith.cmpi slt, %16, %65 : vector<256x1xi32>
    %cst_29 = arith.constant 0.000000e+00 : bf16
    %67 = vector.broadcast %cst_29 : bf16 to vector<256x4xbf16>
    %68 = vector.shape_cast %66 : vector<256x1xi1> to vector<256x1xi1>
    %69 = vector.broadcast %68 : vector<256x1xi1> to vector<256x4xi1>
    %70 = arith.select %69, %64, %67 : vector<256x4xi1>, vector<256x4xbf16>
    %71 = tpu.concatenate %24, %26, %34, %42, %44, %52, %60, %62, %70 in 1 : vector<256x4xbf16>, vector<256x4xbf16>, vector<256x4xbf16>, vector<256x4xbf16>, vector<256x4xbf16>, vector<256x4xbf16>, vector<256x4xbf16>, vector<256x4xbf16>, vector<256x4xbf16> -> vector<256x36xbf16>
    %c0_30 = arith.constant 0 : index
    %c0_31 = arith.constant 0 : index
    %72 = vector.load %arg2[%c0_30, %c0_31] : memref<36x32xbf16, #tpu.memory_space<vmem>>, vector<36x32xbf16>
    %cst_32 = arith.constant dense<0.000000e+00> : vector<256x32xf32>
    %73 = tpu.matmul %71, %72, %cst_32 {dimension_numbers = #tpu.dot_dimension_numbers<[1], [0], [0], [1], [0, 0, 1, 1], [], []>} : vector<256x36xbf16>, vector<36x32xbf16>, vector<256x32xf32> -> vector<256x32xf32>
    %c0_33 = arith.constant 0 : index
    %c0_34 = arith.constant 0 : index
    %74 = vector.load %arg3[%c0_33, %c0_34] : memref<3x32xf32, #tpu.memory_space<vmem>>, vector<1x32xf32>
    %75 = vector.broadcast %74 : vector<1x32xf32> to vector<256x32xf32>
    %76 = arith.addf %73, %75 : vector<256x32xf32>
    %cst_35 = arith.constant dense<0.000000e+00> : vector<256xf32>
    %77 = vector.multi_reduction <add>, %76, %cst_35 [1] : vector<256x32xf32> to vector<256xf32>
    %78 = vector.shape_cast %77 : vector<256xf32> to vector<256x1xf32>
    %cst_36 = arith.constant 3.200000e+01 : f32
    %79 = vector.broadcast %cst_36 : f32 to vector<256x1xf32>
    %80 = arith.divf %78, %79 : vector<256x1xf32>
    %81 = vector.broadcast %80 : vector<256x1xf32> to vector<256x32xf32>
    %82 = arith.subf %76, %81 : vector<256x32xf32>
    %83 = arith.mulf %82, %82 : vector<256x32xf32>
    %cst_37 = arith.constant dense<0.000000e+00> : vector<256xf32>
    %84 = vector.multi_reduction <add>, %83, %cst_37 [1] : vector<256x32xf32> to vector<256xf32>
    %85 = vector.shape_cast %84 : vector<256xf32> to vector<256x1xf32>
    %cst_38 = arith.constant 3.200000e+01 : f32
    %86 = vector.broadcast %cst_38 : f32 to vector<256x1xf32>
    %87 = arith.divf %85, %86 : vector<256x1xf32>
    %cst_39 = arith.constant 9.99999974E-6 : f32
    %88 = vector.broadcast %cst_39 : f32 to vector<256x1xf32>
    %89 = arith.addf %87, %88 : vector<256x1xf32>
    %90 = math.rsqrt %89 : vector<256x1xf32>
    %91 = vector.broadcast %90 : vector<256x1xf32> to vector<256x32xf32>
    %92 = arith.mulf %82, %91 : vector<256x32xf32>
    %c1 = arith.constant 1 : index
    %c0_40 = arith.constant 0 : index
    %93 = vector.load %arg3[%c1, %c0_40] : memref<3x32xf32, #tpu.memory_space<vmem>>, vector<1x32xf32>
    %94 = vector.broadcast %93 : vector<1x32xf32> to vector<256x32xf32>
    %95 = arith.mulf %92, %94 : vector<256x32xf32>
    %c2 = arith.constant 2 : index
    %c0_41 = arith.constant 0 : index
    %96 = vector.load %arg3[%c2, %c0_41] : memref<3x32xf32, #tpu.memory_space<vmem>>, vector<1x32xf32>
    %97 = vector.broadcast %96 : vector<1x32xf32> to vector<256x32xf32>
    %98 = arith.addf %95, %97 : vector<256x32xf32>
    %cst_42 = arith.constant 0.000000e+00 : f32
    %99 = vector.broadcast %cst_42 : f32 to vector<256x32xf32>
    %100 = arith.maximumf %98, %99 : vector<256x32xf32>
    %c0_43 = arith.constant 0 : index
    %c0_44 = arith.constant 0 : index
    %c0_45 = arith.constant 0 : index
    %101 = vector.load %arg4[%c0_43, %c0_44, %c0_45] : memref<1x256x32xf32, #tpu.memory_space<vmem>>, vector<1x256x32xf32>
    %102 = vector.shape_cast %101 : vector<1x256x32xf32> to vector<256x32xf32>
    %103 = vector.shape_cast %100 : vector<256x32xf32> to vector<1x256x32xf32>
    tpu.vector_store %arg4[%c0_43, %c0_44, %c0_45], %103 {strides = array<i32>} : memref<1x256x32xf32, #tpu.memory_space<vmem>>, vector<1x256x32xf32>,
    return
  }
  func.func @transform_0(%arg0: i32) -> (i32, i32, i32) {
    %c0_i32 = arith.constant 0 : i32
    %c0_i32_0 = arith.constant 0 : i32
    %c0_i32_1 = arith.constant 0 : i32
    return %arg0, %c0_i32, %c0_i32_0 : i32, i32, i32
  }
  func.func @transform_1(%arg0: i32) -> (i32, i32) {
    %c0_i32 = arith.constant 0 : i32
    %c0_i32_0 = arith.constant 0 : i32
    %c0_i32_1 = arith.constant 0 : i32
    return %c0_i32, %c0_i32_0 : i32, i32
  }
  func.func @transform_2(%arg0: i32) -> (i32, i32) {
    %c0_i32 = arith.constant 0 : i32
    %c0_i32_0 = arith.constant 0 : i32
    %c0_i32_1 = arith.constant 0 : i32
    return %c0_i32, %c0_i32_0 : i32, i32
  }
  func.func @transform_3(%arg0: i32) -> (i32, i32, i32) {
    %c0_i32 = arith.constant 0 : i32
    %c0_i32_0 = arith.constant 0 : i32
    %c0_i32_1 = arith.constant 0 : i32
    return %arg0, %c0_i32, %c0_i32_0 : i32, i32, i32
  }
}

</mosaic_0001>

<bundles_post_ra>
// kernel: tpu_custom_call.1
= control target key start
LH: loop header
LB: loop body
LE: loop exit
PB: predicated region body
PF: predicated region fallthrough
CT: control target
= control target key end

     0   :  { %s4624_s12 = smov 0   ;;  %s7805_s0 = inlined_call_operand.vmem [shape: bf16[2,304,4], index: 0, kind: input, shape index: {}]   ;;  %s7806_s1 = inlined_call_operand.vmem [shape: bf16[36,32], index: 1, kind: input, shape index: {}]   ;;  %s7807_s2 = inlined_call_operand.vmem [shape: f32[3,32], index: 2, kind: input, shape index: {}]   ;;  %s7808_s3 = inlined_call_operand.vmem [shape: f32[2,256,32], index: 3, kind: output, shape index: {}]  }
   0x1 LB: > { %s4232_s13 = sadd.s32 4294967295, %s4592_s12   ;;  %p4236_p0 = scmp.ge.s32.totalorder %s4592_s12, 1  ;;  %s4592_s12 = sphi %s4624_s12, %s13_s12  }
   0x2   : > { %p137_p1 = scmp.lt.s32.totalorder %s4592_s12, 3 }
   0x4   : > { %p138_p2 = pnand %p4236_p0, %p137_p1 }
   0x6   : > { %141 = sbr.rel (%p138_p2) target bundleno = 992 (0x3e0), region = 32 }
   0xb   : > { %p161_p3 = scmp.lt.s32.totalorder %s4232_s13, 1  ;;  %v174_v0 = vlaneseq  ;;  %vm4594_vm0 = vmmov 1   ;;  %v7814_v2 = vmov 0   ;;  %vm7810_vm2 = vsmask.f32 3328  ;;  %s4596_s18 = smov 4  }
   0xc   : > { %vm721_vm1 = vmpackc.low %vm4594_vm0, %vm4594_vm0  ;;  %vm785_vm4 = vsmask.f32 7440  ;;  %vm1333_vm6 = vsmask.f32 256  ;;  %vm1334_vm7 = vsmask.f32 4368 }
   0xd   : > { %s8631_s13 = smov (!%p161_p3, %s4232_s13), 1  ;;  %v4634_v1 = vshrl.u32 %v174_v0, 7  ;;  %v4637_v3 = vsel %vm721_vm1, 65537, %v7814_v2  ;;  %vm4778_vm11 = vmor %vm7810_vm2, %vm785_vm4  ;;  %s4597_s19 = smov 12  }
   0xe   : > { %s4450_s14 = smul.u32 152, %s8631_s13  ;;  %v797_v5 = vshll.u32 %v4637_v3, 16  ;;  %v801_v7 = vshrl.u32 %v4637_v3, 16  ;;  %vm4828_vm1 = vmor %vm1333_vm6, %vm1334_vm7  ;;  %s4598_s20 = smov 8  }
   0xf   : > { %7961 = vst [vmem:[#allocation2_spill] sm:$0xff] %v4634_v1  ;;  %v211_v4 = vand.u32 15, %v4634_v1  ;;  %v4643_v6 = vadd.s32 16, %v4634_v1  ;;  %v4647_v8 = vadd.s32 8, %v4634_v1  ;;  %v4650_v9 = vadd.s32 24, %v4634_v1  ;;  %s4599_s21 = smov 16  }
  0x10   : > { %v4653_v10 = vadd.s32 104, %v4634_v1  ;;  %v4656_v11 = vadd.s32 120, %v4634_v1  ;;  %s4661_s17 = scalar_lea.vmem %s7805_s0, %s4450_s14  ;;  %v4669_v13 = vrot.slane %v797_v5, 5  ;;  %v4674_v15 = vrot.slane %v801_v7, 4  ;;  %s4600_s22 = smov 20  }
  0x11   : > { %vm4663_vm3 = vcmp.ge.s32.totalorder %v211_v4, 1  ;;  %v225_v14 = vand.u32 15, %v4643_v6  ;;  %v4677_v16 = vld [vmem:[%s4661_s17 + $0x4] sm:$0xf]  ;;  %v4680_v17 = vld [vmem:[%s4661_s17 + $0x8] sm:$0xf] }
  0x12   : > { %7964 = vst [vmem:[#allocation3_spill] sm:$0xff] %v4669_v13  ;;  %v4683_v18 = vld [vmem:[%s4661_s17 + $0x3c] sm:$0xf]  ;;  %v4257_v19 = vcombine.low %v4677_v16, %v4680_v17  ;;  %v4688_v20 = vld [vmem:[%s4661_s17 + $0x40] sm:$0xf]  ;;  %v804_v33 = vor.u32 %v4674_v15, %v4669_v13  ;;  %vm720_vm5 = vmpackc.low %vm4663_vm3, %vm4663_vm3  ;;  %s4601_s23 = smov 24  }
  0x13   : > { %v4691_v21 = vld [vmem:[%s4661_s17 + $0x44] sm:$0xf]  ;;  %v4694_v22 = vld [vmem:[%s4661_s17 + $0x48] sm:$0xf]  ;;  %v4264_v23 = vcombine.low %v4683_v18, %v4688_v20  ;;  %v4701_v25 = vld [vmem:[%s4661_s17 + $0xc] sm:$0xf] }
  0x14   : > { %v4265_v24 = vcombine.low %v4691_v21, %v4694_v22  ;;  %v4704_v26 = vld [vmem:[%s4661_s17 + $0x10] sm:$0xf]  ;;  %v4707_v27 = vld [vmem:[%s4661_s17 + $0x4c] sm:$0xf]  ;;  %v1993_v28 = vshrl.u32 %v4257_v19, 16  ;;  %v1996_v29 = vshll.u32 %v4257_v19, 16 }
  0x15   : > { %v4258_v30 = vcombine.low %v4701_v25, %v4704_v26  ;;  %v4712_v31 = vld [vmem:[%s4661_s17 + $0x50] sm:$0xf]  ;;  %v4715_v32 = vld [vmem:[%s4661_s17 + $0x14] sm:$0xf]  ;;  %v2055_v34 = vshrl.u32 %v4264_v23, 16  ;;  %v2058_v35 = vshll.u32 %v4264_v23, 16 }
  0x16   : > { %v2064_v36 = vshrl.u32 %v4265_v24, 16  ;;  %v2067_v37 = vshll.u32 %v4265_v24, 16  ;;  %v4720_v38 = vld [vmem:[%s4661_s17 + $0x18] sm:$0xf]  ;;  %v1995_v39 = vrot.slane %v1993_v28, 4  ;;  %v1998_v40 = vrot.slane %v1996_v29, 5 }
  0x17   : > { %v2001_v41 = vshrl.u32 %v4258_v30, 16  ;;  %v2004_v42 = vshll.u32 %v4258_v30, 16  ;;  %v4723_v43 = vld [vmem:[%s4661_s17 + $0x54] sm:$0xf]  ;;  %v2057_v44 = vrot.slane %v2055_v34, 4  ;;  %v2060_v45 = vrot.slane %v2058_v35, 5 }
  0x18   : > { %v2066_v46 = vrot.slane %v2064_v36, 4  ;;  %v2069_v47 = vrot.slane %v2067_v37, 5  ;;  %v4726_v48 = vld [vmem:[%s4661_s17 + $0x58] sm:$0xf]  ;;  %v1999_v49 = vor.u32 %v1998_v40, %v1995_v39  ;;  %v4266_v52 = vcombine.low %v4707_v27, %v4712_v31  ;;  %v1689_v36 = vld [vmem:[%s4661_s17 + $0x8] sm:$0x8] }
  0x19   : > { %v2003_v50 = vrot.slane %v2001_v41, 4  ;;  %v2006_v51 = vrot.slane %v2004_v42, 5  ;;  %v4733_v53 = vor.u32 %v2060_v45, %v2057_v44  ;;  %v4259_v55 = vcombine.low %v4715_v32, %v4720_v38  ;;  %s4602_s24 = smov 28   ;;  %s4603_s25 = smov 32  }
  0x1a   : > { %v2070_v54 = vor.u32 %v2069_v47, %v2066_v46  ;;  %v4267_v56 = vcombine.low %v4723_v43, %v4726_v48  ;;  %2135 = vrot.lane.b32.xlu0 %v1999_v49, %s4596_s18  ;;  %v2073_v58 = vshrl.u32 %v4266_v52, 16  ;;  %v2076_v59 = vshll.u32 %v4266_v52, 16  ;;  %s4384_s11 = sshll.u32 %s8631_s13, 8 }
  0x1b   : > { %7965 = vst [vmem:[#allocation4_spill] sm:$0xff] %v4733_v53  ;;  %v4740_v57 = vor.u32 %v2006_v51, %v2003_v50  ;;  %v752_v60 = vsel %vm720_vm5, 65537, %v7814_v2  ;;  %v2010_v62 = vshrl.u32 %v4259_v55, 16  ;;  %v2013_v63 = vshll.u32 %v4259_v55, 16  ;;  %s7644_s16 = scalar_lea.vmem %s7808_s3, %s4384_s11 }
  0x1c   : > { %v4745_v61 = vsel %vm7810_vm2, %v4733_v53, %v2070_v54  ;;  %v2082_v0 = vshrl.u32 %v4267_v56, 16  ;;  %v2075_v12 = vrot.slane %v2073_v58, 4  ;;  %v2078_v15 = vrot.slane %v2076_v59, 5 }
  0x1d   : > { %7966 = vst [vmem:[#allocation5_spill] sm:$0xff] %v4745_v61  ;;  %2151 = vrot.lane.b32.xlu1 %v4745_v61, %s4596_s18  ;;  %v2008_v4 = vsel %vm7810_vm2, %v1999_v49, %v4740_v57  ;;  %v2085_v19 = vshll.u32 %v4267_v56, 16  ;;  %v2012_v23 = vrot.slane %v2010_v62, 4  ;;  %v2015_v24 = vrot.slane %v2013_v63, 5 }
  0x1e   : > { %v2084_v28 = vrot.slane %v2082_v0, 4  ;;  %v788_v29 = vshll.u32 %v752_v60, 16  ;;  %2137 = vrot.lane.b32.xlu0 %v2008_v4, %s4596_s18  ;;  %v2079_v30 = vor.u32 %v2078_v15, %v2075_v12  ;;  %v791_v35 = vshrl.u32 %v752_v60, 16 }
  0x1f   : > { %v2087_v34 = vrot.slane %v2085_v19, 5  ;;  %vm626_vm8 = vcmp.ge.s32.totalorder %v225_v14, 1  ;;  %v4755_v37 = vor.u32 %v2015_v24, %v2012_v23  ;;  %v4759_v40 = vrot.slane %v804_v33, 4 }
  0x20   : > { %v4757_v39 = vrot.slane %v788_v29, 5  ;;  %vm722_vm9 = vmpackc.low %vm626_vm8, %vm626_vm8  ;;  %v218_v41 = vand.u32 15, %v4647_v8  ;;  %v4763_v42 = vsel %vm7810_vm2, %v2070_v54, %v2079_v30  ;;  %v793_v45 = vrot.slane %v791_v35, 4 }
  0x21   : > { %7967 = vst [vmem:[#allocation6_spill] sm:$0xff] %v4759_v40  ;;  %7968 = vst [vmem:[#allocation7_spill] sm:$0xff] %v4763_v42  ;;  %v4765_v44 = vor.u32 %v2087_v34, %v2084_v28  ;;  %v754_v46 = vsel %vm722_vm9, 65537, %v7814_v2  ;;  %2153 = vrot.lane.b32.xlu1 %v4763_v42, %s4596_s18  ;;  %v4773_v6 = vsel %vm7810_vm2, %v4740_v57, %v4755_v37  ;;  %v7969_v33 = vmov 0 }
  0x22   : > { %vm7809_vm10 = vcmp.ne.s16.totalorder %v4757_v39, 0  ;;  %v807_v14 = vshll.u32 %v754_v46, 16  ;;  %v811_v8 = vshrl.u32 %v754_v46, 16  ;;  %v7970_v33 = vsel %vm4778_vm11, 4294967295, %v7969_v33  ;;  %2139 = vrot.lane.b32.xlu0 %v4773_v6, %s4596_s18 }
  0x23   : > { %7971 = vst [vmem:[#allocation8_spill] sm:$0xff] %v7970_v33  ;;  %v4786_v47 = vsel %vm7810_vm2, %v2079_v30, %v4765_v44  ;;  %v794_v49 = vor.u32 %v793_v45, %v4757_v39  ;;  %v1692_v50 = vsel %vm7809_vm10, %v1689_v36, 0  ;;  %vm1174_vm12 = vcmp.lt.s32.totalorder %v218_v41, 15 }
  0x24   : > { %v809_v51 = vrot.slane %v807_v14, 5  ;;  %v813_v52 = vrot.slane %v811_v8, 4  ;;  %vm1270_vm13 = vmpackc.low %vm1174_vm12, %vm1174_vm12  ;;  %v1339_v54 = vrot.slane %v801_v7, 7  ;;  %v232_v55 = vand.u32 15, %v4650_v9 }
  0x25   : > { %v795_v56 = vrot.slane %v794_v49, 4  ;;  %v1302_v58 = vsel %vm1270_vm13, 65537, %v7814_v2  ;;  %v192_v59 = vadd.s32 136, %v4634_v1  ;;  %v302_v60 = vand.u32 15, %v4653_v10  ;;  %2155 = vrot.lane.b32.xlu1 %v4786_v47, %s4596_s18 }
  0x26   : > { %v810_v62 = vsel %vm4778_vm11, %v4759_v40, %v809_v51  ;;  %v814_v63 = vor.u32 %v813_v52, %v809_v51  ;;  %v4804_v7 = vor.u32 %v1339_v54, %v797_v5  ;;  %v4806_v9 = vrot.slane %v1339_v54, 4 }
  0x27   : > { %v800_v0 = vsel %vm4778_vm11, %v795_v56, %v4669_v13  ;;  %vm4811_vm14 = vcmp.ne.s16.totalorder %v810_v62, 0  ;;  %v1345_v4 = vshrl.u32 %v1302_v58, 16  ;;  %v1348_v12 = vshll.u32 %v1302_v58, 16 }
  0x28   : > { %7972 = vst [vmem:[#allocation9_spill] sm:$0xff] %v4804_v7  ;;  %7973 = vst [vmem:[#allocation10_spill] sm:$0xff] %v4806_v9  ;;  %vm4815_vm15 = vcmp.ne.s16.totalorder %v800_v0, 0  ;;  %v7976_v15 = vmov 0  ;;  %v815_v19 = vrot.slane %v814_v63, 4  ;;  %v1694_v3 = vsel %vm4811_vm14, %v4704_v26, 0 }
  0x29   : > { %v7977_v15 = vsel %vm4815_vm15, 4294967295, %v7976_v15  ;;  %vm7819_vm0 = vcmp.ne.s16.totalorder %v4804_v7, 0  ;;  %v1693_v5 = vsel %vm4815_vm15, %v4701_v25, 0  ;;  %v7978_v23 = vmov 0 }
  0x2a   : > { %v7979_v23 = vsel %vm4828_vm1, 4294967295, %v7978_v23  ;;  %v1347_v24 = vrot.slane %v1345_v4, 7  ;;  %v1656_v28 = vsel %vm7819_vm0, %v4677_v16, 0  ;;  %vm1176_vm3 = vcmp.lt.s32.totalorder %v232_v55, 15 }
  0x2b   : > { %7980 = vst [vmem:[#allocation11_spill] sm:$0xff] %v7979_v23  ;;  %v4290_v29 = vcombine.low %v1692_v50, %v1693_v5  ;;  %v820_v30 = vsel %vm4778_vm11, %v815_v19, %v4669_v13  ;;  %vm1272_vm4 = vmpackc.low %vm1176_vm3, %vm1176_vm3  ;;  %v316_v34 = vand.u32 15, %v4656_v11  ;;  %v330_v35 = vand.u32 15, %v192_v59 }
  0x2c   : > { %vm4839_vm5 = vcmp.ne.s16.totalorder %v820_v30, 0  ;;  %v1350_v41 = vor.u32 %v1348_v12, %v1347_v24  ;;  %v1304_v45 = vsel %vm1272_vm4, 65537, %v7814_v2  ;;  %v1352_v46 = vrot.slane %v1347_v24, 4 }
  0x2d   : > { %2403 = vrot.lane.b32.xlu0 %v4290_v29, %s4597_s19  ;;  %v1695_v16 = vsel %vm4839_vm5, %v4715_v32, 0  ;;  %v1363_v14 = vshrl.u32 %v1304_v45, 16  ;;  %v1366_v8 = vshll.u32 %v1304_v45, 16  ;;  %vm4848_vm6 = vcmp.lt.s32.totalorder %v302_v60, 15 }
  0x2e   : > { %v4291_v49 = vcombine.low %v1694_v3, %v1695_v16  ;;  %v1351_v50 = vsel %vm4828_vm1, %v4806_v9, %v1350_v41  ;;  %v4858_v51 = vsel %vm4828_vm1, %v1352_v46, %v4804_v7  ;;  %vm1188_vm7 = vcmp.lt.s32.totalorder %v316_v34, 15  ;;  %vm1282_vm8 = vmpackc.low %vm4848_vm6, %vm4848_vm6 }
  0x2f   : > { %vm4863_vm9 = vcmp.ne.s16.totalorder %v1351_v50, 0  ;;  %v4867_v54 = vrot.slane %v1363_v14, 7  ;;  %vm7818_vm12 = vcmp.ne.s16.totalorder %v4858_v51, 0  ;;  %vm7820_vm13 = vcmask 1042432   ;;  %vm1284_vm4 = vmpackc.low %vm1188_vm7, %vm1188_vm7 }
  0x30   : > { %vm1190_vm3 = vcmp.lt.s32.totalorder %v330_v35, 15  ;;  %2405 = vrot.lane.b32.xlu1 %v4291_v49, %s4597_s19  ;;  %v1657_v55 = vsel %vm4863_vm9, %v4680_v17, 0  ;;  %v1658_v56 = vsel %vm7818_vm12, %v4701_v25, 0  ;;  %v4878_v58 = vsel %vm1282_vm8, 65537, %v7814_v2 }
  0x31   : > { %vm1286_vm6 = vmpackc.low %vm1190_vm3, %vm1190_vm3  ;;  %7987 = vst [vmem:[#allocation12_spill] sm:$0xff] %v4878_v58  ;;  %v1316_v59 = vsel %vm1284_vm4, 65537, %v7814_v2  ;;  %v4273_v60 = vcombine.low %v1656_v28, %v1657_v55  ;;  %v1368_v62 = vor.u32 %v1366_v8, %v4867_v54  ;;  %v1453_v0 = vshrl.u32 %v4878_v58, 16 }
  0x32   : > { %v1318_v63 = vsel %vm1286_vm6, 65537, %v7814_v2  ;;  %v1471_v4 = vshrl.u32 %v1316_v59, 16  ;;  %v1474_v12 = vshll.u32 %v1316_v59, 16  ;;  %v194_v29 = vadd.s32 152, %v4634_v1 }
  0x33   : > { %v1489_v17 = vshrl.u32 %v1318_v63, 16  ;;  %v1492_v19 = vshll.u32 %v1318_v63, 16  ;;  %v2253_v3 = vrot.slane %v4273_v60, 5  ;;  %v1369_v5 = vsel %vm4828_vm1, %v4806_v9, %v1368_v62 }
  0x34   : > { %v4887_v24 = vrot.slane %v1453_v0, 7  ;;  %vm4890_vm7 = vcmp.ne.s16.totalorder %v1369_v5, 0  ;;  %v1473_v30 = vrot.slane %v1471_v4, 7  ;;  %v180_v35 = vadd.s32 40, %v4634_v1  ;;  %v5304_v4 = vld [vmem:[%s4661_s17 + $0x28] sm:$0xf] }
  0x35   : > { %v1491_v34 = vrot.slane %v1489_v17, 7  ;;  %2286 = vrot.lane.b32.xlu0 %v2253_v3, %s4598_s20  ;;  %v1659_v41 = vsel %vm4890_vm7, %v4704_v26, 0  ;;  %v344_v46 = vand.u32 15, %v194_v29  ;;  %v1370_v16 = vrot.slane %v4867_v54, 4 }
  0x36   : > { %7988 = vst [vmem:[#allocation13_spill] sm:$0xff] %v4887_v24  ;;  %v1460_v45 = vrot.slane %v4887_v24, 4  ;;  %v4901_v14 = vcombine.low %v1658_v56, %v1659_v41  ;;  %v1476_v8 = vor.u32 %v1474_v12, %v1473_v30  ;;  %v1478_v11 = vrot.slane %v1473_v30, 4 }
  0x37   : > { %v1494_v49 = vor.u32 %v1492_v19, %v1491_v34  ;;  %vm4908_vm8 = vcmp.lt.s32.totalorder %v344_v46, 15  ;;  %v1496_v59 = vrot.slane %v1491_v34, 4  ;;  %v246_v60 = vand.u32 15, %v180_v35 }
  0x38   : > { %v4906_v50 = vsel %vm4828_vm1, %v1460_v45, %v4804_v7  ;;  %v7813_v62 = vrot.slane %v4901_v14, 5  ;;  %v1477_v54 = vsel %vm4828_vm1, %v4806_v9, %v1476_v8  ;;  %v4919_v56 = vsel %vm4828_vm1, %v1478_v11, %v4804_v7  ;;  %vm1288_vm3 = vmpackc.low %vm4908_vm8, %vm4908_vm8 }
  0x39   : > { %v1495_v63 = vsel %vm4828_vm1, %v4806_v9, %v1494_v49  ;;  %vm7812_vm4 = vcmp.ne.s16.totalorder %v4906_v50, 0  ;;  %vm4928_vm6 = vcmp.ne.s16.totalorder %v1477_v54, 0  ;;  %vm7811_vm10 = vcmp.ne.s16.totalorder %v4919_v56, 0 }
  0x3a   : > { %vm4933_vm2 = vcmp.ne.s16.totalorder %v1495_v63, 0  ;;  %v2255_v12 = vsel %vm7820_vm13, %v2253_v3, %v7813_v62  ;;  %v1670_v17 = vsel %vm7812_vm4, %v4683_v18, 0  ;;  %v1671_v19 = vsel %vm4928_vm6, %v4688_v20, 0 }
  0x3b   : > { %v1672_v5 = vsel %vm7811_vm10, %v4691_v21, 0  ;;  %2288 = vrot.lane.b32.xlu1 %v2255_v12, %s4598_s20  ;;  %v1673_v29 = vsel %vm4933_vm2, %v4694_v22, 0  ;;  %v4953_v30 = vcombine.low %v1670_v17, %v1671_v19  ;;  %v1320_v3 = vsel %vm1288_vm3, 65537, %v7814_v2 }
  0x3c   : > { %v4959_v18 = vsel %vm4828_vm1, %v1496_v59, %v4804_v7  ;;  %v4281_v20 = vcombine.low %v1672_v5, %v1673_v29  ;;  %v1507_v34 = vshrl.u32 %v1320_v3, 16  ;;  %v1510_v35 = vshll.u32 %v1320_v3, 16 }
  0x3d   : > { %7997 = vst [vmem:[#allocation14_spill] sm:$0xff] %v4953_v30  ;;  %vm7817_vm8 = vcmp.ne.s16.totalorder %v4959_v18, 0  ;;  %v7821_v41 = vrot.slane %v4953_v30, 5  ;;  %vm1178_vm10 = vcmp.lt.s32.totalorder %v246_v60, 15  ;;  %v4969_v46 = vsel %vm4828_vm1, %v1370_v16, %v4804_v7 }
  0x3e   : > { %v1674_v45 = vsel %vm7817_vm8, %v4707_v27, 0  ;;  %v2268_v8 = vrot.slane %v4281_v20, 5  ;;  %v1509_v11 = vrot.slane %v1507_v34, 7  ;;  %vm1274_vm3 = vmpackc.low %vm1178_vm10, %vm1178_vm10  ;;  %vm7816_vm4 = vcmp.ne.s16.totalorder %v4969_v46, 0 }
  0x3f   : > { %v196_v49 = vadd.s32 168, %v4634_v1  ;;  %v1306_v55 = vsel %vm1274_vm3, 65537, %v7814_v2  ;;  %v1660_v59 = vsel %vm7816_vm4, %v4715_v32, 0  ;;  %v191_v60 = vadd.s32 128, %v4634_v1 }
  0x40   : > { %v193_v54 = vadd.s32 144, %v4634_v1  ;;  %v2269_v16 = vsel %vm7820_vm13, %v7821_v41, %v2268_v8  ;;  %v1512_v63 = vor.u32 %v1510_v35, %v1509_v11  ;;  %v1381_v12 = vshrl.u32 %v1306_v55, 16 }
  0x41   : > { %v1384_v17 = vshll.u32 %v1306_v55, 16  ;;  %2302 = vrot.lane.b32.xlu0 %v2269_v16, %s4598_s20  ;;  %v358_v19 = vand.u32 15, %v196_v49  ;;  %v1514_v5 = vrot.slane %v1509_v11, 4  ;;  %v323_v29 = vand.u32 15, %v191_v60 }
  0x42   : > { %v337_v3 = vand.u32 15, %v193_v54  ;;  %v1513_v20 = vsel %vm4828_vm1, %v4806_v9, %v1512_v63  ;;  %v4986_v34 = vrot.slane %v1381_v12, 7  ;;  %v179_v62 = vadd.s32 32, %v4634_v1 }
  0x43   : > { %v4990_v2 = vadd.s32 160, %v4634_v1  ;;  %vm4992_vm10 = vcmp.ne.s16.totalorder %v1513_v20, 0  ;;  %vm1194_vm3 = vcmp.lt.s32.totalorder %v358_v19, 15  ;;  %v4999_v11 = vsel %vm4828_vm1, %v1514_v5, %v4804_v7 }
  0x44   : > { %7998 = vst [vmem:[#allocation15_spill] sm:$0xff] %v4986_v34  ;;  %vm640_vm4 = vcmp.ge.s32.totalorder %v323_v29, 1  ;;  %v1675_v49 = vsel %vm4992_vm10, %v4712_v31, 0  ;;  %v1386_v55 = vor.u32 %v1384_v17, %v4986_v34  ;;  %vm1290_vm8 = vmpackc.low %vm1194_vm3, %vm1194_vm3  ;;  %vm7829_vm12 = vcmp.ne.s16.totalorder %v4999_v11, 0 }
  0x45   : > { %vm5006_vm0 = vcmp.ge.s32.totalorder %v337_v3, 1  ;;  %v4282_v54 = vcombine.low %v1674_v45, %v1675_v49  ;;  %v8003_v16 = vmov 0   ;;  %v1676_v12 = vsel %vm7829_vm12, %v4723_v43, 0  ;;  %vm736_vm13 = vmpackc.low %vm640_vm4, %vm640_vm4 }
  0x46   : > { %v1322_v63 = vsel %vm1290_vm8, 65537, %v8003_v16  ;;  %v239_v19 = vand.u32 15, %v179_v62  ;;  %v1387_v17 = vsel %vm4828_vm1, %v4806_v9, %v1386_v55  ;;  %v768_v3 = vsel %vm736_vm13, 65537, %v8003_v16  ;;  %vm738_vm3 = vmpackc.low %vm5006_vm0, %vm5006_vm0 }
  0x47   : > { %v1525_v5 = vshrl.u32 %v1322_v63, 16  ;;  %v1528_v29 = vshll.u32 %v1322_v63, 16  ;;  %v2270_v45 = vrot.slane %v4282_v54, 5  ;;  %vm5021_vm8 = vcmp.ne.s16.totalorder %v1387_v17, 0 }
  0x48   : > { %v947_v49 = vshll.u32 %v768_v3, 16  ;;  %v951_v41 = vshrl.u32 %v768_v3, 16  ;;  %v1661_v62 = vsel %vm5021_vm8, %v4720_v38, 0  ;;  %v770_v63 = vsel %vm738_vm3, 65537, %v8003_v16 }
  0x49   : > { %v5028_v55 = vrot.slane %v1525_v5, 7  ;;  %vm628_vm13 = vcmp.ge.s32.totalorder %v239_v19, 1  ;;  %vm8007_vm4 = vcmask 1042432   ;;  %v5032_v30 = vcombine.low %v1660_v59, %v1661_v62 }
  0x4a   : > { %v2271_v60 = vsel %vm8007_vm4, %v2268_v8, %v2270_v45  ;;  %v949_v54 = vrot.slane %v947_v49, 5  ;;  %v953_v17 = vrot.slane %v951_v41, 4  ;;  %vm724_vm0 = vmpackc.low %vm628_vm13, %vm628_vm13  ;;  %v967_v61 = vshll.u32 %v770_v63, 16 }
  0x4b   : > { %8006 = vst [vmem:[#allocation16_spill] sm:$0xff] %v5028_v55  ;;  %8008 = vst [vmem:[#allocation17_spill] sm:$0xff] %v5032_v30  ;;  %2304 = vrot.lane.b32.xlu1 %v2271_v60, %s4598_s20  ;;  %v1530_v3 = vor.u32 %v1528_v29, %v5028_v55  ;;  %v971_v53 = vshrl.u32 %v770_v63, 16  ;;  %v756_v24 = vsel %vm724_vm0, 65537, %v8003_v16  ;;  %v7828_v5 = vrot.slane %v5032_v30, 5 }
  0x4c   : > { %v950_v19 = vsel %vm4778_vm11, %v4759_v40, %v949_v54  ;;  %v954_v8 = vor.u32 %v953_v17, %v949_v54  ;;  %v827_v59 = vshll.u32 %v756_v24, 16  ;;  %v969_v29 = vrot.slane %v967_v61, 5  ;;  %vm8012_vm13 = vmmov %vm8007_vm4 }
  0x4d   : > { %v1531_v41 = vsel %vm4828_vm1, %v4806_v9, %v1530_v3  ;;  %vm5044_vm3 = vcmp.ne.s16.totalorder %v950_v19, 0  ;;  %v973_v62 = vrot.slane %v971_v53, 4  ;;  %v8011_v63 = vrot.slane %v4901_v14, 5 }
  0x4e   : > { %vm5053_vm4 = vcmp.ne.s16.totalorder %v1531_v41, 0  ;;  %v955_v54 = vrot.slane %v954_v8, 4  ;;  %v1708_v17 = vsel %vm5044_vm3, %v4694_v22, 0  ;;  %v970_v61 = vsel %vm4778_vm11, %v4759_v40, %v969_v29 }
  0x4f   : > { %v2257_v60 = vsel %vm8012_vm13, %v8011_v63, %v7828_v5  ;;  %v1677_v53 = vsel %vm5053_vm4, %v4726_v48, 0  ;;  %v974_v14 = vor.u32 %v973_v62, %v969_v29  ;;  %v829_v3 = vrot.slane %v827_v59, 5 }
  0x50   : > { %2290 = vrot.lane.b32.xlu0 %v2257_v60, %s4598_s20  ;;  %v5067_v19 = vcombine.low %v1676_v12, %v1677_v53  ;;  %v960_v8 = vsel %vm4778_vm11, %v955_v54, %v4669_v13  ;;  %vm5072_vm0 = vcmp.ne.s16.totalorder %v970_v61, 0  ;;  %v8016_v41 = vmov 0  ;;  %v5088_v54 = vld [vmem:[%s4661_s17 + $0x20] sm:$0xf] }
  0x51   : > { %v8017_v41 = vsel %vm5072_vm0, 4294967295, %v8016_v41  ;;  %v831_v63 = vshrl.u32 %v756_v24, 16  ;;  %vm5076_vm13 = vcmp.ne.s16.totalorder %v960_v8, 0  ;;  %v8019_v60 = vmov 0 }
  0x52   : > { %8015 = vst [vmem:[#allocation18_spill] sm:$0xff] %v5067_v19  ;;  %8018 = vst [vmem:[#allocation19_spill] sm:$0xff] %v8017_v41  ;;  %v8020_v60 = vsel %vm5076_vm13, 4294967295, %v8019_v60  ;;  %v975_v5 = vrot.slane %v974_v14, 4  ;;  %v7834_v29 = vrot.slane %v5067_v19, 5  ;;  %v1709_v12 = vsel %vm5076_vm13, %v4707_v27, 0 }
  0x53   : > { %v830_v59 = vsel %vm4778_vm11, %v4759_v40, %v829_v3  ;;  %v833_v62 = vrot.slane %v831_v63, 4  ;;  %v4298_v53 = vcombine.low %v1708_v17, %v1709_v12  ;;  %v1710_v61 = vsel %vm5072_vm0, %v4712_v31, 0  ;;  %v5105_v17 = vld [vmem:[%s4661_s17 + $0x1c] sm:$0xf] }
  0x54   : > { %v980_v24 = vsel %vm4778_vm11, %v975_v5, %v4669_v13  ;;  %v351_v14 = vand.u32 15, %v4990_v2  ;;  %vm8021_vm12 = vcmask 1042432   ;;  %v8022_v63 = vmov 0 }
  0x55   : > { %v2273_v8 = vsel %vm8021_vm12, %v2270_v45, %v7834_v29  ;;  %vm5100_vm1 = vcmp.ne.s16.totalorder %v980_v24, 0  ;;  %v834_v12 = vor.u32 %v833_v62, %v829_v3  ;;  %2419 = vrot.lane.b32.xlu0 %v4298_v53, %s4597_s19  ;;  %vm5112_vm0 = vcmp.ne.s16.totalorder %v830_v59, 0  ;;  %v5119_v3 = vld [vmem:[%s4661_s17 + $0x60] sm:$0xf] }
  0x56   : > { %v8023_v63 = vsel %vm5100_vm1, 4294967295, %v8022_v63  ;;  %2306 = vrot.lane.b32.xlu1 %v2273_v8, %s4598_s20  ;;  %v1711_v2 = vsel %vm5100_vm1, %v4723_v43, 0  ;;  %v8025_v5 = vmov 0  ;;  %vm644_vm12 = vcmp.ge.s32.totalorder %v351_v14, 1  ;;  %v5129_v8 = vld [vmem:[%s4661_s17 + $0x5c] sm:$0xf] }
  0x57   : > { %8024 = vst [vmem:[#allocation20_spill] sm:$0xff] %v8023_v63  ;;  %v8026_v5 = vsel %vm5112_vm0, 4294967295, %v8025_v5  ;;  %v4260_v45 = vcombine.low %v5105_v17, %v5088_v54  ;;  %v4299_v24 = vcombine.low %v1710_v61, %v1711_v2  ;;  %v835_v29 = vrot.slane %v834_v12, 4  ;;  %vm740_vm13 = vmpackc.low %vm644_vm12, %vm644_vm12 }
  0x58   : > { %8027 = vst [vmem:[#allocation21_spill] sm:$0xff] %v8026_v5  ;;  %v772_v62 = vsel %vm740_vm13, 65537, %v8003_v16  ;;  %v1696_v59 = vsel %vm5112_vm0, %v4720_v38, 0  ;;  %v8028_v61 = vmov 0  ;;  %v4268_v2 = vcombine.low %v5129_v8, %v5119_v3 }
  0x59   : > { %v840_v53 = vsel %vm4778_vm11, %v835_v29, %v4669_v13  ;;  %v987_v14 = vshll.u32 %v772_v62, 16  ;;  %v991_v19 = vshrl.u32 %v772_v62, 16  ;;  %v2019_v12 = vshrl.u32 %v4260_v45, 16 }
  0x5a   : > { %2421 = vrot.lane.b32.xlu1 %v4299_v24, %s4597_s19  ;;  %vm5132_vm1 = vcmp.ne.s16.totalorder %v840_v53, 0  ;;  %v2022_v23 = vshll.u32 %v4260_v45, 16  ;;  %v8031_v53 = vmov 0  ;;  %v2091_v63 = vshrl.u32 %v4268_v2, 16 }
  0x5b   : > { %v8029_v61 = vsel %vm5132_vm1, 4294967295, %v8028_v61  ;;  %v1697_v29 = vsel %vm5132_vm1, %v5105_v17, 0  ;;  %v989_v30 = vrot.slane %v987_v14, 5  ;;  %v993_v9 = vrot.slane %v991_v19, 4 }
  0x5c   : > { %8030 = vst [vmem:[#allocation22_spill] sm:$0xff] %v8029_v61  ;;  %v4292_v16 = vcombine.low %v1696_v59, %v1697_v29  ;;  %vm8034_vm12 = vcmp.ne.s16.totalorder %v4804_v7, 0  ;;  %v2021_v19 = vrot.slane %v2019_v12, 4  ;;  %v2024_v45 = vrot.slane %v2022_v23, 5 }
  0x5d   : > { %v990_v24 = vsel %vm4778_vm11, %v4759_v40, %v989_v30  ;;  %v994_v62 = vor.u32 %v993_v9, %v989_v30  ;;  %v1726_v41 = vsel %vm8034_vm12, %v4701_v25, 0  ;;  %v2094_v59 = vshll.u32 %v4268_v2, 16 }
  0x5e   : > { %2407 = vrot.lane.b32.xlu0 %v4292_v16, %s4597_s19  ;;  %vm5145_vm13 = vcmp.ne.s16.totalorder %v990_v24, 0  ;;  %v1727_v9 = vsel %vm4863_vm9, %v4704_v26, 0  ;;  %vm8035_vm1 = vcmp.ne.s16.totalorder %v4858_v51, 0  ;;  %v1729_v25 = vsel %vm4890_vm7, %v4720_v38, 0 }
  0x5f   : > { %v8032_v53 = vsel %vm5145_vm13, 4294967295, %v8031_v53  ;;  %v995_v14 = vrot.slane %v994_v62, 4  ;;  %v1712_v29 = vsel %vm5145_vm13, %v4726_v48, 0  ;;  %v1728_v30 = vsel %vm8035_vm1, %v4715_v32, 0 }
  0x60   : > { %8033 = vst [vmem:[#allocation23_spill] sm:$0xff] %v8032_v53  ;;  %vm8036_vm12 = vcmp.ne.s16.totalorder %v4906_v50, 0  ;;  %v1741_v26 = vsel %vm4928_vm6, %v4694_v22, 0  ;;  %vm8037_vm13 = vcmp.ne.s16.totalorder %v4919_v56, 0  ;;  %v1745_v24 = vsel %vm4992_vm10, %v4726_v48, 0 }
  0x61   : > { %v1000_v23 = vsel %vm4778_vm11, %v995_v14, %v4669_v13  ;;  %v1740_v16 = vsel %vm8036_vm12, %v4691_v21, 0  ;;  %v1742_v12 = vsel %vm8037_vm13, %v4707_v27, 0  ;;  %v1743_v21 = vsel %vm4933_vm2, %v4712_v31, 0 }
  0x62   : > { %vm5176_vm1 = vcmp.ne.s16.totalorder %v1000_v23, 0  ;;  %2451 = vrot.lane.b32.xlu0 %v4740_v57, %s4599_s21  ;;  %vm8040_vm12 = vcmp.ne.s16.totalorder %v4959_v18, 0  ;;  %v5194_v14 = vor.u32 %v2024_v45, %v2021_v19  ;;  %v2093_v23 = vrot.slane %v2091_v63, 4 }
  0x63   : > { %v1744_v22 = vsel %vm8040_vm12, %v4723_v43, 0  ;;  %v1713_v62 = vsel %vm5176_vm1, %v5129_v8, 0  ;;  %v2096_v13 = vrot.slane %v2094_v59, 5  ;;  %v4308_v33 = vcombine.low %v1726_v41, %v1727_v9 }
  0x64   : > { %v4300_v57 = vcombine.low %v1712_v29, %v1713_v62  ;;  %v4309_v40 = vcombine.low %v1728_v30, %v1729_v25  ;;  %v5196_v53 = vcombine.low %v1740_v16, %v1741_v26  ;;  %v4316_v55 = vcombine.low %v1742_v12, %v1743_v21  ;;  %v1759_v29 = vld [vmem:[%s4661_s17 + $0x10] sm:$0x8] }
  0x65   : > { %v5198_v34 = vcombine.low %v1744_v22, %v1745_v24  ;;  %vm8042_vm13 = vsmask.f32 3328  ;;  %vm8043_vm12 = vcmp.ne.s16.totalorder %v4969_v46, 0  ;;  %v1731_v63 = vsel %vm5021_vm8, %v5088_v54, 0 }
  0x66   : > { %8041 = vst [vmem:[#allocation24_spill] sm:$0xff] %v5196_v53  ;;  %2423 = vrot.lane.b32.xlu1 %v4300_v57, %s4597_s19  ;;  %2467 = vrot.lane.b32.xlu0 %v4763_v42, %s4599_s21  ;;  %v5206_v19 = vsel %vm8042_vm13, %v4755_v37, %v5194_v14  ;;  %v1730_v41 = vsel %vm8043_vm12, %v5105_v17, 0  ;;  %v5214_v45 = vor.u32 %v2096_v13, %v2093_v23  ;;  %v2568_v59 = vrot.slane %v4308_v33, 5 }
  0x67   : > { %v2569_v9 = vrot.slane %v4309_v40, 5  ;;  %v7867_v30 = vrot.slane %v5196_v53, 5  ;;  %v2583_v25 = vrot.slane %v4316_v55, 5  ;;  %v2585_v16 = vrot.slane %v5198_v34, 5 }
  0x68   : > { %v5223_v26 = vcombine.low %v1730_v41, %v1731_v63  ;;  %vm8044_vm13 = vcmp.ne.s16.totalorder %v4999_v11, 0  ;;  %v1747_v40 = vsel %vm5053_vm4, %v5119_v3, 0  ;;  %vm8045_vm12 = vcmp.ne.s16.totalorder %v4757_v39, 0 }
  0x69   : > { %v1746_v13 = vsel %vm8044_vm13, %v5129_v8, 0  ;;  %v1762_v33 = vsel %vm8045_vm12, %v1759_v29, 0  ;;  %vm8046_vm11 = vcmp.ne.s16.totalorder %v4804_v7, 0  ;;  %v1763_v55 = vsel %vm4815_vm15, %v4715_v32, 0 }
  0x6a   : > { %2453 = vrot.lane.b32.xlu1 %v4773_v6, %s4599_s21  ;;  %2455 = vrot.lane.b32.xlu0 %v5206_v19, %s4599_s21  ;;  %v1796_v6 = vsel %vm8046_vm11, %v4715_v32, 0  ;;  %v1797_v12 = vsel %vm4863_vm9, %v4720_v38, 0  ;;  %vm8047_vm13 = vcmp.ne.s16.totalorder %v4858_v51, 0  ;;  %v1799_v22 = vsel %vm4890_vm7, %v5088_v54, 0 }
  0x6b   : > { %v1798_v21 = vsel %vm8047_vm13, %v5105_v17, 0  ;;  %vm8048_vm12 = vsmask.f32 3328  ;;  %vm8049_vm11 = vcmask 1042432   ;;  %vm8052_vm7 = vcmp.ne.s16.totalorder %v4906_v50, 0 }
  0x6c   : > { %v5251_v24 = vsel %vm8048_vm12, %v4765_v44, %v5214_v45  ;;  %v2570_v62 = vsel %vm8049_vm11, %v2568_v59, %v2569_v9  ;;  %vm8050_vm15 = vmmov %vm8049_vm11  ;;  %v5263_v44 = vcombine.low %v1796_v6, %v1797_v12  ;;  %v4344_v52 = vcombine.low %v1798_v21, %v1799_v22 }
  0x6d   : > { %v2584_v32 = vsel %vm8050_vm15, %v7867_v30, %v2583_v25  ;;  %vm8051_vm9 = vmmov %vm8049_vm11  ;;  %v1810_v28 = vsel %vm8052_vm7, %v4707_v27, 0  ;;  %v1811_v57 = vsel %vm4928_vm6, %v4712_v31, 0  ;;  %v7870_v23 = vrot.slane %v5223_v26, 5 }
  0x6e   : > { %v2586_v51 = vsel %vm8051_vm9, %v2583_v25, %v2585_v16  ;;  %2469 = vrot.lane.b32.xlu1 %v4786_v47, %s4599_s21  ;;  %2601 = vrot.lane.b32.xlu0 %v2568_v59, %s4600_s22  ;;  %v5272_v41 = vcombine.low %v1746_v13, %v1747_v40  ;;  %v4325_v63 = vcombine.low %v1762_v33, %v1763_v55  ;;  %v1764_v59 = vsel %vm4811_vm14, %v4720_v38, 0  ;;  %v5291_v13 = vld [vmem:[%s4661_s17 + $0x24] sm:$0xf] }
  0x6f   : > { %v7873_v29 = vrot.slane %v5263_v44, 5  ;;  %v2884_v25 = vrot.slane %v4344_v52, 5  ;;  %vm8053_vm15 = vcmp.ne.s16.totalorder %v4919_v56, 0  ;;  %v1813_v50 = vsel %vm4933_vm2, %v4726_v48, 0  ;;  %v5294_v40 = vld [vmem:[%s4661_s17 + $0x64] sm:$0xf]  ;;  %vm8055_vm2 = vmmov %vm8051_vm9 }
  0x70   : > { %v1812_v27 = vsel %vm8053_vm15, %v4723_v43, 0  ;;  %v1765_v0 = vsel %vm4839_vm5, %v5105_v17, 0  ;;  %v1778_v38 = vsel %vm5044_vm3, %v4712_v31, 0  ;;  %v5296_v33 = vcombine.low %v1810_v28, %v1811_v57  ;;  %vm8058_vm12 = vmmov %vm8055_vm2 }
  0x71   : > { %v5298_v56 = vcombine.low %v1812_v27, %v1813_v50  ;;  %v5309_v6 = vsel %vm8055_vm2, %v7873_v29, %v2884_v25  ;;  %vm8056_vm6 = vcmp.ne.s16.totalorder %v4959_v18, 0  ;;  %v1815_v55 = vsel %vm4992_vm10, %v5119_v3, 0  ;;  %v5328_v18 = vld [vmem:[%s4661_s17 + $0x68] sm:$0xf]  ;;  %vm8064_vm9 = vmmov %vm8055_vm2 }
  0x72   : > { %8054 = vst [vmem:[#allocation25_spill] sm:$0xff] %v5296_v33  ;;  %2471 = vrot.lane.b32.xlu1 %v5251_v24, %s4599_s21  ;;  %2617 = vrot.lane.b32.xlu0 %v2584_v32, %s4600_s22  ;;  %v1814_v31 = vsel %vm8056_vm6, %v5129_v8, 0  ;;  %vm8057_vm13 = vcmp.ne.s16.totalorder %v4969_v46, 0  ;;  %v2572_v21 = vsel %vm8058_vm12, %v2569_v9, %v7870_v23  ;;  %v7871_v22 = vrot.slane %v5272_v41, 5  ;;  %vm8065_vm7 = vmmov %vm8055_vm2 }
  0x73   : > { %v1800_v12 = vsel %vm8057_vm13, %v5291_v13, 0  ;;  %vm8059_vm11 = vnez %v8020_v60  ;;  %v7872_v52 = vrot.slane %v5298_v56, 5  ;;  %v4352_v35 = vcombine.low %v1814_v31, %v1815_v55 }
  0x74   : > { %v1779_v32 = vsel %vm8059_vm11, %v4723_v43, 0  ;;  %v1801_v46 = vsel %vm5021_vm8, %v5304_v4, 0  ;;  %vm8060_vm10 = vcmp.ne.s16.totalorder %v4999_v11, 0  ;;  %v1817_v9 = vsel %vm5053_vm4, %v5328_v18, 0  ;;  %vm8062_vm4 = vmmov %vm8055_vm2 }
  0x75   : > { %v1816_v28 = vsel %vm8060_vm10, %v5294_v40, 0  ;;  %v4326_v57 = vcombine.low %v1764_v59, %v1765_v0  ;;  %v5340_v27 = vcombine.low %v1800_v12, %v1801_v46  ;;  %v182_v50 = vadd.s32 56, %v4634_v1  ;;  %vm8069_vm12 = vmmov %vm8062_vm4 }
  0x76   : > { %v5342_v43 = vcombine.low %v1816_v28, %v1817_v9  ;;  %2603 = vrot.lane.b32.xlu1 %v2570_v62, %s4600_s22  ;;  %2605 = vrot.lane.b32.xlu0 %v2572_v21, %s4600_s22  ;;  %v4333_v20 = vcombine.low %v1778_v38, %v1779_v32  ;;  %v1766_v11 = vsel %vm5112_vm0, %v5088_v54, 0  ;;  %v2900_v31 = vrot.slane %v4352_v35, 5  ;;  %v8063_v21 = vld [vmem:[#allocation15_spill] sm:$0xff]  ;;  %v8066_v9 = vld [vmem:[#allocation16_spill] sm:$0xff] }
  0x77   : > { %v198_v58 = vadd.s32 184, %v4634_v1  ;;  %v7869_v59 = vrot.slane %v5340_v27, 5  ;;  %v260_v55 = vand.u32 15, %v182_v50  ;;  %v184_v12 = vadd.s32 72, %v4634_v1 }
  0x78   : > { %v7868_v0 = vrot.slane %v5342_v43, 5  ;;  %vm8061_vm8 = vnez %v8029_v61  ;;  %v5360_v38 = vsel %vm8062_vm4, %v7872_v52, %v2900_v31  ;;  %v1388_v32 = vrot.slane %v8063_v21, 4 }
  0x79   : > { %v1767_v62 = vsel %vm8061_vm8, %v5291_v13, 0  ;;  %v372_v35 = vand.u32 15, %v198_v58  ;;  %v5366_v46 = vsel %vm8064_vm9, %v2884_v25, %v7869_v59  ;;  %vm1180_vm15 = vcmp.lt.s32.totalorder %v260_v55, 15  ;;  %v8067_v58 = vld [vmem:[#allocation19_spill] sm:$0xff] }
  0x7a   : > { %v5371_v28 = vsel %vm8065_vm7, %v2900_v31, %v7868_v0  ;;  %v1532_v50 = vrot.slane %v8066_v9, 4  ;;  %2619 = vrot.lane.b32.xlu1 %v2586_v51, %s4600_s22  ;;  %2718 = vrot.lane.b32.xlu0 %v4325_v63, %s4601_s23  ;;  %vm8068_vm2 = vnez %v8067_v58  ;;  %v4261_v25 = vcombine.low %v5291_v13, %v5304_v4  ;;  %vm1276_vm6 = vmpackc.low %vm1180_vm15, %vm1180_vm15  ;;  %v8070_v51 = vld [vmem:[#allocation20_spill] sm:$0xff] }
  0x7b   : > { %v1780_v21 = vsel %vm8068_vm2, %v4726_v48, 0  ;;  %vm1196_vm13 = vcmp.lt.s32.totalorder %v372_v35, 15  ;;  %v274_v30 = vand.u32 15, %v184_v12  ;;  %v2588_v31 = vsel %vm8069_vm12, %v2585_v16, %v7871_v22  ;;  %v8073_v48 = vld [vmem:[#allocation11_spill] sm:$0xff] }
  0x7c   : > { %vm8071_vm10 = vnez %v8070_v51  ;;  %v4327_v55 = vcombine.low %v1766_v11, %v1767_v62  ;;  %v8072_v9 = vmov 0   ;;  %vm1292_vm4 = vmpackc.low %vm1196_vm13, %vm1196_vm13  ;;  %vm8074_vm9 = vnez %v8073_v48 }
  0x7d   : > { %v1781_v63 = vsel %vm8071_vm10, %v5129_v8, 0  ;;  %v1308_v0 = vsel %vm1276_vm6, 65537, %v8072_v9  ;;  %v5393_v59 = vsel %vm8074_vm9, %v1388_v32, %v4804_v7  ;;  %v1324_v23 = vsel %vm1292_vm4, 65537, %v8072_v9 }
  0x7e   : > { %v1399_v12 = vshrl.u32 %v1308_v0, 16  ;;  %v1402_v35 = vshll.u32 %v1308_v0, 16  ;;  %v5399_v34 = vsel %vm8074_vm9, %v1532_v50, %v4804_v7  ;;  %v1543_v16 = vshrl.u32 %v1324_v23, 16  ;;  %2621 = vrot.lane.b32.xlu1 %v2588_v31, %s4600_s22  ;;  %2734 = vrot.lane.b32.xlu0 %v4333_v20, %s4601_s23 }
  0x7f   : > { %v1546_v22 = vshll.u32 %v1324_v23, 16  ;;  %v200_v11 = vadd.s32 200, %v4634_v1  ;;  %v2028_v62 = vshrl.u32 %v4261_v25, 16  ;;  %vm5406_vm7 = vcmp.lt.s32.totalorder %v274_v30, 15  ;;  %v8077_v30 = vld [vmem:[#allocation23_spill] sm:$0xff] }
  0x80   : > { %v5404_v32 = vrot.slane %v1399_v12, 7  ;;  %v181_v52 = vadd.s32 48, %v4634_v1  ;;  %v2031_v29 = vshll.u32 %v4261_v25, 16  ;;  %vm7878_vm15 = vcmp.ne.s16.totalorder %v5393_v59, 0  ;;  %vm1278_vm12 = vmpackc.low %vm5406_vm7, %vm5406_vm7 }
  0x81   : > { %v5412_v50 = vrot.slane %v1543_v16, 7  ;;  %v4334_v23 = vcombine.low %v1780_v21, %v1781_v63  ;;  %v4269_v31 = vcombine.low %v5294_v40, %v5328_v18  ;;  %vm7881_vm6 = vcmp.ne.s16.totalorder %v5399_v34, 0 }
  0x82   : > { %v1404_v20 = vor.u32 %v1402_v35, %v5404_v32  ;;  %vm8078_vm13 = vnez %v8077_v30  ;;  %v1783_v25 = vsel %vm5176_vm1, %v5294_v40, 0  ;;  %v386_v21 = vand.u32 15, %v200_v11  ;;  %2720 = vrot.lane.b32.xlu1 %v4326_v57, %s4601_s23  ;;  %2722 = vrot.lane.b32.xlu0 %v4327_v55, %s4601_s23  ;;  %v8079_v35 = vld [vmem:[#allocation10_spill] sm:$0xff] }
  0x83   : > { %v1782_v12 = vsel %vm8078_vm13, %v5119_v3, 0  ;;  %v1548_v42 = vor.u32 %v1546_v22, %v5412_v50  ;;  %v2030_v63 = vrot.slane %v2028_v62, 4  ;;  %v1662_v53 = vsel %vm7878_vm15, %v5105_v17, 0 }
  0x84   : > { %v1405_v16 = vsel %vm8074_vm9, %v8079_v35, %v1404_v20  ;;  %v253_v61 = vand.u32 15, %v181_v52  ;;  %v2033_v22 = vrot.slane %v2031_v29, 5  ;;  %v1678_v55 = vsel %vm7881_vm6, %v5129_v8, 0 }
  0x85   : > { %vm5436_vm4 = vcmp.ne.s16.totalorder %v1405_v16, 0  ;;  %v1549_v57 = vsel %vm8074_vm9, %v8079_v35, %v1548_v42  ;;  %v2100_v11 = vshrl.u32 %v4269_v31, 16  ;;  %v1310_v29 = vsel %vm1278_vm12, 65537, %v8072_v9 }
  0x86   : > { %v1663_v62 = vsel %vm5436_vm4, %v5088_v54, 0  ;;  %vm5449_vm7 = vcmp.ne.s16.totalorder %v1549_v57, 0  ;;  %v2103_v52 = vshll.u32 %v4269_v31, 16  ;;  %vm5459_vm15 = vcmp.lt.s32.totalorder %v386_v21, 15  ;;  %2736 = vrot.lane.b32.xlu1 %v4334_v23, %s4601_s23  ;;  %2766 = vrot.lane.b32.xlu0 %v4755_v37, %s4602_s24 }
  0x87   : > { %v5454_v20 = vcombine.low %v1662_v53, %v1663_v62  ;;  %v1679_v42 = vsel %vm5449_vm7, %v5119_v3, 0  ;;  %v4335_v16 = vcombine.low %v1782_v12, %v1783_v25  ;;  %vm5468_vm12 = vcmp.ge.s32.totalorder %v253_v61, 1  ;;  %vm1294_vm6 = vmpackc.low %vm5459_vm15, %vm5459_vm15  ;;  %v8088_v61 = vld [vmem:[#allocation17_spill] sm:$0xff] }
  0x88   : > { %v5466_v57 = vcombine.low %v1678_v55, %v1679_v42  ;;  %v197_v31 = vadd.s32 176, %v4634_v1  ;;  %v5473_v62 = vor.u32 %v2033_v22, %v2030_v63  ;;  %v1417_v5 = vshrl.u32 %v1310_v29, 16  ;;  %vm726_vm0 = vmpackc.low %vm5468_vm12, %vm5468_vm12  ;;  %v8091_v63 = vld [vmem:[#allocation18_spill] sm:$0xff] }
  0x89   : > { %v7885_v21 = vrot.slane %v5454_v20, 5  ;;  %v2102_v37 = vrot.slane %v2100_v11, 4  ;;  %v2105_v12 = vrot.slane %v2103_v52, 5  ;;  %v8089_v25 = vrot.slane %v8088_v61, 5 }
  0x8a   : > { %v7884_v23 = vrot.slane %v5466_v57, 5  ;;  %vm8090_vm8 = vcmask 1042432   ;;  %2738 = vrot.lane.b32.xlu1 %v4335_v16, %s4601_s23  ;;  %2782 = vrot.lane.b32.xlu0 %v4786_v47, %s4602_s24  ;;  %v8092_v22 = vrot.slane %v8091_v63, 5  ;;  %v365_v52 = vand.u32 15, %v197_v31 }
  0x8b   : > { %v5485_v55 = vsel %vm8090_vm8, %v8089_v25, %v7885_v21  ;;  %vm8093_vm15 = vmmov %vm8090_vm8  ;;  %vm8094_vm8 = vsmask.f32 3328  ;;  %v5505_v8 = vrot.slane %v1417_v5, 7  ;;  %v1420_v16 = vshll.u32 %v1310_v29, 16  ;;  %v5522_v29 = vld [vmem:[%s4661_s17 + $0x40] sm:$0xf] }
  0x8c   : > { %v5498_v11 = vsel %vm8093_vm15, %v8092_v22, %v7884_v23  ;;  %v5503_v42 = vsel %vm8094_vm8, %v5194_v14, %v5473_v62  ;;  %v1326_v53 = vsel %vm1294_vm6, 65537, %v8072_v9  ;;  %v758_v47 = vsel %vm726_vm0, 65537, %v8072_v9  ;;  %8097 = vst [vmem:[#allocation15_spill] sm:$0xff] %v5522_v29  ;;  %v4555_v22 = vld [vmem:[%s4661_s17 + $0x44] sm:$0xf]  ;;  %vm8098_vm0 = vmmov %vm8094_vm8 }
  0x8d   : > { %v5509_v61 = vor.u32 %v2105_v12, %v2102_v37  ;;  %v1406_v14 = vrot.slane %v5404_v32, 4  ;;  %v1561_v31 = vshrl.u32 %v1326_v53, 16  ;;  %vm5517_vm12 = vcmp.ge.s32.totalorder %v365_v52, 1 }
  0x8e   : > { %2768 = vrot.lane.b32.xlu1 %v5206_v19, %s4602_s24  ;;  %2770 = vrot.lane.b32.xlu0 %v5503_v42, %s4602_s24  ;;  %v1155_v37 = vsel %vm5044_vm3, %v5522_v29, 0  ;;  %v1422_v12 = vor.u32 %v1420_v16, %v5505_v8  ;;  %v847_v63 = vshll.u32 %v758_v47, 16  ;;  %v1156_v23 = vsel %vm8059_vm11, %v4555_v22, 0  ;;  %vm742_vm3 = vmpackc.low %vm5517_vm12, %vm5517_vm12 }
  0x8f   : > { %v183_v32 = vadd.s32 64, %v4634_v1  ;;  %v851_v21 = vshrl.u32 %v758_v47, 16  ;;  %v5532_v52 = vcombine.low %v1155_v37, %v1156_v23  ;;  %v199_v25 = vadd.s32 192, %v4634_v1  ;;  %vm8103_vm11 = vmmov %vm8093_vm15 }
  0x90   : > { %v5538_v51 = vsel %vm8098_vm0, %v5214_v45, %v5509_v61  ;;  %v8099_v49 = vrot.slane %v5263_v44, 5  ;;  %v5548_v60 = vrot.slane %v1561_v31, 7  ;;  %v1564_v23 = vshll.u32 %v1326_v53, 16 }
  0x91   : > { %v267_v16 = vand.u32 15, %v183_v32  ;;  %v379_v47 = vand.u32 15, %v199_v25  ;;  %v8101_v45 = vrot.slane %v5298_v56, 5  ;;  %v8102_v37 = vrot.slane %v5296_v33, 5 }
  0x92   : > { %2784 = vrot.lane.b32.xlu1 %v5251_v24, %s4602_s24  ;;  %2916 = vrot.lane.b32.xlu0 %v8099_v49, %s4603_s25  ;;  %8100 = vst [vmem:[#allocation16_spill] sm:$0xff] %v5548_v60  ;;  %v5558_v22 = vsel %vm8074_vm9, %v1406_v14, %v4804_v7  ;;  %v1423_v44 = vsel %vm8074_vm9, %v8079_v35, %v1422_v12  ;;  %v849_v31 = vrot.slane %v847_v63, 5  ;;  %v853_v49 = vrot.slane %v851_v21, 4 }
  0x93   : > { %v2899_v5 = vsel %vm8103_vm11, %v8102_v37, %v8101_v45  ;;  %v774_v53 = vsel %vm742_vm3, 65537, %v8072_v9  ;;  %vm632_vm6 = vcmp.ge.s32.totalorder %v267_v16, 1  ;;  %vm5564_vm15 = vcmp.ge.s32.totalorder %v379_v47, 1 }
  0x94   : > { %v1550_v25 = vrot.slane %v5412_v50, 4  ;;  %vm728_vm8 = vmpackc.low %vm632_vm6, %vm632_vm6  ;;  %vm7893_vm12 = vcmp.ne.s16.totalorder %v5558_v22, 0  ;;  %vm5573_vm0 = vcmp.ne.s16.totalorder %v1423_v44, 0  ;;  %v1566_v21 = vor.u32 %v1564_v23, %v5548_v60 }
  0x95   : > { %v760_v12 = vsel %vm728_vm8, 65537, %v8072_v9  ;;  %v1007_v63 = vshll.u32 %v774_v53, 16  ;;  %v1011_v32 = vshrl.u32 %v774_v53, 16  ;;  %vm744_vm3 = vmpackc.low %vm5564_vm15, %vm5564_vm15  ;;  %v854_v47 = vor.u32 %v853_v49, %v849_v31  ;;  %v4556_v53 = vld [vmem:[%s4661_s17 + $0x50] sm:$0xf] }
  0x96   : > { %2786 = vrot.lane.b32.xlu1 %v5538_v51, %s4602_s24  ;;  %2932 = vrot.lane.b32.xlu0 %v2899_v5, %s4603_s25  ;;  %v867_v50 = vshll.u32 %v760_v12, 16  ;;  %v871_v16 = vshrl.u32 %v760_v12, 16  ;;  %v5585_v45 = vsel %vm8074_vm9, %v1550_v25, %v4804_v7  ;;  %v1664_v5 = vsel %vm7893_vm12, %v5291_v13, 0  ;;  %v4557_v12 = vld [vmem:[%s4661_s17 + $0x54] sm:$0xf] }
  0x97   : > { %v1665_v44 = vsel %vm5573_vm0, %v5304_v4, 0  ;;  %v776_v49 = vsel %vm744_vm3, 65537, %v8072_v9  ;;  %v1159_v56 = vsel %vm8078_vm13, %v4556_v53, 0  ;;  %v1009_v25 = vrot.slane %v1007_v63, 5 }
  0x98   : > { %v5587_v37 = vrot.slane %v867_v50, 5  ;;  %v873_v23 = vrot.slane %v871_v16, 4  ;;  %v1160_v50 = vsel %vm5176_vm1, %v4557_v12, 0  ;;  %vm7892_vm11 = vcmp.ne.s16.totalorder %v5585_v45, 0 }
  0x99   : > { %v855_v16 = vrot.slane %v854_v47, 4  ;;  %v1027_v29 = vshll.u32 %v776_v49, 16  ;;  %v1031_v60 = vshrl.u32 %v776_v49, 16  ;;  %v5611_v7 = vcombine.low %v1159_v56, %v1160_v50  ;;  %v8113_v47 = vld [vmem:[#allocation8_spill] sm:$0xff]  ;;  %v8115_v49 = vld [vmem:[#allocation3_spill] sm:$0xff] }
  0x9a   : > { %2918 = vrot.lane.b32.xlu1 %v5309_v6, %s4603_s25  ;;  %2141 = vrot.lane.b32.xlu0 %v5206_v19, %s4596_s18  ;;  %v1567_v6 = vsel %vm8074_vm9, %v8079_v35, %v1566_v21  ;;  %v1013_v19 = vrot.slane %v1011_v32, 4  ;;  %v874_v33 = vor.u32 %v873_v23, %v5587_v37  ;;  %v5617_v30 = vcombine.low %v1664_v5, %v1665_v44  ;;  %v8112_v32 = vld [vmem:[#allocation6_spill] sm:$0xff]  ;;  %v5770_v35 = vld [vmem:[%s4661_s17 + $0x6c] sm:$0xf] }
  0x9b   : > { %8108 = vst [vmem:[#allocation19_spill] sm:$0xff] %v5611_v7  ;;  %vm5619_vm13 = vcmp.ne.s16.totalorder %v1567_v6, 0  ;;  %v1680_v63 = vsel %vm7892_vm11, %v5294_v40, 0  ;;  %vm8114_vm1 = vnez %v8113_v47  ;;  %vm8116_vm6 = vcmp.ne.s16.totalorder %v5393_v59, 0 }
  0x9c   : > { %8109 = vst [vmem:[#allocation23_spill] sm:$0xff] %v5617_v30  ;;  %v1014_v21 = vor.u32 %v1013_v19, %v1009_v25  ;;  %v850_v23 = vsel %vm8114_vm1, %v8112_v32, %v849_v31  ;;  %v1732_v5 = vsel %vm8116_vm6, %v5291_v13, 0  ;;  %v1681_v44 = vsel %vm5619_vm13, %v5328_v18, 0 }
  0x9d   : > { %v875_v53 = vrot.slane %v874_v33, 4  ;;  %v1029_v56 = vrot.slane %v1027_v29, 5  ;;  %v1033_v6 = vrot.slane %v1031_v60, 4  ;;  %v7891_v31 = vrot.slane %v5617_v30, 5 }
  0x9e   : > { %2934 = vrot.lane.b32.xlu1 %v5360_v38, %s4603_s25  ;;  %2920 = vrot.lane.b32.xlu0 %v5366_v46, %s4603_s25  ;;  %v860_v38 = vsel %vm8114_vm1, %v855_v16, %v8115_v49  ;;  %v5632_v46 = vpop.permute.xlu0 %2135  ;;  %v1733_v19 = vsel %vm5436_vm4, %v5304_v4, 0  ;;  %vm5648_vm15 = vcmp.ne.s16.totalorder %v850_v23, 0  ;;  %v8117_v12 = vmov 0  ;;  %v5665_v16 = vld [vmem:[%s4661_s17 + $0x30] sm:$0xf] }
  0x9f   : > { %v8118_v12 = vsel %vm5648_vm15, 4294967295, %v8117_v12  ;;  %vm5652_vm8 = vcmp.ne.s16.totalorder %v860_v38, 0  ;;  %v8120_v33 = vmov 0  ;;  %v1015_v29 = vrot.slane %v1014_v21, 4 }
  0xa0   : > { %8119 = vst [vmem:[#allocation17_spill] sm:$0xff] %v8118_v12  ;;  %v8121_v33 = vsel %vm5652_vm8, 4294967295, %v8120_v33  ;;  %v5656_v60 = vcombine.low %v1732_v5, %v1733_v19  ;;  %v870_v50 = vsel %vm8114_vm1, %v8112_v32, %v5587_v37  ;;  %vm8124_vm3 = vcmp.ne.s16.totalorder %v5399_v34, 0  ;;  %v4562_v12 = vld [vmem:[%s4661_s17 + $0x4c] sm:$0xf] }
  0xa1   : > { %8122 = vst [vmem:[#allocation18_spill] sm:$0xff] %v8121_v33  ;;  %v1748_v23 = vsel %vm8124_vm3, %v5294_v40, 0  ;;  %v1749_v21 = vsel %vm5449_vm7, %v5328_v18, 0  ;;  %v1034_v38 = vor.u32 %v1033_v6, %v1029_v56  ;;  %v8125_v37 = vrot.slane %v5454_v20, 5 }
  0xa2   : > { %2157 = vrot.lane.b32.xlu1 %v5251_v24, %s4596_s18  ;;  %2143 = vrot.lane.b32.xlu0 %v5503_v42, %s4596_s18  ;;  %v5658_v24 = vcombine.low %v1680_v63, %v1681_v44  ;;  %v880_v63 = vsel %vm8114_vm1, %v875_v53, %v8115_v49  ;;  %v7894_v5 = vrot.slane %v5656_v60, 5  ;;  %v5677_v44 = vcombine.low %v1748_v23, %v1749_v21  ;;  %v5698_v23 = vld [vmem:[%s4661_s17 + $0x2c] sm:$0xf] }
  0xa3   : > { %vm8126_vm6 = vcmask 1042432   ;;  %v1698_v53 = vsel %vm5648_vm15, %v5088_v54, 0  ;;  %v1699_v6 = vsel %vm5652_vm8, %v5291_v13, 0  ;;  %v1020_v20 = vsel %vm8114_vm1, %v1015_v29, %v8115_v49 }
  0xa4   : > { %8123 = vst [vmem:[#allocation26_spill] sm:$0xff] %v5658_v24  ;;  %v2261_v19 = vsel %vm8126_vm6, %v8125_v37, %v7891_v31  ;;  %v4262_v21 = vcombine.low %v5698_v23, %v5665_v16  ;;  %v8127_v54 = vrot.slane %v5223_v26, 5  ;;  %vm8128_vm3 = vmmov %vm8126_vm6  ;;  %v5716_v31 = vpop.permute.xlu1 %2151  ;;  %vm5718_vm6 = vcmp.ne.s16.totalorder %v870_v50, 0 }
  0xa5   : > { %v8129_v7 = vmov 0  ;;  %vm5722_vm11 = vcmp.ne.s16.totalorder %v880_v63, 0  ;;  %v8132_v29 = vmov 0  ;;  %v8135_v26 = vmov 0 }
  0xa6   : > { %2936 = vrot.lane.b32.xlu1 %v5371_v28, %s4603_s25  ;;  %2292 = vrot.lane.b32.xlu0 %v5485_v55, %s4598_s20  ;;  %v1010_v28 = vsel %vm8114_vm1, %v8112_v32, %v1009_v25  ;;  %v5700_v55 = vpop.permute.xlu0 %2137  ;;  %v5712_v13 = vsel %vm8128_vm3, %v8127_v54, %v7894_v5  ;;  %v7896_v25 = vrot.slane %v5677_v44, 5  ;;  %v8130_v7 = vsel %vm5718_vm6, 4294967295, %v8129_v7 }
  0xa7   : > { %8131 = vst [vmem:[#allocation27_spill] sm:$0xff] %v8130_v7  ;;  %v8133_v29 = vsel %vm5722_vm11, 4294967295, %v8132_v29  ;;  %vm5726_vm12 = vcmp.ne.s16.totalorder %v1010_v28, 0  ;;  %v1035_v54 = vrot.slane %v1034_v38, 4  ;;  %v8138_v5 = vrot.slane %v5272_v41, 5 }
  0xa8   : > { %8134 = vst [vmem:[#allocation28_spill] sm:$0xff] %v8133_v29  ;;  %v8136_v26 = vsel %vm5726_vm12, 4294967295, %v8135_v26  ;;  %v4293_v50 = vcombine.low %v1698_v53, %v1699_v6  ;;  %vm5740_vm9 = vcmp.ne.s16.totalorder %v1020_v20, 0  ;;  %v8139_v63 = vmov 0 }
  0xa9   : > { %8137 = vst [vmem:[#allocation29_spill] sm:$0xff] %v8136_v26  ;;  %v5735_v37 = vsel %vm8128_vm3, %v8138_v5, %v7896_v25  ;;  %v8140_v63 = vsel %vm5740_vm9, 4294967295, %v8139_v63  ;;  %v1030_v38 = vsel %vm8114_vm1, %v8112_v32, %v1029_v56  ;;  %v1700_v41 = vsel %vm5718_vm6, %v5304_v4, 0 }
  0xaa   : > { %2159 = vrot.lane.b32.xlu1 %v5538_v51, %s4596_s18  ;;  %2294 = vrot.lane.b32.xlu0 %v2261_v19, %s4598_s20  ;;  %8141 = vst [vmem:[#allocation30_spill] sm:$0xff] %v8140_v63  ;;  %v1701_v5 = vsel %vm5722_vm11, %v5698_v23, 0  ;;  %v2037_v28 = vshrl.u32 %v4262_v21, 16  ;;  %v2040_v25 = vshll.u32 %v4262_v21, 16  ;;  %v5754_v19 = vld [vmem:[%s4661_s17 + $0x70] sm:$0xf]  ;;  %v5764_v30 = vpop.permute.xlu0 %2139  ;;  %v1040_v21 = vsel %vm8114_vm1, %v1035_v54, %v8115_v49 }
  0xab   : > { %v8142_v53 = vrot.slane %v5658_v24, 5  ;;  %v8143_v6 = vrot.slane %v5466_v57, 5  ;;  %v1714_v56 = vsel %vm5726_vm12, %v5119_v3, 0  ;;  %8144 = vst [vmem:[#allocation31_spill] sm:$0xff] %v5764_v30  ;;  %v1715_v32 = vsel %vm5740_vm9, %v5294_v40, 0 }
  0xac   : > { %vm5775_vm11 = vcmp.ne.s16.totalorder %v1030_v38, 0  ;;  %v8145_v57 = vmov 0  ;;  %v4294_v40 = vcombine.low %v1700_v41, %v1701_v5  ;;  %v1803_v54 = vsel %vm5436_vm4, %v5665_v16, 0 }
  0xad   : > { %v2277_v20 = vsel %vm8128_vm3, %v8143_v6, %v8142_v53  ;;  %v8146_v57 = vsel %vm5775_vm11, 4294967295, %v8145_v57  ;;  %vm8148_vm3 = vcmp.ne.s16.totalorder %v5393_v59, 0  ;;  %v5785_v53 = vpop.permute.xlu1 %2153  ;;  %v4270_v6 = vcombine.low %v5770_v35, %v5754_v19 }
  0xae   : > { %8147 = vst [vmem:[#allocation32_spill] sm:$0xff] %v8146_v57  ;;  %v1802_v3 = vsel %vm8148_vm3, %v5698_v23, 0  ;;  %2308 = vrot.lane.b32.xlu1 %v5498_v11, %s4598_s20  ;;  %2409 = vrot.lane.b32.xlu0 %v4293_v50, %s4597_s19  ;;  %vm8149_vm1 = vcmp.ne.s16.totalorder %v5399_v34, 0  ;;  %v2039_v38 = vrot.slane %v2037_v28, 4  ;;  %v2042_v24 = vrot.slane %v2040_v25, 5  ;;  %v5812_v5 = vpop.permute.xlu0 %2403 }
  0xaf   : > { %v1818_v59 = vsel %vm8149_vm1, %v5770_v35, 0  ;;  %v5795_v30 = vcombine.low %v1802_v3, %v1803_v54  ;;  %v1819_v11 = vsel %vm5449_vm7, %v5754_v19, 0  ;;  %vm5800_vm3 = vcmp.ne.s16.totalorder %v1040_v21, 0  ;;  %8153 = vst [vmem:[#allocation34_spill] sm:$0xff] %v5812_v5 }
  0xb0   : > { %v8150_v50 = vmov 0  ;;  %v5804_v41 = vcombine.low %v1818_v59, %v1819_v11  ;;  %v4301_v34 = vcombine.low %v1714_v56, %v1715_v32  ;;  %v1716_v25 = vsel %vm5775_vm11, %v5328_v18, 0  ;;  %v591_v59 = vld [vmem:[%s4661_s17] sm:$0x8] }
  0xb1   : > { %v8151_v50 = vsel %vm5800_vm3, 4294967295, %v8150_v50  ;;  %v7904_v0 = vrot.slane %v5795_v30, 5  ;;  %v2109_v17 = vshrl.u32 %v4270_v6, 16  ;;  %v1717_v21 = vsel %vm5800_vm3, %v5770_v35, 0  ;;  %v5827_v56 = vpop.permute.xlu1 %2155 }
  0xb2   : > { %8152 = vst [vmem:[#allocation33_spill] sm:$0xff] %v8151_v50  ;;  %2310 = vrot.lane.b32.xlu1 %v2277_v20, %s4598_s20  ;;  %2411 = vrot.lane.b32.xlu0 %v4294_v40, %s4597_s19  ;;  %v7905_v28 = vrot.slane %v5804_v41, 5  ;;  %v5818_v3 = vor.u32 %v2042_v24, %v2039_v38  ;;  %v2112_v54 = vshll.u32 %v4270_v6, 16  ;;  %v8154_v32 = vrot.slane %v5340_v27, 5 }
  0xb3   : > { %vm8155_vm4 = vcmask 1042432   ;;  %vm8156_vm7 = vcmp.ne.s16.totalorder %v5558_v22, 0  ;;  %v1735_v24 = vsel %vm5573_vm0, %v5665_v16, 0  ;;  %v8157_v6 = vrot.slane %v5342_v43, 5 }
  0xb4   : > { %v5825_v20 = vsel %vm8155_vm4, %v8154_v32, %v7904_v0  ;;  %v1734_v40 = vsel %vm8156_vm7, %v5698_v23, 0  ;;  %vm8158_vm1 = vmmov %vm8155_vm4  ;;  %v186_v38 = vadd.s32 88, %v4634_v1  ;;  %v4302_v11 = vcombine.low %v1716_v25, %v1717_v21  ;;  %v5859_v25 = vpop.permute.xlu0 %2286 }
  0xb5   : > { %v5840_v27 = vsel %vm8158_vm1, %v8157_v6, %v7905_v28  ;;  %vm8159_vm4 = vsmask.f32 3328  ;;  %v2111_v0 = vrot.slane %v2109_v17, 4  ;;  %v2114_v43 = vrot.slane %v2112_v54, 5  ;;  %v4558_v28 = vld [vmem:[%s4661_s17 + $0x4] sm:$0xf] }
  0xb6   : > { %2425 = vrot.lane.b32.xlu1 %v4301_v34, %s4597_s19  ;;  %2457 = vrot.lane.b32.xlu0 %v5503_v42, %s4599_s21  ;;  %v5850_v32 = vsel %vm8159_vm4, %v5473_v62, %v5818_v3  ;;  %v5852_v5 = vcombine.low %v1734_v40, %v1735_v24  ;;  %vm8161_vm7 = vcmp.ne.s16.totalorder %v4757_v39, 0  ;;  %vm8162_vm1 = vnez %v7977_v15  ;;  %v5864_v62 = vpop.permute.xlu1 %2405 }
  0xb7   : > { %v1139_v6 = vsel %vm8161_vm7, %v591_v59, 0  ;;  %v1140_v34 = vsel %vm8162_vm1, %v4558_v28, 0  ;;  %v288_v42 = vand.u32 15, %v186_v38  ;;  %v202_v39 = vadd.s32 216, %v4634_v1  ;;  %v5871_v28 = vld [vmem:[%s4661_s17 + $0x38] sm:$0xf] }
  0xb8   : > { %8160 = vst [vmem:[#allocation35_spill] sm:$0xff] %v5852_v5  ;;  %v4240_v17 = vcombine.low %v1139_v6, %v1140_v34  ;;  %v5867_v21 = vor.u32 %v2114_v43, %v2111_v0  ;;  %v7907_v15 = vrot.slane %v5852_v5, 5  ;;  %vm8163_vm4 = vcmp.ne.s16.totalorder %v5585_v45, 0  ;;  %v4559_v0 = vld [vmem:[%s4661_s17 + $0x8] sm:$0xf]  ;;  %v5897_v34 = vpop.permute.xlu0 %2302 }
  0xb9   : > { %v1750_v54 = vsel %vm8163_vm4, %v5770_v35, 0  ;;  %v1751_v40 = vsel %vm5619_vm13, %v5754_v19, 0  ;;  %vm5879_vm7 = vcmp.lt.s32.totalorder %v288_v42, 15  ;;  %v204_v59 = vadd.s32 232, %v4634_v1  ;;  %v5891_v6 = vld [vmem:[%s4661_s17 + $0x34] sm:$0xf] }
  0xba   : > { %2427 = vrot.lane.b32.xlu1 %v4302_v11, %s4597_s19  ;;  %2459 = vrot.lane.b32.xlu0 %v5850_v32, %s4599_s21  ;;  %vm7915_vm1 = vcmask 31744   ;;  %v1141_v38 = vsel %vm4811_vm14, %v4559_v0, 0  ;;  %v4560_v11 = vld [vmem:[%s4661_s17 + $0xc] sm:$0xf]  ;;  %8166 = vst [vmem:[#allocation36_spill] sm:$0xff] %v5897_v34  ;;  %v1768_v10 = vsel %vm5648_vm15, %v5304_v4, 0  ;;  %v4263_v42 = vcombine.low %v5891_v6, %v5871_v28  ;;  %vm1280_vm4 = vmpackc.low %vm5879_vm7, %vm5879_vm7 }
  0xbb   : > { %v1142_v43 = vsel %vm4839_vm5, %v4560_v11, 0  ;;  %v1769_v36 = vsel %vm5652_vm8, %v5698_v23, 0  ;;  %v400_v0 = vand.u32 15, %v202_v39  ;;  %vm8167_vm14 = vsmask.f32 3328 }
  0xbc   : > { %vm8169_vm5 = vcmask 1042432   ;;  %v5917_v11 = vcombine.low %v1750_v54, %v1751_v40  ;;  %v185_v39 = vadd.s32 80, %v4634_v1  ;;  %v5925_v33 = vsel %vm7915_vm1, %v4240_v17, %v5632_v46  ;;  %v5935_v40 = vld [vmem:[%s4661_s17 + $0x48] sm:$0xf]  ;;  %v5944_v34 = vld [vmem:[%s4661_s17 + $0x78] sm:$0xf] }
  0xbd   : > { %v4241_v54 = vcombine.low %v1141_v38, %v1142_v43  ;;  %8172 = vst [vmem:[#allocation39_spill] sm:$0xff] %v5935_v40  ;;  %v1158_v46 = vsel %vm8071_vm10, %v4562_v12, 0  ;;  %v4328_v17 = vcombine.low %v1768_v10, %v1769_v36  ;;  %v1312_v58 = vsel %vm1280_vm4, 65537, %v8072_v9  ;;  %v5967_v43 = vld [vmem:[%s4661_s17 + $0x74] sm:$0xf] }
  0xbe   : > { %2473 = vrot.lane.b32.xlu1 %v5538_v51, %s4599_s21  ;;  %2607 = vrot.lane.b32.xlu0 %v5712_v13, %s4600_s22  ;;  %v5910_v51 = vsel %vm8167_vm14, %v5509_v61, %v5867_v21  ;;  %v8168_v13 = vrot.slane %v5656_v60, 5  ;;  %8170 = vst [vmem:[#allocation37_spill] sm:$0xff] %v5917_v11  ;;  %v5930_v61 = vsel %vm7915_vm1, %v5532_v52, %v5716_v31  ;;  %v5932_v60 = vpop.permute.xlu1 %2288  ;;  %v2046_v52 = vshrl.u32 %v4263_v42, 16  ;;  %v5981_v5 = vld [vmem:[%s4661_s17 + $0x10] sm:$0xf] }
  0xbf   : > { %8171 = vst [vmem:[#allocation38_spill] sm:$0xff] %v5930_v61  ;;  %v2049_v31 = vshll.u32 %v4263_v42, 16  ;;  %vm8176_vm10 = vnez %v8133_v29  ;;  %8177 = vst [vmem:[#allocation20_spill] sm:$0xff] %v5967_v43  ;;  %v281_v10 = vand.u32 15, %v185_v39  ;;  %v4271_v42 = vcombine.low %v5967_v43, %v5944_v34  ;;  %v8181_v29 = vld [vmem:[#allocation21_spill] sm:$0xff] }
  0xc0   : > { %v2576_v4 = vsel %vm8169_vm5, %v8168_v13, %v7907_v15  ;;  %v414_v13 = vand.u32 15, %v204_v59  ;;  %v1157_v15 = vsel %vm8068_vm2, %v5935_v40, 0  ;;  %vm5955_vm2 = vcmp.lt.s32.totalorder %v400_v0, 15 }
  0xc1   : > { %v1770_v59 = vsel %vm5718_vm6, %v5665_v16, 0  ;;  %v1771_v38 = vsel %vm8176_vm10, %v5891_v6, 0  ;;  %v5969_v24 = vcombine.low %v1157_v15, %v1158_v46  ;;  %vm8182_vm14 = vnez %v8181_v29  ;;  %vm1296_vm5 = vmpackc.low %vm5955_vm2, %vm5955_vm2 }
  0xc2   : > { %2475 = vrot.lane.b32.xlu1 %v5910_v51, %s4599_s21  ;;  %2609 = vrot.lane.b32.xlu0 %v2576_v4, %s4600_s22  ;;  %v5971_v36 = vpop.permute.xlu0 %2290  ;;  %vm5975_vm7 = vcmp.lt.s32.totalorder %v414_v13, 15  ;;  %v187_v4 = vadd.s32 96, %v4634_v1  ;;  %v1784_v15 = vsel %vm5726_vm12, %v5328_v18, 0  ;;  %v1785_v39 = vsel %vm5740_vm9, %v5770_v35, 0  ;;  %v5997_v46 = vpop.permute.xlu1 %2304 }
  0xc3   : > { %8178 = vst [vmem:[#allocation40_spill] sm:$0xff] %v5971_v36  ;;  %v1435_v13 = vshrl.u32 %v1312_v58, 16  ;;  %8183 = vst [vmem:[#allocation21_spill] sm:$0xff] %v5997_v46  ;;  %v4329_v7 = vcombine.low %v1770_v59, %v1771_v38  ;;  %v1786_v18 = vsel %vm5775_vm11, %v5754_v19, 0  ;;  %v2048_v26 = vrot.slane %v2046_v52, 4  ;;  %v8192_v46 = vld [vmem:[#allocation12_spill] sm:$0xff] }
  0xc4   : > { %v2051_v63 = vrot.slane %v2049_v31, 5  ;;  %v8184_v40 = vrot.slane %v5917_v11, 5  ;;  %v8185_v12 = vrot.slane %v5677_v44, 5  ;;  %vm8186_vm4 = vcmask 1042432   ;;  %vm1298_vm2 = vmpackc.low %vm5975_vm7, %vm5975_vm7 }
  0xc5   : > { %vm6014_vm1 = vcmp.ge.s32.totalorder %v281_v10, 1  ;;  %v201_v52 = vadd.s32 208, %v4634_v1  ;;  %v2118_v31 = vshrl.u32 %v4271_v42, 16  ;;  %v2121_v59 = vshll.u32 %v4271_v42, 16 }
  0xc6   : > { %2623 = vrot.lane.b32.xlu1 %v5735_v37, %s4600_s22  ;;  %2724 = vrot.lane.b32.xlu0 %v4328_v17, %s4601_s23  ;;  %v2592_v36 = vsel %vm8186_vm4, %v8185_v12, %v8184_v40  ;;  %v1787_v37 = vsel %vm5800_vm3, %v5967_v43, 0  ;;  %v1328_v44 = vsel %vm1296_vm5, 65537, %v8072_v9  ;;  %v295_v40 = vand.u32 15, %v187_v4  ;;  %vm730_vm5 = vmpackc.low %vm6014_vm1, %vm6014_vm1 }
  0xc7   : > { %vm8189_vm4 = vcmask 31744   ;;  %v4336_v12 = vcombine.low %v1784_v15, %v1785_v39  ;;  %v1437_v50 = vrot.slane %v1435_v13, 7  ;;  %v1438_v57 = vshll.u32 %v1312_v58, 16  ;;  %v6026_v10 = vpop.permute.xlu0 %2419 }
  0xc8   : > { %v6022_v38 = vsel %vm8189_vm4, %v4241_v54, %v5700_v55  ;;  %8190 = vst [vmem:[#allocation41_spill] sm:$0xff] %v6026_v10  ;;  %v6028_v11 = vor.u32 %v2051_v63, %v2048_v26  ;;  %v1424_v42 = vrot.slane %v5505_v8, 4  ;;  %v1456_v61 = vshll.u32 %v8192_v46, 16  ;;  %v8193_v26 = vld [vmem:[#allocation22_spill] sm:$0xff] }
  0xc9   : > { %v1330_v55 = vsel %vm1298_vm2, 65537, %v8072_v9  ;;  %vm8194_vm4 = vnez %v8193_v26  ;;  %v4337_v8 = vcombine.low %v1786_v18, %v1787_v37  ;;  %v1579_v54 = vshrl.u32 %v1328_v44, 16 }
  0xca   : > { %2625 = vrot.lane.b32.xlu1 %v2592_v36, %s4600_s22  ;;  %2726 = vrot.lane.b32.xlu0 %v4329_v7, %s4601_s23  ;;  %8191 = vst [vmem:[#allocation42_spill] sm:$0xff] %v6028_v11  ;;  %v6042_v7 = vld [vmem:[%s4661_s17 + $0x14] sm:$0xf]  ;;  %v393_v58 = vand.u32 15, %v201_v52  ;;  %v6047_v36 = vpop.permute.xlu1 %2306  ;;  %v2120_v4 = vrot.slane %v2118_v31, 4  ;;  %v2123_v15 = vrot.slane %v2121_v59, 5  ;;  %v1440_v46 = vor.u32 %v1438_v57, %v1437_v50 }
  0xcb   : > { %8195 = vst [vmem:[#allocation12_spill] sm:$0xff] %v6047_v36  ;;  %vm6049_vm3 = vcmp.ge.s32.totalorder %v295_v40, 1  ;;  %v203_v39 = vadd.s32 224, %v4634_v1  ;;  %vm8198_vm1 = vcmp.ne.s16.totalorder %v5558_v22, 0  ;;  %v1597_v17 = vshrl.u32 %v1330_v55, 16  ;;  %v8200_v22 = vld [vmem:[#allocation9_spill] sm:$0xff] }
  0xcc   : > { %v1804_v13 = vsel %vm8198_vm1, %v5891_v6, 0  ;;  %v762_v18 = vsel %vm730_vm5, 65537, %v8072_v9  ;;  %vm8199_vm7 = vsmask.f32 3328  ;;  %v1805_v52 = vsel %vm5573_vm0, %v5871_v28, 0  ;;  %v8202_v31 = vld [vmem:[#allocation13_spill] sm:$0xff]  ;;  %vm8211_vm11 = vmpackc.low %vm6049_vm3, %vm6049_vm3 }
  0xcd   : > { %v6064_v37 = vsel %vm8199_vm7, %v5818_v3, %v6028_v11  ;;  %vm8201_vm2 = vnez %v8073_v48  ;;  %v1458_v59 = vor.u32 %v1456_v61, %v8202_v31  ;;  %v1581_v40 = vrot.slane %v1579_v54, 7  ;;  %v8207_v61 = vld [vmem:[#allocation10_spill] sm:$0xff] }
  0xce   : > { %2740 = vrot.lane.b32.xlu1 %v4336_v12, %s4601_s23  ;;  %2772 = vrot.lane.b32.xlu0 %v5850_v32, %s4602_s24  ;;  %v6072_v57 = vsel %vm8201_vm2, %v1424_v42, %v8200_v22  ;;  %v1582_v12 = vshll.u32 %v1328_v44, 16  ;;  %v1442_v63 = vrot.slane %v1437_v50, 4  ;;  %vm6075_vm5 = vcmp.ge.s32.totalorder %v393_v58, 1  ;;  %v6094_v58 = vpop.permute.xlu1 %2421 }
  0xcf   : > { %v6084_v3 = vor.u32 %v2123_v15, %v2120_v4  ;;  %v887_v11 = vshll.u32 %v762_v18, 16  ;;  %v891_v42 = vshrl.u32 %v762_v18, 16  ;;  %v407_v10 = vand.u32 15, %v203_v39  ;;  %v8210_v15 = vld [vmem:[#allocation16_spill] sm:$0xff]  ;;  %vm746_vm1 = vmpackc.low %vm6075_vm5, %vm6075_vm5 }
  0xd0   : > { %v6082_v14 = vpop.permute.xlu0 %2407  ;;  %v6086_v36 = vcombine.low %v1804_v13, %v1805_v52  ;;  %v1441_v50 = vsel %vm8201_vm2, %v8207_v61, %v1440_v46  ;;  %v6091_v44 = vrot.slane %v1597_v17, 7  ;;  %v1600_v54 = vshll.u32 %v1330_v55, 16 }
  0xd1   : > { %8205 = vst [vmem:[#allocation22_spill] sm:$0xff] %v6084_v3  ;;  %vm8209_vm0 = vcmp.ne.s16.totalorder %v5585_v45, 0  ;;  %vm7927_vm7 = vcmp.ne.s16.totalorder %v6072_v57, 0  ;;  %v1568_v39 = vrot.slane %v8210_v15, 4  ;;  %v764_v55 = vsel %vm8211_vm11, 65537, %v8072_v9 }
  0xd2   : > { %8206 = vst [vmem:[#allocation13_spill] sm:$0xff] %v6086_v36  ;;  %8208 = vst [vmem:[#allocation43_spill] sm:$0xff] %v6091_v44  ;;  %2742 = vrot.lane.b32.xlu1 %v4337_v8, %s4601_s23  ;;  %2774 = vrot.lane.b32.xlu0 %v6064_v37, %s4602_s24  ;;  %v1820_v4 = vsel %vm8209_vm0, %v5967_v43, 0  ;;  %v1584_v8 = vor.u32 %v1582_v12, %v1581_v40  ;;  %v6115_v45 = vsel %vm8201_vm2, %v1442_v63, %v8200_v22  ;;  %vm8216_vm3 = vsmask.f32 3328 }
  0xd3   : > { %v1459_v1 = vsel %vm8201_vm2, %v8207_v61, %v1458_v59  ;;  %v1586_v13 = vrot.slane %v1581_v40, 4  ;;  %vm6122_vm5 = vcmp.ne.s16.totalorder %v1441_v50, 0  ;;  %v6126_v0 = vrot.slane %v887_v11, 5 }
  0xd4   : > { %v6120_v46 = vpop.permute.xlu0 %2451  ;;  %v893_v18 = vrot.slane %v891_v42, 4  ;;  %vm6128_vm11 = vcmp.ge.s32.totalorder %v407_v10, 1  ;;  %v1602_v63 = vor.u32 %v1600_v54, %v6091_v44  ;;  %v778_v31 = vsel %vm746_vm1, 65537, %v8072_v9 }
  0xd5   : > { %v907_v12 = vshll.u32 %v764_v55, 16  ;;  %v911_v59 = vshrl.u32 %v764_v55, 16  ;;  %v6139_v40 = vsel %vm8216_vm3, %v5867_v21, %v6084_v3  ;;  %v1821_v10 = vsel %vm5619_vm13, %v5944_v34, 0  ;;  %vm748_vm13 = vmpackc.low %vm6128_vm11, %vm6128_vm11 }
  0xd6   : > { %2788 = vrot.lane.b32.xlu1 %v5910_v51, %s4602_s24  ;;  %8217 = vst [vmem:[#allocation16_spill] sm:$0xff] %v6139_v40  ;;  %2922 = vrot.lane.b32.xlu0 %v5825_v20, %s4603_s25  ;;  %v6150_v42 = vsel %vm8201_vm2, %v1568_v39, %v8200_v22  ;;  %v1666_v50 = vsel %vm7927_vm7, %v5698_v23, 0  ;;  %v1585_v21 = vsel %vm8201_vm2, %v8207_v61, %v1584_v8  ;;  %vm7930_vm1 = vcmp.ne.s16.totalorder %v6115_v45, 0 }
  0xd7   : > { %vm6159_vm0 = vcmp.ne.s16.totalorder %v1459_v1, 0  ;;  %v8218_v20 = vmov 0  ;;  %v1667_v23 = vsel %vm6122_vm5, %v5665_v16, 0  ;;  %v6176_v15 = vsel %vm8201_vm2, %v1586_v13, %v8200_v22 }
  0xd8   : > { %v8219_v20 = vsel %vm6159_vm0, 4294967295, %v8218_v20  ;;  %v6166_v2 = vpop.permute.xlu1 %2423  ;;  %v6168_v54 = vpop.permute.xlu0 %2467  ;;  %v894_v39 = vor.u32 %v893_v18, %v6126_v0  ;;  %v1047_v55 = vshll.u32 %v778_v31, 16  ;;  %v1603_v8 = vsel %vm8201_vm2, %v8207_v61, %v1602_v63 }
  0xd9   : > { %v1051_v1 = vshrl.u32 %v778_v31, 16  ;;  %v6182_v11 = vrot.slane %v907_v12, 5  ;;  %v913_v44 = vrot.slane %v911_v59, 4  ;;  %v8220_v13 = vrot.slane %v6086_v36, 5 }
  0xda   : > { %2790 = vrot.lane.b32.xlu1 %v6139_v40, %s4602_s24  ;;  %2145 = vrot.lane.b32.xlu0 %v5850_v32, %s4596_s18  ;;  %v8221_v22 = vrot.slane %v5795_v30, 5  ;;  %vm8222_vm3 = vcmask 1042432   ;;  %v6193_v3 = vcombine.low %v1820_v4, %v1821_v10  ;;  %vm7932_vm7 = vcmp.ne.s16.totalorder %v6150_v42, 0 }
  0xdb   : > { %v780_v63 = vsel %vm748_vm13, 65537, %v8072_v9  ;;  %v4278_v31 = vcombine.low %v1666_v50, %v1667_v23  ;;  %vm6202_vm10 = vcmp.ne.s16.totalorder %v1585_v21, 0  ;;  %v1668_v30 = vsel %vm7930_vm1, %v5891_v6, 0 }
  0xdc   : > { %v2891_v18 = vsel %vm8222_vm3, %v8221_v22, %v8220_v13  ;;  %8223 = vst [vmem:[#allocation44_spill] sm:$0xff] %v6193_v3  ;;  %v1669_v22 = vsel %vm6159_vm0, %v5871_v28, 0  ;;  %v6212_v4 = vpop.permute.xlu1 %2453  ;;  %v6214_v12 = vpop.permute.xlu0 %2455  ;;  %vm7931_vm11 = vcmp.ne.s16.totalorder %v6176_v15, 0  ;;  %vm6217_vm13 = vcmp.ne.s16.totalorder %v1603_v8, 0 }
  0xdd   : > { %v895_v59 = vrot.slane %v894_v39, 4  ;;  %v6221_v10 = vrot.slane %v1047_v55, 5  ;;  %v1053_v50 = vrot.slane %v1051_v1, 4  ;;  %v914_v21 = vor.u32 %v913_v44, %v6182_v11 }
  0xde   : > { %v1067_v23 = vshll.u32 %v780_v63, 16  ;;  %v1071_v13 = vshrl.u32 %v780_v63, 16  ;;  %v8228_v61 = vsel %vm8194_vm4, %v6042_v7, 0  ;;  %v8229_v48 = vsel %vm8182_vm14, %v5981_v5, 0  ;;  %2938 = vrot.lane.b32.xlu1 %v5840_v27, %s4603_s25  ;;  %2924 = vrot.lane.b32.xlu0 %v2891_v18, %s4603_s25 }
  0xdf   : > { %v4242_v8 = vcombine.low %v8229_v48, %v8228_v61  ;;  %vm8230_vm3 = vcmask 64512   ;;  %v6238_v44 = vcombine.low %v1668_v30, %v1669_v22  ;;  %v2262_v7 = vrot.slane %v4278_v31, 5  ;;  %v8232_v61 = vld [vmem:[#allocation6_spill] sm:$0xff]  ;;  %v8235_v22 = vld [vmem:[#allocation31_spill] sm:$0xff] }
  0xe0   : > { %v3004_v39 = vsel %vm8230_vm3, %v5925_v33, %v5859_v25  ;;  %v1682_v29 = vsel %vm7932_vm7, %v5770_v35, 0  ;;  %v1683_v48 = vsel %vm6202_vm10, %v5754_v19, 0  ;;  %v6247_v33 = vpop.permute.xlu1 %2469  ;;  %v6249_v25 = vpop.permute.xlu0 %2601  ;;  %v1684_v27 = vsel %vm7931_vm11, %v5967_v43, 0 }
  0xe1   : > { %8231 = vst [vmem:[#allocation45_spill] sm:$0xff] %v6238_v44  ;;  %v1685_v5 = vsel %vm6217_vm13, %v5944_v34, 0  ;;  %vm8233_vm14 = vnez %v8113_v47  ;;  %v1054_v1 = vor.u32 %v1053_v50, %v6221_v10  ;;  %v915_v18 = vrot.slane %v914_v21, 4 }
  0xe2   : > { %v890_v35 = vsel %vm8233_vm14, %v8232_v61, %v6126_v0  ;;  %v900_v55 = vsel %vm8233_vm14, %v895_v59, %v8115_v49  ;;  %v6265_v63 = vrot.slane %v1067_v23, 5  ;;  %v1073_v31 = vrot.slane %v1071_v13, 4  ;;  %2161 = vrot.lane.b32.xlu1 %v5910_v51, %s4596_s18  ;;  %2147 = vrot.lane.b32.xlu0 %v6064_v37, %s4596_s18  ;;  %v8241_v23 = vld [vmem:[#allocation23_spill] sm:$0xff] }
  0xe3   : > { %vm8234_vm4 = vcmask 31744   ;;  %v6276_v0 = vcombine.low %v1682_v29, %v1683_v48  ;;  %v7934_v59 = vrot.slane %v6238_v44, 5  ;;  %vm8237_vm11 = vcmask 64512   ;;  %v8247_v29 = vld [vmem:[#allocation19_spill] sm:$0xff]  ;;  %v8268_v44 = vld [vmem:[#allocation21_spill] sm:$0xff] }
  0xe4   : > { %v2980_v30 = vsel %vm8234_vm4, %v5969_v24, %v5785_v53  ;;  %vm8236_vm3 = vmmov %vm8234_vm4  ;;  %v3006_v50 = vsel %vm8237_vm11, %v6022_v38, %v5932_v60  ;;  %v8238_v53 = vrot.slane %v6193_v3, 5  ;;  %v8239_v24 = vrot.slane %v5804_v41, 5  ;;  %v6301_v38 = vpop.permute.xlu1 %2471  ;;  %v6303_v41 = vpop.permute.xlu0 %2617 }
  0xe5   : > { %v2959_v26 = vsel %vm8236_vm3, %v4242_v8, %v8235_v22  ;;  %vm8240_vm4 = vcmask 1042432   ;;  %v8242_v13 = vrot.slane %v8241_v23, 5  ;;  %vm6290_vm7 = vcmp.ne.s16.totalorder %v890_v35, 0  ;;  %v8249_v22 = vld [vmem:[#allocation34_spill] sm:$0xff]  ;;  %8251 = vst [vmem:[#allocation31_spill] sm:$0xff] %v6303_v41 }
  0xe6   : > { %v2907_v21 = vsel %vm8240_vm4, %v8239_v24, %v8238_v53  ;;  %vm8243_vm3 = vmmov %vm8240_vm4  ;;  %v8244_v8 = vmov 0  ;;  %vm8248_vm1 = vcmask 31744   ;;  %vm8250_vm11 = vcmask 97280   ;;  %v6312_v24 = vld [vmem:[%s4661_s17 + $0x80] sm:$0xf] }
  0xe7   : > { %v2263_v51 = vsel %vm8243_vm3, %v8242_v13, %v2262_v7  ;;  %v8245_v8 = vsel %vm6290_vm7, 4294967295, %v8244_v8  ;;  %v2983_v48 = vsel %vm8248_vm1, %v8247_v29, %v5827_v56  ;;  %v6299_v60 = vsel %vm8250_vm11, %v3004_v39, %v8249_v22  ;;  %v4485_v56 = vld [vmem:[%s7806_s1 + $0x10] ss:$0 sps:$4 sm:$0x33]   ;;  %vm8256_vm1 = vmmov %vm8250_vm11  ;;  %2940 = vrot.lane.b32.xlu1 %v2907_v21, %s4603_s25  ;;  %v6339_v13 = vld [vmem:[%s4661_s17 + $0x7c] sm:$0xf] }
  0xe8   : > { %8246 = vst [vmem:[#allocation6_spill] sm:$0xff] %v8245_v8  ;;  %v6305_v53 = vcombine.low %v1684_v27, %v1685_v5  ;;  %vm6307_vm4 = vcmp.ne.s16.totalorder %v900_v55, 0  ;;  %v8253_v35 = vmov 0  ;;  %v1055_v23 = vrot.slane %v1054_v1, 4  ;;  %2296 = vrot.lane.b32.xlu0 %v2263_v51, %s4598_s20  ;;  %v6356_v51 = vpop.permute.xlu1 %2603  ;;  %v6358_v29 = vpop.permute.xlu0 %2605 }
  0xe9   : > { %v8254_v35 = vsel %vm6307_vm4, 4294967295, %v8253_v35  ;;  %v910_v39 = vsel %vm8233_vm14, %v8232_v61, %v6182_v11  ;;  %v920_v27 = vsel %vm8233_vm14, %v915_v18, %v8115_v49  ;;  %v1074_v5 = vor.u32 %v1073_v31, %v6265_v63  ;;  %8260 = vst [vmem:[#allocation34_spill] sm:$0xff] %v6356_v51 }
  0xea   : > { %8252 = vst [vmem:[#allocation23_spill] sm:$0xff] %v6305_v53  ;;  %8255 = vst [vmem:[#allocation19_spill] sm:$0xff] %v8254_v35  ;;  %v6327_v55 = vsel %vm8256_vm1, %v3006_v50, %v5864_v62  ;;  %v2278_v1 = vrot.slane %v6276_v0, 5  ;;  %v2265_v11 = vsel %vm8243_vm3, %v2262_v7, %v7934_v59  ;;  %v1702_v18 = vsel %vm6290_vm7, %v5665_v16, 0  ;;  %v4486_v16 = vld [vmem:[%s7806_s1 + $0x8] sm:$0xff]   ;;  %v8257_v7 = vld [vmem:[#allocation36_spill] sm:$0xff] }
  0xeb   : > { %v1703_v62 = vsel %vm6307_vm4, %v5891_v6, 0  ;;  %v1050_v31 = vsel %vm8233_vm14, %v8232_v61, %v6221_v10  ;;  %v4272_v0 = vcombine.low %v6339_v13, %v6312_v24  ;;  %vm3457_vm1 = vcmask 1041408   ;;  %v8258_v50 = vld [vmem:[#allocation38_spill] sm:$0xff]  ;;  %8261 = vst [vmem:[#allocation36_spill] sm:$0xff] %v6358_v29  ;;  %2163 = vrot.lane.b32.xlu1 %v6139_v40, %s4596_s18  ;;  %v8315_v35 = vld [vmem:[#allocation37_spill] sm:$0xff] }
  0xec   : > { %vm8259_vm3 = vcmask 64512   ;;  %vm6360_vm11 = vcmp.ne.s16.totalorder %v910_v39, 0  ;;  %v8262_v22 = vmov 0  ;;  %vm6364_vm6 = vcmp.ne.s16.totalorder %v920_v27, 0  ;;  %4448 = vmatprep.subr.msk.bf16.mxu0 %vm3457_vm1, %v4485_v56  ;;  %4449 = vmatprep.subr.msk.bf16.mxu1 %vm3457_vm1, %v4485_v56  ;;  %v8270_v27 = vld [vmem:[#allocation40_spill] sm:$0xff]  ;;  %v8271_v29 = vld [vmem:[#allocation26_spill] sm:$0xff] }
  0xed   : > { %v3020_v21 = vsel %vm8259_vm3, %v8258_v50, %v8257_v7  ;;  %v8263_v22 = vsel %vm6360_vm11, 4294967295, %v8262_v22  ;;  %v8265_v10 = vmov 0  ;;  %v3459_v59 = vsel %vm3457_vm1, %v4485_v56, 0  ;;  %vm8269_vm9 = vmmov %vm8259_vm3  ;;  %2298 = vrot.lane.b32.xlu0 %v2265_v11, %s4598_s20  ;;  %v4488_v11 = vld [vmem:[%s7806_s1] sm:$0xff]   ;;  %v6404_v7 = vpop.permute.xlu0 %2718 }
  0xee   : > { %8264 = vst [vmem:[#allocation38_spill] sm:$0xff] %v8263_v22  ;;  %v8266_v10 = vsel %vm6364_vm6, 4294967295, %v8265_v10  ;;  %v3022_v3 = vsel %vm8269_vm9, %v2980_v30, %v8268_v44  ;;  %v1060_v39 = vsel %vm8233_vm14, %v1055_v23, %v8115_v49  ;;  %v1075_v50 = vrot.slane %v1074_v5, 4  ;;  %4405 = vmatpush3.bf16.msra.mxu0 %v3459_v59  ;;  %4445 = vmatpush3.bf16.msra.mxu1 %v3459_v59  ;;  %v6390_v23 = vld [vmem:[%s4661_s17 + $0x3c] sm:$0xf] }
  0xef   : > { %8267 = vst [vmem:[#allocation46_spill] sm:$0xff] %v8266_v10  ;;  %v3008_v36 = vsel %vm8259_vm3, %v2959_v26, %v8270_v27  ;;  %v8272_v56 = vrot.slane %v8271_v29, 5  ;;  %vm8273_vm1 = vcmask 1042432   ;;  %v4295_v44 = vcombine.low %v1702_v18, %v1703_v62  ;;  %4406 = vmatprep.subr.bf16.mxu0 %v4486_v16  ;;  %4443 = vmatprep.subr.bf16.mxu1 %v4486_v16  ;;  %v8277_v18 = vld [vmem:[#allocation12_spill] sm:$0xff]  ;;  %v6594_v22 = vld [vmem:[%s4661_s17 + $0x44] sm:$0xf] }
  0xf0   : > { %vm6382_vm9 = vcmp.ne.s16.totalorder %v1050_v31, 0  ;;  %v8274_v30 = vmov 0  ;;  %v1704_v59 = vsel %vm6360_vm11, %v5871_v28, 0  ;;  %v1705_v26 = vsel %vm6364_vm6, %v6390_v23, 0  ;;  %v8278_v31 = vld [vmem:[#allocation41_spill] sm:$0xff] }
  0xf1   : > { %v2279_v51 = vsel %vm8273_vm1, %v8272_v56, %v2278_v1  ;;  %v8275_v30 = vsel %vm6382_vm9, 4294967295, %v8274_v30  ;;  %v2127_v5 = vshrl.u32 %v4272_v0, 16  ;;  %v2130_v29 = vshll.u32 %v4272_v0, 16  ;;  %v6402_v56 = vpop.permute.xlu1 %2619  ;;  %2413 = vrot.lane.b32.xlu0 %v4295_v44, %s4597_s19 }
  0xf2   : > { %8276 = vst [vmem:[#allocation21_spill] sm:$0xff] %v8275_v30  ;;  %v3024_v62 = vsel %vm8259_vm3, %v2983_v48, %v8277_v18  ;;  %vm8279_vm1 = vcmask 97280   ;;  %vm6406_vm12 = vcmp.ne.s16.totalorder %v1060_v39, 0  ;;  %v8280_v40 = vmov 0  ;;  %4407 = vmatpush3.bf16.msra.mxu0 %v4486_v16  ;;  %4446 = vmatpush3.bf16.msra.mxu1 %v4486_v16  ;;  %v8328_v30 = vld [vmem:[#allocation16_spill] sm:$0xff] }
  0xf3   : > { %v3055_v27 = vsel %vm8279_vm1, %v3020_v21, %v8278_v31  ;;  %v8281_v40 = vsel %vm6406_vm12, 4294967295, %v8280_v40  ;;  %v1070_v0 = vsel %vm8233_vm14, %v8232_v61, %v6265_v63  ;;  %v8283_v41 = vrot.slane %v6305_v53, 5  ;;  %2312 = vrot.lane.b32.xlu1 %v2279_v51, %s4598_s20  ;;  %4408 = vmatprep.subr.bf16.mxu0 %v4488_v11  ;;  %v8292_v53 = vld [vmem:[#allocation15_spill] sm:$0xff] }
  0xf4   : > { %8282 = vst [vmem:[#allocation40_spill] sm:$0xff] %v8281_v40  ;;  %vm8284_vm8 = vcmask 1042432   ;;  %v1080_v21 = vsel %vm8233_vm14, %v1075_v50, %v8115_v49  ;;  %vm8285_vm3 = vcmp.ne.s16.totalorder %v6072_v57, 0  ;;  %v1737_v18 = vsel %vm6122_vm5, %v5871_v28, 0  ;;  %4444 = vmatprep.subr.bf16.mxu1 %v4488_v11  ;;  %v8326_v40 = vld [vmem:[#allocation31_spill] sm:$0xff] }
  0xf5   : > { %v2281_v48 = vsel %vm8284_vm8, %v2278_v1, %v8283_v41  ;;  %v1736_v39 = vsel %vm8285_vm3, %v5891_v6, 0  ;;  %v1718_v63 = vsel %vm6382_vm9, %v5754_v19, 0  ;;  %v4296_v41 = vcombine.low %v1704_v59, %v1705_v26  ;;  %v6444_v19 = vpop.permute.xlu1 %2621  ;;  %v6446_v59 = vpop.permute.xlu0 %2734 }
  0xf6   : > { %vm8286_vm8 = vcmp.ne.s16.totalorder %v6150_v42, 0  ;;  %v1753_v1 = vsel %vm6202_vm10, %v5944_v34, 0  ;;  %v1719_v16 = vsel %vm6406_vm12, %v5967_v43, 0  ;;  %vm6440_vm3 = vcmp.ne.s16.totalorder %v1070_v0, 0  ;;  %4409 = vmatpush3.bf16.msra.mxu0 %v4488_v11  ;;  %4447 = vmatpush3.bf16.msra.mxu1 %v4488_v11 }
  0xf7   : > { %v1752_v6 = vsel %vm8286_vm8, %v5967_v43, 0  ;;  %v2129_v50 = vrot.slane %v2127_v5, 4  ;;  %v2132_v44 = vrot.slane %v2130_v29, 5  ;;  %vm6448_vm8 = vcmp.ne.s16.totalorder %v1080_v21, 0  ;;  %2314 = vrot.lane.b32.xlu1 %v2281_v48, %s4598_s20  ;;  %2415 = vrot.lane.b32.xlu0 %v4296_v41, %s4597_s19 }
  0xf8   : > { %v6452_v31 = vcombine.low %v1736_v39, %v1737_v18  ;;  %vm8291_vm1 = vcmp.ne.s16.totalorder %v6115_v45, 0  ;;  %v1739_v5 = vsel %vm6159_vm0, %v8292_v53, 0  ;;  %vm8293_vm15 = vcmask 97280   ;;  %v8295_v39 = vld [vmem:[#allocation2_spill] sm:$0xff] }
  0xf9   : > { %v1738_v0 = vsel %vm8291_vm1, %v6390_v23, 0  ;;  %v3057_v29 = vsel %vm8293_vm15, %v3022_v3, %v6094_v58  ;;  %vm8294_vm14 = vmmov %vm8293_vm15  ;;  %v6464_v21 = vcombine.low %v1752_v6, %v1753_v1  ;;  %v206_v18 = vadd.s32 248, %v8295_v39  ;;  %v6490_v41 = vpop.permute.xlu0 %2722 }
  0xfa   : > { %v3043_v43 = vsel %vm8294_vm14, %v3008_v36, %v6082_v14  ;;  %vm8296_vm2 = vcmask 130048   ;;  %v4303_v47 = vcombine.low %v1718_v63, %v1719_v16  ;;  %v1720_v3 = vsel %vm6440_vm3, %v5944_v34, 0  ;;  %v8297_v36 = vld [vmem:[#allocation4_spill] sm:$0xff]  ;;  %v8298_v14 = vld [vmem:[#allocation42_spill] sm:$0xff]  ;;  %v6488_v63 = vpop.permute.xlu1 %2720 }
  0xfb   : > { %v3074_v49 = vsel %vm8296_vm2, %v6299_v60, %v6120_v46  ;;  %vm8299_vm15 = vsmask.f32 3328  ;;  %v1721_v53 = vsel %vm6448_vm8, %v6339_v13, 0  ;;  %v6483_v11 = vcombine.low %v1738_v0, %v1739_v5  ;;  %vm8301_vm2 = vmmov %vm8294_vm14  ;;  %2461 = vrot.lane.b32.xlu0 %v6064_v37, %s4599_s21 }
  0xfc   : > { %v6478_v58 = vsel %vm8299_vm15, %v8298_v14, %v8297_v36  ;;  %v428_v46 = vand.u32 15, %v206_v18  ;;  %v189_v60 = vadd.s32 112, %v8295_v39  ;;  %v3059_v48 = vsel %vm8301_vm2, %v3024_v62, %v6166_v2  ;;  %2429 = vrot.lane.b32.xlu1 %v4303_v47, %s4597_s19 }
  0xfd   : > { %8300 = vst [vmem:[#allocation26_spill] sm:$0xff] %v6483_v11  ;;  %v6492_v6 = vor.u32 %v2132_v44, %v2129_v50  ;;  %v2577_v1 = vrot.slane %v6452_v31, 5  ;;  %v205_v16 = vadd.s32 240, %v8295_v39  ;;  %vm8302_vm14 = vcmask 130048   ;;  %v6529_v37 = vpop.permute.xlu0 %2766 }
  0xfe   : > { %v3090_v0 = vsel %vm8302_vm14, %v3055_v27, %v6168_v54  ;;  %vm8303_vm1 = vcmp.ne.s16.totalorder %v6176_v15, 0  ;;  %v1755_v62 = vsel %vm6217_vm13, %v6312_v24, 0  ;;  %vm8304_vm15 = vmmov %vm8302_vm14  ;;  %v4304_v54 = vcombine.low %v1720_v3, %v1721_v53  ;;  %v6514_v27 = vld [vmem:[%s4661_s17 + $0x88] sm:$0xf] }
  0xff   : > { %v1754_v2 = vsel %vm8303_vm1, %v6339_v13, 0  ;;  %v3076_v50 = vsel %vm8304_vm15, %v6327_v55, %v6212_v4  ;;  %vm8305_vm2 = vmmov %vm8302_vm14  ;;  %vm6516_vm14 = vcmp.lt.s32.totalorder %v428_v46, 15  ;;  %v1773_v47 = vsel %vm6307_vm4, %v6390_v23, 0  ;;  %v8308_v55 = vld [vmem:[#allocation22_spill] sm:$0xff]  ;;  %v8310_v3 = vld [vmem:[#allocation35_spill] sm:$0xff]  ;;  %2463 = vrot.lane.b32.xlu0 %v6478_v58, %s4599_s21 }
 0x100   : > { %v3078_v44 = vsel %vm8305_vm2, %v3043_v43, %v6214_v12  ;;  %v1772_v43 = vsel %vm6290_vm7, %v5871_v28, 0  ;;  %v309_v4 = vand.u32 15, %v189_v60  ;;  %v6527_v12 = vpop.permute.xlu1 %2736  ;;  %vm8309_vm1 = vsmask.f32 3328  ;;  %v6542_v46 = vld [vmem:[%s4661_s17 + $0x84] sm:$0xf]  ;;  %2431 = vrot.lane.b32.xlu1 %v4304_v54, %s4597_s19 }
 0x101   : > { %v6534_v18 = vsel %vm8309_vm1, %v8308_v55, %v6492_v6  ;;  %v8311_v36 = vrot.slane %v8310_v3, 5  ;;  %vm8312_vm15 = vcmask 1042432   ;;  %v6539_v53 = vcombine.low %v1754_v2, %v1755_v62 }
 0x102   : > { %v421_v39 = vand.u32 15, %v205_v16  ;;  %v3092_v60 = vsel %vm8305_vm2, %v3057_v29, %v6247_v33  ;;  %vm8313_vm0 = vcmask 162816   ;;  %v8314_v55 = vrot.slane %v6464_v21, 5  ;;  %vm8317_vm1 = vmmov %vm8312_vm15 }
 0x103   : > { %v2578_v14 = vsel %vm8312_vm15, %v8311_v36, %v2577_v1  ;;  %v3109_v5 = vsel %vm8313_vm0, %v3074_v49, %v6249_v25  ;;  %v8316_v8 = vrot.slane %v8315_v35, 5  ;;  %v4307_v2 = vcombine.low %v6542_v46, %v6514_v27  ;;  %vm1300_vm15 = vmpackc.low %vm6516_vm14, %vm6516_vm14  ;;  %v6590_v36 = vpop.permute.xlu0 %2782 }
 0x104   : > { %v4330_v49 = vcombine.low %v1772_v43, %v1773_v47  ;;  %v1788_v33 = vsel %vm6382_vm9, %v5944_v34, 0  ;;  %v1789_v25 = vsel %vm6406_vm12, %v6339_v13, 0  ;;  %v8318_v29 = vrot.slane %v6483_v11, 5  ;;  %vm8319_vm2 = vmmov %vm8317_vm1  ;;  %v6588_v47 = vpop.permute.xlu1 %2738  ;;  %2477 = vrot.lane.b32.xlu1 %v8328_v30, %s4599_s21  ;;  %2611 = vrot.lane.b32.xlu0 %v2578_v14, %s4600_s22  ;;  %v8330_v30 = vld [vmem:[#allocation34_spill] sm:$0xff]  ;;  %v8331_v14 = vld [vmem:[#allocation36_spill] sm:$0xff] }
 0x105   : > { %v6553_v3 = vsel %vm8317_vm1, %v8316_v8, %v8314_v55  ;;  %v6570_v8 = vld [vmem:[%s4661_s17 + $0x40] sm:$0xf]  ;;  %vm8320_vm1 = vcmp.ne.s16.totalorder %v6072_v57, 0  ;;  %vm6584_vm0 = vcmp.ge.s32.totalorder %v309_v4, 1  ;;  %v1775_v57 = vsel %vm6364_vm6, %v6594_v22, 0 }
 0x106   : > { %v1774_v35 = vsel %vm6360_vm11, %v6570_v8, 0  ;;  %v2580_v16 = vsel %vm8319_vm2, %v2577_v1, %v8318_v29  ;;  %v1806_v62 = vsel %vm8320_vm1, %v6390_v23, 0  ;;  %v1807_v54 = vsel %vm6122_vm5, %v6570_v8, 0 }
 0x107   : > { %v1332_v17 = vsel %vm1300_vm15, 65537, %v8072_v9  ;;  %vm6605_vm5 = vcmp.ge.s32.totalorder %v421_v39, 1  ;;  %v6609_v4 = vcombine.low %v1788_v33, %v1789_v25  ;;  %v1790_v29 = vsel %vm6440_vm3, %v6312_v24, 0  ;;  %vm734_vm15 = vmpackc.low %vm6584_vm0, %vm6584_vm0 }
 0x108   : > { %v1791_v55 = vsel %vm6448_vm8, %v6542_v46, 0  ;;  %v2443_v10 = vshrl.u32 %v4307_v2, 16  ;;  %vm8325_vm2 = vcmask 130048   ;;  %vm8327_vm14 = vcmask 162816   ;;  %2479 = vrot.lane.b32.xlu1 %v6534_v18, %s4599_s21  ;;  %2613 = vrot.lane.b32.xlu0 %v2580_v16, %s4600_s22 }
 0x109   : > { %v3094_v31 = vsel %vm8325_vm2, %v3059_v48, %v6301_v38  ;;  %v3125_v39 = vsel %vm8327_vm14, %v3090_v0, %v8326_v40  ;;  %v2446_v33 = vshll.u32 %v4307_v2, 16  ;;  %v6624_v25 = vcombine.low %v1806_v62, %v1807_v54  ;;  %vm750_vm2 = vmpackc.low %vm6605_vm5, %vm6605_vm5  ;;  %v6644_v62 = vpop.permute.xlu0 %2770 }
 0x10a   : > { %v4331_v11 = vcombine.low %v1774_v35, %v1775_v57  ;;  %vm8329_vm1 = vcmp.ne.s16.totalorder %v6150_v42, 0  ;;  %v1823_v40 = vsel %vm6202_vm10, %v6312_v24, 0  ;;  %v1615_v48 = vshrl.u32 %v1332_v17, 16  ;;  %vm8332_vm4 = vmmov %vm8327_vm14  ;;  %v2769_v35 = vpop.permute.xlu1 %2768 }
 0x10b   : > { %v1822_v38 = vsel %vm8329_vm1, %v6339_v13, 0  ;;  %v3111_v0 = vsel %vm8327_vm14, %v3076_v50, %v8330_v30  ;;  %v6642_v2 = vsel %vm8332_vm4, %v3078_v44, %v8331_v14  ;;  %v8333_v42 = vrot.slane %v6539_v53, 5  ;;  %vm8336_vm0 = vmmov %vm8332_vm4 }
 0x10c   : > { %v8334_v32 = vrot.slane %v6464_v21, 5  ;;  %vm8335_vm10 = vcmask 1042432   ;;  %v6651_v43 = vcombine.low %v1790_v29, %v1791_v55  ;;  %v6655_v57 = vsel %vm8336_vm0, %v3092_v60, %v6402_v56  ;;  %v8339_v56 = vld [vmem:[#allocation39_spill] sm:$0xff]  ;;  %2627 = vrot.lane.b32.xlu1 %v6553_v3, %s4600_s22  ;;  %2728 = vrot.lane.b32.xlu0 %v4330_v49, %s4601_s23 }
 0x10d   : > { %vm8337_vm1 = vcmask 195584   ;;  %v2445_v44 = vrot.slane %v2443_v10, 4  ;;  %v766_v30 = vsel %vm734_vm15, 65537, %v8072_v9  ;;  %v2448_v21 = vrot.slane %v2446_v33, 5  ;;  %v8348_v49 = vld [vmem:[#allocation43_spill] sm:$0xff] }
 0x10e   : > { %v2596_v54 = vsel %vm8335_vm10, %v8334_v32, %v8333_v42  ;;  %v3144_v50 = vsel %vm8337_vm1, %v3109_v5, %v6404_v7  ;;  %v2892_v14 = vrot.slane %v6624_v25, 5  ;;  %v6664_v55 = vcombine.low %v1822_v38, %v1823_v40  ;;  %v2785_v33 = vpop.permute.xlu1 %2784  ;;  %v2917_v38 = vpop.permute.xlu0 %2916 }
 0x10f   : > { %v782_v7 = vsel %vm750_vm2, 65537, %v8072_v9  ;;  %vm8338_vm4 = vcmp.ne.s16.totalorder %v6115_v45, 0  ;;  %vm8340_vm15 = vnez %v8219_v20  ;;  %v6678_v60 = vrot.slane %v1615_v48, 7 }
 0x110   : > { %v1808_v10 = vsel %vm8338_vm4, %v6594_v22, 0  ;;  %v1809_v5 = vsel %vm8340_vm15, %v8339_v56, 0  ;;  %v1618_v16 = vshll.u32 %v1332_v17, 16  ;;  %vm8341_vm14 = vcmask 228352   ;;  %2629 = vrot.lane.b32.xlu1 %v2596_v54, %s4600_s22  ;;  %2730 = vrot.lane.b32.xlu0 %v4331_v11, %s4601_s23 }
 0x111   : > { %v3179_v29 = vsel %vm8341_vm14, %v3144_v50, %v6529_v37  ;;  %vm8342_vm5 = vcmp.ne.s16.totalorder %v6176_v15, 0  ;;  %v1825_v45 = vsel %vm6217_vm13, %v6514_v27, 0  ;;  %v927_v1 = vshll.u32 %v766_v30, 16  ;;  %v8344_v15 = vld [vmem:[#allocation13_spill] sm:$0xff]  ;;  %vm8346_vm13 = vmmov %vm8336_vm0 }
 0x112   : > { %v1824_v9 = vsel %vm8342_vm5, %v6542_v46, 0  ;;  %vm8343_vm2 = vcmask 261120   ;;  %v931_v40 = vshrl.u32 %v766_v30, 16  ;;  %v1087_v48 = vshll.u32 %v782_v7, 16  ;;  %vm8347_vm0 = vmmov %vm8337_vm1  ;;  %v6714_v56 = vpop.permute.xlu1 %2786 }
 0x113   : > { %v3214_v20 = vsel %vm8343_vm2, %v3179_v29, %v2917_v38  ;;  %v1091_v42 = vshrl.u32 %v782_v7, 16  ;;  %v6692_v37 = vor.u32 %v2448_v21, %v2445_v44  ;;  %v8345_v17 = vrot.slane %v8344_v15, 5  ;;  %vm8349_vm1 = vmmov %vm8341_vm14 }
 0x114   : > { %v7958_v32 = vrot.slane %v6664_v55, 5  ;;  %v6702_v50 = vcombine.low %v1808_v10, %v1809_v5  ;;  %v6706_v30 = vsel %vm8346_vm13, %v3094_v31, %v6444_v19  ;;  %v3160_v3 = vsel %vm8347_vm0, %v3125_v39, %v6446_v59  ;;  %v2933_v10 = vpop.permute.xlu0 %2932  ;;  %vm8350_vm4 = vmmov %vm8343_vm2  ;;  %v8352_v39 = vld [vmem:[#allocation44_spill] sm:$0xff]  ;;  %2744 = vrot.lane.b32.xlu1 %v6609_v4, %s4601_s23  ;;  %2776 = vrot.lane.b32.xlu0 %v6478_v58, %s4602_s24 }
 0x115   : > { %v6699_v52 = vsel %vm8335_vm10, %v8345_v17, %v2892_v14  ;;  %v1604_v44 = vrot.slane %v8348_v49, 4  ;;  %v1620_v21 = vor.u32 %v1618_v16, %v6678_v60  ;;  %v3195_v7 = vsel %vm8349_vm1, %v3160_v3, %v6590_v36  ;;  %vm8354_vm2 = vmmov %vm8335_vm10  ;;  %v8357_v17 = vld [vmem:[#allocation11_spill] sm:$0xff] }
 0x116   : > { %v3258_v29 = vshrl.u32 %v3214_v20, 16  ;;  %v3261_v38 = vshll.u32 %v3214_v20, 16  ;;  %v6716_v5 = vrot.slane %v927_v1, 5  ;;  %v3230_v19 = vsel %vm8350_vm4, %v3195_v7, %v2933_v10  ;;  %vm8355_vm10 = vmmov %vm8347_vm0 }
 0x117   : > { %vm7960_vm15 = vsmask.f32 4352  ;;  %v933_v31 = vrot.slane %v931_v40, 4  ;;  %v6719_v15 = vrot.slane %v1087_v48, 5  ;;  %v1093_v59 = vrot.slane %v1091_v42, 4  ;;  %v8356_v42 = vld [vmem:[#allocation9_spill] sm:$0xff]  ;;  %vm8359_vm0 = vmmov %vm8349_vm1 }
 0x118   : > { %vm7959_vm14 = vcmask 293888   ;;  %vm8351_vm5 = vsmask.f32 3328  ;;  %v8353_v16 = vrot.slane %v8352_v39, 5  ;;  %v2894_v20 = vrot.slane %v6702_v50, 5  ;;  %v2919_v39 = vpop.permute.xlu1 %2918  ;;  %vm8361_vm1 = vmmov %vm8355_vm10  ;;  %2746 = vrot.lane.b32.xlu1 %v6651_v43, %s4601_s23 }
 0x119   : > { %v6726_v36 = vsel %vm8351_vm5, %v6492_v6, %v6692_v37  ;;  %v6736_v40 = vcombine.low %v1824_v9, %v1825_v45  ;;  %v3146_v11 = vsel %vm8355_vm10, %v3111_v0, %v6488_v63  ;;  %v3321_v54 = vshrl.u32 %v3230_v19, 16  ;;  %vm8362_vm5 = vmmov %vm8361_vm1 }
 0x11a   : > { %v6733_v1 = vsel %vm8354_vm2, %v8353_v16, %v7958_v32  ;;  %v3324_v48 = vshll.u32 %v3230_v19, 16  ;;  %vm8358_vm13 = vnez %v8357_v17  ;;  %v3181_v49 = vsel %vm8359_vm0, %v3146_v11, %v2769_v35  ;;  %v6746_v16 = vpop.permute.xlu0 %2141  ;;  %v8360_v32 = vld [vmem:[#allocation10_spill] sm:$0xff]  ;;  %vm8363_vm10 = vmmov %vm8359_vm0 }
 0x11b   : > { %v6743_v3 = vsel %vm8358_vm13, %v1604_v44, %v8356_v42  ;;  %v3260_v7 = vrot.slane %v3258_v29, 3  ;;  %v3263_v10 = vrot.slane %v3261_v38, 4  ;;  %v1621_v9 = vsel %vm8358_vm13, %v8360_v32, %v1620_v21  ;;  %v1795_v21 = vld [vmem:[%s4661_s17 + $0x94] sm:$0x1] }
 0x11c   : > { %v3148_v63 = vsel %vm8361_vm1, %v6642_v2, %v6490_v41  ;;  %v3216_v0 = vsel %vm8350_vm4, %v3181_v49, %v2919_v39  ;;  %v934_v45 = vor.u32 %v933_v31, %v6716_v5  ;;  %v1094_v44 = vor.u32 %v1093_v59, %v6719_v15  ;;  %v2935_v31 = vpop.permute.xlu1 %2934  ;;  %vm8366_vm1 = vmmov %vm8350_vm4  ;;  %2792 = vrot.lane.b32.xlu1 %v6534_v18, %s4602_s24 }
 0x11d   : > { %v3162_v35 = vsel %vm8362_vm5, %v6655_v57, %v6527_v12  ;;  %v3265_v29 = vshrl.u32 %v3216_v0, 16  ;;  %v3268_v38 = vshll.u32 %v3216_v0, 16  ;;  %vm1653_vm2 = vcmp.ne.s16.totalorder %v6743_v3, 0  ;;  %vm8367_vm4 = vmmov %vm8366_vm1 }
 0x11e   : > { %v3183_v41 = vsel %vm8363_vm10, %v3148_v63, %v6644_v62  ;;  %v3323_v2 = vrot.slane %v3321_v54, 3  ;;  %v3326_v32 = vrot.slane %v3324_v48, 4  ;;  %vm6767_vm13 = vcmp.ne.s16.totalorder %v1621_v9, 0  ;;  %v2921_v59 = vpop.permute.xlu0 %2920 }
 0x11f   : > { %v3197_v12 = vsel %vm8359_vm0, %v3162_v35, %v2785_v33  ;;  %v3267_v57 = vrot.slane %v3265_v29, 3  ;;  %v3270_v19 = vrot.slane %v3268_v38, 4  ;;  %v3264_v4 = vor.u32 %v3263_v10, %v3260_v7  ;;  %v8368_v33 = vld [vmem:[#allocation5_spill] sm:$0xff]  ;;  %v8369_v7 = vld [vmem:[#allocation8_spill] sm:$0xff] }
 0x120   : > { %v3232_v11 = vsel %vm8366_vm1, %v3197_v12, %v2935_v31  ;;  %v3218_v42 = vsel %vm8367_vm4, %v3183_v41, %v2921_v59  ;;  %v935_v17 = vrot.slane %v934_v45, 4  ;;  %v1095_v49 = vrot.slane %v1094_v44, 4  ;;  %2778 = vrot.lane.b32.xlu0 %v8368_v33, %s4602_s24  ;;  %v6788_v44 = vpop.permute.xlu1 %2157  ;;  %2794 = vrot.lane.b32.xlu1 %v6726_v36, %s4602_s24 }
 0x121   : > { %v3329_v62 = vshrl.u32 %v3232_v11, 16  ;;  %v3332_v54 = vshll.u32 %v3232_v11, 16  ;;  %v3271_v48 = vor.u32 %v3270_v19, %v3267_v57  ;;  %v3273_v39 = vshrl.u32 %v3218_v42, 16 }
 0x122   : > { %v3276_v9 = vshll.u32 %v3218_v42, 16  ;;  %v6778_v63 = vor.u32 %v3326_v32, %v3323_v2  ;;  %vm8370_vm5 = vnez %v8369_v7  ;;  %v6791_v38 = vpop.permute.xlu0 %2143  ;;  %vm8371_vm10 = vcmask 1042432   ;;  %v8372_v2 = vld [vmem:[#allocation3_spill] sm:$0xff]  ;;  %v4568_v42 = vld [vmem:[%s4661_s17 + $0x70] sm:$0xf] }
 0x123   : > { %v930_v10 = vsel %vm8370_vm5, %v8232_v61, %v6716_v5  ;;  %v1090_v0 = vsel %vm8370_vm5, %v8232_v61, %v6719_v15  ;;  %v3331_v45 = vrot.slane %v3329_v62, 3  ;;  %v3334_v43 = vrot.slane %v3332_v54, 4  ;;  %v8384_v54 = vld [vmem:[#allocation20_spill] sm:$0xff] }
 0x124   : > { %v3272_v35 = vsel %vm7960_vm15, %v3264_v4, %v3271_v48  ;;  %v3275_v29 = vrot.slane %v3273_v39, 3  ;;  %v3278_v41 = vrot.slane %v3276_v9, 4  ;;  %v2895_v5 = vsel %vm8371_vm10, %v2892_v14, %v2894_v20  ;;  %2926 = vrot.lane.b32.xlu0 %v6699_v52, %s4603_s25  ;;  %v2937_v52 = vpop.permute.xlu1 %2936  ;;  %2942 = vrot.lane.b32.xlu1 %v6733_v1, %s4603_s25 }
 0x125   : > { %4410 = vmatprep.mubr.msk.bf16.mxu0 %vm7959_vm14, %v3272_v35  ;;  %v1686_v15 = vsel %vm1653_vm2, %v6339_v13, 0  ;;  %v940_v32 = vsel %vm8370_vm5, %v935_v17, %v8372_v2  ;;  %vm8373_vm0 = vcmask 195584   ;;  %v3335_v57 = vor.u32 %v3334_v43, %v3331_v45 }
 0x126   : > { %v3164_v12 = vsel %vm8373_vm0, %v6706_v30, %v6588_v47  ;;  %v1622_v25 = vrot.slane %v6678_v60, 4  ;;  %v1100_v14 = vsel %vm8370_vm5, %v1095_v49, %v8372_v2  ;;  %v6816_v19 = vor.u32 %v3278_v41, %v3275_v29  ;;  %v6833_v59 = vpop.permute.xlu0 %2292 }
 0x127   : > { %v1687_v31 = vsel %vm6767_vm13, %v6312_v24, 0  ;;  %vm6821_vm1 = vcmp.ne.s16.totalorder %v930_v10, 0  ;;  %vm6825_vm4 = vcmp.ne.s16.totalorder %v1090_v0, 0  ;;  %vm8378_vm10 = vcmask 228352  }
 0x128   : > { %v3199_v60 = vsel %vm8378_vm10, %v3164_v12, %v6714_v56  ;;  %v3336_v4 = vsel %vm7960_vm15, %v6778_v63, %v3335_v57  ;;  %vm6835_vm5 = vcmp.ne.s16.totalorder %v940_v32, 0  ;;  %v1167_v17 = vsel %vm6440_vm3, %v4568_v42, 0  ;;  %2149 = vrot.lane.b32.xlu0 %v6478_v58, %s4596_s18  ;;  %v6872_v29 = vpop.permute.xlu1 %2159  ;;  %2165 = vrot.lane.b32.xlu1 %v6534_v18, %s4596_s18 }
 0x129   : > { %vm8381_vm0 = vcmask 261120   ;;  %4426 = vmatprep.mubr.msk.bf16.mxu1 %vm7959_vm14, %v3336_v4  ;;  %v3280_v56 = vsel %vm7960_vm15, %v3271_v48, %v6816_v19  ;;  %vm6846_vm10 = vcmp.ne.s16.totalorder %v1100_v14, 0  ;;  %v1168_v39 = vsel %vm6448_vm8, %v8384_v54, 0 }
 0x12a   : > { %v3234_v49 = vsel %vm8381_vm0, %v3199_v60, %v2937_v52  ;;  %4411 = vmatmul.mubr.msk.bf16.vlgmr.msra.gmra.mxu0 %vm7959_vm14, %v3280_v56  ;;  %v6856_v51 = vcombine.low %v1167_v17, %v1168_v39  ;;  %v1153_v48 = vsel %vm6821_vm1, %v5871_v28, 0  ;;  %v4288_v10 = vcombine.low %v1686_v15, %v1687_v31  ;;  %v6874_v28 = vpop.permute.xlu0 %2294  ;;  %v1172_v15 = vld [vmem:[%s4661_s17 + $0x84] sm:$0x1]  ;;  %v8389_v52 = vld [vmem:[#allocation23_spill] sm:$0xff] }
 0x12b   : > { %v3337_v9 = vshrl.u32 %v3234_v49, 16  ;;  %v3340_v7 = vshll.u32 %v3234_v49, 16  ;;  %v1154_v26 = vsel %vm6835_vm5, %v6390_v23, 0  ;;  %v1169_v0 = vsel %vm6825_vm4, %v5944_v34, 0  ;;  %v8394_v49 = vld [vmem:[#allocation45_spill] sm:$0xff] }
 0x12c   : > { %v1170_v45 = vsel %vm6846_vm10, %v6339_v13, 0  ;;  %v6876_v58 = vcombine.low %v1153_v48, %v1154_v26  ;;  %vm6881_vm3 = vcmp.ne.s16.totalorder %v1622_v25, 0  ;;  %2928 = vrot.lane.b32.xlu0 %v2895_v5, %s4603_s25  ;;  %v2910_v13 = vrot.slane %v6736_v40, 5  ;;  %v6891_v2 = vpop.permute.xlu1 %2308  ;;  %v1725_v48 = vld [vmem:[%s4661_s17 + $0x8c] sm:$0x1] }
 0x12d   : > { %v3339_v43 = vrot.slane %v3337_v9, 3  ;;  %v3342_v35 = vrot.slane %v3340_v7, 4  ;;  %v6878_v41 = vcombine.low %v1169_v0, %v1170_v45  ;;  %v2282_v25 = vrot.slane %v4288_v10, 5 }
 0x12e   : > { %v6895_v12 = vpop.permute.xlu0 %2409  ;;  %v1688_v14 = vsel %vm6881_vm3, %v1172_v15, 0  ;;  %v8387_v1 = vrot.slane %v6664_v55, 5  ;;  %vm8388_vm8 = vcmask 1042432   ;;  %v8390_v4 = vrot.slane %v8389_v52, 5  ;;  %v1760_v52 = vld [vmem:[%s4661_s17 + $0x8c] sm:$0xf] }
 0x12f   : > { %v6885_v34 = vor.u32 %v3342_v35, %v3339_v43  ;;  %vm8391_vm0 = vmmov %vm8388_vm8  ;;  %v1706_v18 = vsel %vm6821_vm1, %v6570_v8, 0  ;;  %v1707_v55 = vsel %vm6835_vm5, %v6594_v22, 0  ;;  %v8395_v56 = vrot.slane %v8394_v49, 5 }
 0x130   : > { %v2911_v5 = vsel %vm8388_vm8, %v8387_v1, %v2910_v13  ;;  %2167 = vrot.lane.b32.xlu0 %v6492_v6, %s4596_s18  ;;  %v6909_v31 = vpop.permute.xlu1 %2310  ;;  %v2283_v42 = vsel %vm8391_vm0, %v8390_v4, %v2282_v25  ;;  %vm1138_vm8 = vcmp.ne.s16.totalorder %v8232_v61, 0  ;;  %v8392_v6 = vld [vmem:[#allocation14_spill] sm:$0xff]  ;;  %v4297_v9 = vcombine.low %v1706_v18, %v1707_v55  ;;  %v1761_v4 = vld [vmem:[%s4661_s17 + $0x90] sm:$0xf] }
 0x131   : > { %v3344_v32 = vsel %vm7960_vm15, %v3335_v57, %v6885_v34  ;;  %v4289_v57 = vcombine.low %v1688_v14, %v1688_v14  ;;  %2944 = vrot.lane.b32.xlu1 %v2911_v5, %s4603_s25  ;;  %v8393_v17 = vrot.slane %v8392_v6, 5  ;;  %v1724_v22 = vsel %vm1138_vm8, %v6514_v27, 0  ;;  %v8397_v18 = vld [vmem:[#allocation24_spill] sm:$0xff]  ;;  %v8399_v6 = vld [vmem:[#allocation26_spill] sm:$0xff] }
 0x132   : > { %4427 = vmatmul.mubr.msk.bf16.vlgmr.msra.gmra.mxu1 %vm7959_vm14, %v3344_v32  ;;  %v6911_v60 = vpop.permute.xlu0 %2411  ;;  %vm8396_vm14 = vmmov %vm8391_vm0  ;;  %v1722_v26 = vsel %vm6825_vm4, %v6312_v24, 0  ;;  %v1723_v0 = vsel %vm6846_vm10, %v6542_v46, 0  ;;  %v4306_v45 = vcombine.low %v1724_v22, %v1724_v22  ;;  %v1758_v15 = vsel %vm6881_vm3, %v1725_v48, 0 }
 0x133   : > { %v2267_v54 = vsel %vm8396_vm14, %v8395_v56, %v8393_v17  ;;  %v2284_v39 = vrot.slane %v4289_v57, 5  ;;  %v4305_v32 = vcombine.low %v1722_v26, %v1723_v0  ;;  %v1756_v24 = vsel %vm1653_vm2, %v6542_v46, 0  ;;  %vm8401_vm14 = vmmov %vm8391_vm0  ;;  %v4569_v26 = vld [vmem:[%s4661_s17 + $0x18] sm:$0xf] }
 0x134   : > { %2316 = vrot.lane.b32.xlu0 %v2283_v42, %s4598_s20  ;;  %v6930_v7 = vpop.permute.xlu1 %2425  ;;  %v4324_v5 = vcombine.low %v1758_v15, %v1758_v15  ;;  %v8398_v55 = vrot.slane %v8397_v18, 5  ;;  %v8400_v17 = vrot.slane %v8399_v6, 5  ;;  %v1792_v48 = vsel %vm6825_vm4, %v6514_v27, 0  ;;  %v8402_v0 = vld [vmem:[#allocation17_spill] sm:$0xff]  ;;  %v8404_v15 = vld [vmem:[#allocation18_spill] sm:$0xff]  ;;  %vm8407_vm4 = vmmov %vm8391_vm0 }
 0x135   : > { %2300 = vrot.lane.b32.xlu1 %v2267_v54, %s4598_s20  ;;  %v2285_v10 = vsel %vm8391_vm0, %v2282_v25, %v2284_v39  ;;  %v1757_v25 = vsel %vm6767_vm13, %v6514_v27, 0  ;;  %v4342_v54 = vcombine.low %v1760_v52, %v1761_v4  ;;  %vm8405_vm15 = vnez %v8404_v15 }
 0x136   : > { %v6932_v8 = vpop.permute.xlu0 %2457  ;;  %v4323_v57 = vcombine.low %v1756_v24, %v1757_v25  ;;  %v2582_v49 = vsel %vm8401_vm14, %v8400_v17, %v8398_v55  ;;  %v2599_v56 = vrot.slane %v4324_v5, 5  ;;  %vm8403_vm14 = vnez %v8402_v0  ;;  %v4571_v24 = vld [vmem:[%s4661_s17 + $0x48] sm:$0xf]  ;;  %v4572_v5 = vld [vmem:[%s4661_s17 + $0x4c] sm:$0xf] }
 0x137   : > { %v1776_v25 = vsel %vm6821_vm1, %v4571_v24, 0  ;;  %v2758_v30 = vshrl.u32 %v4342_v54, 16  ;;  %v8406_v27 = vrot.slane %v6539_v53, 5  ;;  %v2761_v55 = vshll.u32 %v4342_v54, 16  ;;  %v8413_v24 = vld [vmem:[#allocation27_spill] sm:$0xff] }
 0x138   : > { %2417 = vrot.lane.b32.xlu0 %v4297_v9, %s4597_s19  ;;  %v6947_v43 = vpop.permute.xlu1 %2427  ;;  %v1826_v47 = vsel %vm1653_vm2, %v1760_v52, 0  ;;  %v1827_v53 = vsel %vm6767_vm13, %v1761_v4, 0  ;;  %vm8414_vm1 = vnez %v8413_v24 }
 0x139   : > { %2318 = vrot.lane.b32.xlu1 %v2285_v10, %s4598_s20  ;;  %v1793_v10 = vsel %vm6846_vm10, %v1760_v52, 0  ;;  %v2763_v54 = vrot.slane %v2761_v55, 5  ;;  %v7022_v52 = vcombine.low %v1826_v47, %v1827_v53  ;;  %vm8417_vm10 = vcmask 64512  }
 0x13a   : > { %v6949_v35 = vpop.permute.xlu0 %2459  ;;  %v4340_v18 = vcombine.low %v1792_v48, %v1793_v10  ;;  %v4573_v10 = vld [vmem:[%s4661_s17 + $0x58] sm:$0xf] }
 0x13b   : > { %v2912_v53 = vrot.slane %v7022_v52, 5 }
 0x13c   : > { %2435 = vrot.lane.b32.xlu0 %v4306_v45, %s4597_s19  ;;  %v6961_v14 = vpop.permute.xlu1 %2473  ;;  %v4570_v45 = vld [vmem:[%s4661_s17 + $0x1c] sm:$0xf] }
 0x13d   : > { %2433 = vrot.lane.b32.xlu1 %v4305_v32, %s4597_s19  ;;  %v1146_v32 = vsel %vm8405_vm15, %v4570_v45, 0  ;;  %vm8408_vm15 = vcmask 31744   ;;  %v8411_v45 = vld [vmem:[#allocation30_spill] sm:$0xff] }
 0x13e   : > { %v6963_v1 = vpop.permute.xlu0 %2607  ;;  %vm8412_vm13 = vnez %v8411_v45 }
 0x140   : > { %2481 = vrot.lane.b32.xlu0 %v6726_v36, %s4599_s21  ;;  %v6970_v46 = vpop.permute.xlu1 %2475  ;;  %v2597_v36 = vrot.slane %v4323_v57, 5  ;;  %v1777_v57 = vsel %vm6835_vm5, %v4572_v5, 0  ;;  %v8418_v5 = vld [vmem:[#allocation7_spill] sm:$0xff] }
 0x141   : > { %2465 = vrot.lane.b32.xlu1 %v8368_v33, %s4599_s21  ;;  %v1145_v33 = vsel %vm8403_vm14, %v4569_v26, 0  ;;  %v4332_v11 = vcombine.low %v1776_v25, %v1777_v57  ;;  %v8409_v26 = vld [vmem:[#allocation29_spill] sm:$0xff]  ;;  %vm8420_vm14 = vcmask 130048  }
 0x142   : > { %v6972_v42 = vpop.permute.xlu0 %2609  ;;  %v2600_v22 = vsel %vm8391_vm0, %v2597_v36, %v2599_v56  ;;  %v2598_v62 = vsel %vm8407_vm4, %v8406_v27, %v2597_v36  ;;  %v1794_v56 = vsel %vm1138_vm8, %v1761_v4, 0  ;;  %v2760_v36 = vrot.slane %v2758_v30, 4  ;;  %v4576_v30 = vld [vmem:[%s4661_s17 + $0x24] sm:$0xf]  ;;  %v8415_v27 = vld [vmem:[#allocation28_spill] sm:$0xff] }
 0x143   : > { %vm8410_vm2 = vnez %v8409_v26  ;;  %v4341_v15 = vcombine.low %v1794_v56, %v1794_v56  ;;  %vm8416_vm5 = vnez %v8415_v27  ;;  %vm8419_vm0 = vcmask 97280   ;;  %v8423_v26 = vld [vmem:[#allocation33_spill] sm:$0xff] }
 0x144   : > { %2615 = vrot.lane.b32.xlu0 %v2582_v49, %s4600_s22  ;;  %v6982_v39 = vpop.permute.xlu1 %2623  ;;  %v4243_v49 = vcombine.low %v1145_v33, %v1146_v32  ;;  %v1161_v0 = vsel %vm8410_vm2, %v4573_v10, 0  ;;  %v4574_v33 = vld [vmem:[%s4661_s17 + $0x5c] sm:$0xf]  ;;  %v4575_v32 = vld [vmem:[%s4661_s17 + $0x20] sm:$0xf]  ;;  %v2764_v57 = vor.u32 %v2763_v54, %v2760_v36  ;;  %v8421_v10 = vld [vmem:[#allocation32_spill] sm:$0xff] }
 0x145   : > { %2483 = vrot.lane.b32.xlu1 %v6692_v37, %s4599_s21  ;;  %v1162_v4 = vsel %vm8412_vm13, %v4574_v33, 0  ;;  %v1147_v25 = vsel %vm8414_vm1, %v4575_v32, 0  ;;  %vm8422_vm4 = vnez %v8421_v10  ;;  %v4578_v54 = vld [vmem:[%s4661_s17 + $0x64] sm:$0xf]  ;;  %vm8425_vm2 = vcmask 162816  }
 0x146   : > { %v2725_v9 = vpop.permute.xlu0 %2724  ;;  %v2962_v48 = vsel %vm8408_vm15, %v4243_v49, %v6746_v16  ;;  %v1148_v16 = vsel %vm8416_vm5, %v4576_v30, 0  ;;  %v1828_v49 = vsel %vm6881_vm3, %v1795_v21, 0  ;;  %vm8424_vm15 = vnez %v8423_v26 }
 0x147   : > { %vm8426_vm13 = vcmask 195584   ;;  %vm8427_vm3 = vsmask.f32 3328  ;;  %vm8428_vm1 = vcmask 228352   ;;  %vm8429_vm5 = vcmask 1042432  }
 0x148   : > { %2633 = vrot.lane.b32.xlu0 %v2600_v22, %s4600_s22  ;;  %v7008_v6 = vpop.permute.xlu1 %2625  ;;  %v2765_v52 = vsel %vm8427_vm3, %v6692_v37, %v2764_v57 }
 0x149   : > { %2631 = vrot.lane.b32.xlu1 %v2598_v62, %s4600_s22  ;;  %v3010_v62 = vsel %vm8417_vm10, %v2962_v48, %v6833_v59  ;;  %v4244_v59 = vcombine.low %v1147_v25, %v1148_v16  ;;  %v4577_v48 = vld [vmem:[%s4661_s17 + $0x60] sm:$0xf]  ;;  %vm8430_vm10 = vcmask 261120  }
 0x14a   : > { %v7010_v17 = vpop.permute.xlu0 %2726  ;;  %v1163_v36 = vsel %vm8422_vm4, %v4577_v48, 0  ;;  %vm8433_vm4 = vcmask 64512  }
 0x14c   : > { %2748 = vrot.lane.b32.xlu0 %v4340_v18, %s4601_s23  ;;  %v7020_v22 = vpop.permute.xlu1 %2740  ;;  %v3045_v18 = vsel %vm8419_vm0, %v3010_v62, %v6895_v12  ;;  %v1164_v12 = vsel %vm8424_vm15, %v4578_v54, 0  ;;  %vm8431_vm0 = vcmask 31744   ;;  %vm8434_vm15 = vmmov %vm8433_vm4 }
 0x14d   : > { %2732 = vrot.lane.b32.xlu1 %v4332_v11, %s4601_s23  ;;  %v4251_v11 = vcombine.low %v1161_v0, %v1162_v4  ;;  %v3080_v56 = vsel %vm8420_vm14, %v3045_v18, %v6932_v8  ;;  %v4359_v8 = vcombine.low %v1828_v49, %v1828_v49  ;;  %v2913_v4 = vsel %vm8429_vm5, %v2910_v13, %v2912_v53  ;;  %vm8432_vm14 = vmmov %vm8431_vm0  ;;  %v8435_v13 = vld [vmem:[#allocation25_spill] sm:$0xff] }
 0x14e   : > { %v2773_v3 = vpop.permute.xlu0 %2772  ;;  %v3115_v33 = vsel %vm8425_vm2, %v3080_v56, %v6963_v1  ;;  %v4252_v32 = vcombine.low %v1163_v36, %v1164_v12  ;;  %v2965_v37 = vsel %vm8432_vm14, %v4244_v59, %v6791_v38  ;;  %v8436_v25 = vrot.slane %v8435_v13, 5  ;;  %vm8437_vm2 = vmmov %vm8429_vm5 }
 0x14f   : > { %v3150_v23 = vsel %vm8426_vm13, %v3115_v33, %v2725_v9  ;;  %v2986_v9 = vsel %vm8431_vm0, %v4251_v11, %v6788_v44  ;;  %v3012_v40 = vsel %vm8434_vm15, %v2965_v37, %v6874_v28  ;;  %v2914_v44 = vrot.slane %v4359_v8, 5  ;;  %vm8446_vm15 = vmmov %vm8437_vm2 }
 0x150   : > { %2780 = vrot.lane.b32.xlu0 %v8418_v5, %s4602_s24  ;;  %v7046_v55 = vpop.permute.xlu1 %2742  ;;  %v3185_v21 = vsel %vm8428_vm1, %v3150_v23, %v2773_v3  ;;  %v3026_v3 = vsel %vm8433_vm4, %v2986_v9, %v6891_v2  ;;  %v2897_v30 = vsel %vm8437_vm2, %v2894_v20, %v8436_v25  ;;  %vm8438_vm13 = vcmask 97280  }
 0x151   : > { %2750 = vrot.lane.b32.xlu1 %v4341_v15, %s4601_s23  ;;  %v3061_v38 = vsel %vm8438_vm13, %v3026_v3, %v6930_v7  ;;  %vm8439_vm3 = vmmov %vm8438_vm13  ;;  %vm8440_vm1 = vcmask 130048   ;;  %vm8444_vm14 = vcmask 195584   ;;  %vm8447_vm2 = vcmask 31744  }
 0x152   : > { %v2775_v47 = vpop.permute.xlu0 %2774  ;;  %v3047_v27 = vsel %vm8439_vm3, %v3012_v40, %v6911_v60  ;;  %v3096_v28 = vsel %vm8440_vm1, %v3061_v38, %v6961_v14  ;;  %vm8441_vm5 = vmmov %vm8440_vm1  ;;  %v2915_v14 = vsel %vm8446_vm15, %v2912_v53, %v2914_v44  ;;  %vm8448_vm13 = vcmask 228352  }
 0x153   : > { %v3082_v50 = vsel %vm8441_vm5, %v3047_v27, %v6949_v35  ;;  %vm8445_vm4 = vmmov %vm8444_vm14  ;;  %v2989_v35 = vsel %vm8447_vm2, %v4252_v32, %v6872_v29  ;;  %vm8450_vm1 = vsmask.f32 4352  ;;  %vm8451_vm5 = vcmask 64512  }
 0x154   : > { %2798 = vrot.lane.b32.xlu0 %v2764_v57, %s4602_s24  ;;  %v2789_v0 = vpop.permute.xlu1 %2788  ;;  %vm8449_vm3 = vmmov %vm8448_vm13  ;;  %vm8456_vm15 = vcmask 130048   ;;  %vm8457_vm2 = vcmask 162816  }
 0x155   : > { %2796 = vrot.lane.b32.xlu1 %v2765_v52, %s4602_s24 }
 0x156   : > { %v2923_v45 = vpop.permute.xlu0 %2922 }
 0x157   : > { %v3220_v1 = vsel %vm8430_vm10, %v3185_v21, %v2923_v45  ;;  %vm8442_vm10 = vcmask 162816  }
 0x158   : > { %v3281_v15 = vshrl.u32 %v3220_v1, 16  ;;  %v3284_v24 = vshll.u32 %v3220_v1, 16  ;;  %2946 = vrot.lane.b32.xlu0 %v2913_v4, %s4603_s25  ;;  %v2791_v16 = vpop.permute.xlu1 %2790  ;;  %v3131_v20 = vsel %vm8442_vm10, %v3096_v28, %v6982_v39  ;;  %vm8443_vm0 = vmmov %vm8442_vm10  ;;  %vm8452_vm10 = vcmask 261120  }
 0x159   : > { %v3117_v7 = vsel %vm8443_vm0, %v3082_v50, %v6972_v42  ;;  %2930 = vrot.lane.b32.xlu1 %v2897_v30, %s4603_s25  ;;  %v3166_v57 = vsel %vm8444_vm14, %v3131_v20, %v7020_v22  ;;  %v3028_v22 = vsel %vm8451_vm5, %v2989_v35, %v6909_v31  ;;  %vm8453_vm0 = vmmov %vm8452_vm10  ;;  %vm8454_vm14 = vcmask 293888  }
 0x15a   : > { %v3283_v2 = vrot.slane %v3281_v15, 3  ;;  %v3286_v62 = vrot.slane %v3284_v24, 4  ;;  %v7090_v5 = vpop.permute.xlu0 %2145  ;;  %v3152_v18 = vsel %vm8445_vm4, %v3117_v7, %v7010_v17  ;;  %v3201_v49 = vsel %vm8448_vm13, %v3166_v57, %v2789_v0  ;;  %vm8459_vm5 = vmmov %vm8450_vm1  ;;  %v4579_v7 = vld [vmem:[%s4661_s17 + $0x28] sm:$0xf] }
 0x15b   : > { %v3187_v39 = vsel %vm8449_vm3, %v3152_v18, %v2775_v47  ;;  %vm8455_vm4 = vcmask 97280   ;;  %vm8458_vm13 = vcmask 195584   ;;  %v1149_v57 = vsel %vm6290_vm7, %v4579_v7, 0  ;;  %v4580_v18 = vld [vmem:[%s4661_s17 + $0x2c] sm:$0xf] }
 0x15c   : > { %v3287_v60 = vor.u32 %v3286_v62, %v3283_v2  ;;  %v2939_v11 = vpop.permute.xlu1 %2938  ;;  %v3063_v10 = vsel %vm8455_vm4, %v3028_v22, %v6947_v43  ;;  %vm8463_vm4 = vmmov %vm8450_vm1  ;;  %vm8471_vm7 = vcmask 64512  }
 0x15d   : > { %v3236_v59 = vsel %vm8452_vm10, %v3201_v49, %v2939_v11  ;;  %2948 = vrot.lane.b32.xlu1 %v2915_v14, %s4603_s25  ;;  %v3098_v33 = vsel %vm8456_vm15, %v3063_v10, %v6970_v46  ;;  %vm8460_vm10 = vmmov %vm8453_vm0  ;;  %v8466_v14 = vld [vmem:[#allocation19_spill] sm:$0xff] }
 0x15e   : > { %v2925_v42 = vpop.permute.xlu0 %2924  ;;  %v3288_v56 = vsel %vm8450_vm1, %v6816_v19, %v3287_v60  ;;  %v3345_v53 = vshrl.u32 %v3236_v59, 16  ;;  %v3348_v29 = vshll.u32 %v3236_v59, 16  ;;  %v3133_v23 = vsel %vm8457_vm2, %v3098_v33, %v7008_v6  ;;  %v4581_v59 = vld [vmem:[%s4661_s17 + $0x68] sm:$0xf] }
 0x15f   : > { %v3222_v17 = vsel %vm8453_vm0, %v3187_v39, %v2925_v42  ;;  %4414 = vmatprep.mubr.msk.bf16.mxu0 %vm8454_vm14, %v3288_v56  ;;  %v3168_v43 = vsel %vm8458_vm13, %v3133_v23, %v7046_v55  ;;  %vm8461_vm0 = vmmov %vm8454_vm14  ;;  %vm8467_vm2 = vnez %v8466_v14  ;;  %vm8468_vm13 = vcmask 31744  }
 0x160   : > { %v3289_v48 = vshrl.u32 %v3222_v17, 16  ;;  %v3292_v47 = vshll.u32 %v3222_v17, 16  ;;  %v3347_v36 = vrot.slane %v3345_v53, 3  ;;  %v3350_v19 = vrot.slane %v3348_v29, 4  ;;  %v7120_v54 = vpop.permute.xlu1 %2161  ;;  %vm8462_vm14 = vmmov %vm8461_vm0  ;;  %v4582_v29 = vld [vmem:[%s4661_s17 + $0x6c] sm:$0xf] }
 0x161   : > { %v3203_v21 = vsel %vm8449_vm3, %v3168_v43, %v2791_v16  ;;  %vm8464_vm15 = vmmov %vm8461_vm0  ;;  %v1150_v35 = vsel %vm8467_vm2, %v4580_v18, 0  ;;  %v1165_v53 = vsel %vm6382_vm9, %v4581_v59, 0  ;;  %vm8474_vm3 = vcmask 97280  }
 0x162   : > { %v3291_v31 = vrot.slane %v3289_v48, 3  ;;  %v3294_v26 = vrot.slane %v3292_v47, 4  ;;  %v7122_v12 = vpop.permute.xlu0 %2147  ;;  %v3351_v52 = vor.u32 %v3350_v19, %v3347_v36  ;;  %v4245_v11 = vcombine.low %v1149_v57, %v1150_v35  ;;  %v4583_v36 = vld [vmem:[%s4661_s17 + $0x30] sm:$0xf] }
 0x163   : > { %v1166_v47 = vsel %vm6406_vm12, %v4582_v29, 0  ;;  %vm8476_vm9 = vcmask 162816   ;;  %vm8477_vm12 = vcmask 195584  }
 0x164   : > { %v7128_v8 = vor.u32 %v3294_v26, %v3291_v31  ;;  %v2941_v0 = vpop.permute.xlu1 %2940  ;;  %v3352_v45 = vsel %vm8450_vm1, %v6885_v34, %v3351_v52  ;;  %v2968_v22 = vsel %vm8468_vm13, %v4245_v11, %v7090_v5  ;;  %v1151_v31 = vsel %vm6360_vm11, %v4583_v36, 0  ;;  %v4584_v26 = vld [vmem:[%s4661_s17 + $0x34] sm:$0xf]  ;;  %vm8479_vm11 = vmmov %vm8460_vm10 }
 0x165   : > { %v3238_v46 = vsel %vm8460_vm10, %v3203_v21, %v2941_v0  ;;  %4430 = vmatprep.mubr.msk.bf16.mxu1 %vm8461_vm0, %v3352_v45  ;;  %v1152_v23 = vsel %vm6364_vm6, %v4584_v26, 0  ;;  %vm8475_vm1 = vcmask 130048   ;;  %v4253_v0 = vcombine.low %v1165_v53, %v1166_v47  ;;  %vm8480_vm6 = vmmov %vm8468_vm13 }
 0x166   : > { %v2297_v4 = vpop.permute.xlu0 %2296  ;;  %v3296_v32 = vsel %vm8459_vm5, %v3287_v60, %v7128_v8  ;;  %v3353_v6 = vshrl.u32 %v3238_v46, 16  ;;  %v3356_v1 = vshll.u32 %v3238_v46, 16  ;;  %vm8478_vm5 = vcmask 228352   ;;  %vm8481_vm10 = vmmov %vm8480_vm6 }
 0x167   : > { %4415 = vmatmul.mubr.msk.bf16.gmra.mxu0 %vm8462_vm14, %v3296_v32  ;;  %v3014_v10 = vsel %vm8471_vm7, %v2968_v22, %v2297_v4  ;;  %v4246_v32 = vcombine.low %v1151_v31, %v1152_v23  ;;  %vm8482_vm0 = vmmov %vm8471_vm7 }
 0x168   : > { %v3355_v9 = vrot.slane %v3353_v6, 3  ;;  %v3358_v55 = vrot.slane %v3356_v1, 4  ;;  %v7140_v37 = vpop.permute.xlu1 %2163  ;;  %vm8483_vm14 = vmmov %vm8482_vm0 }
 0x169   : > { %vm8486_vm2 = vmmov %vm8475_vm1 }
 0x16a   : > { %v2299_v15 = vpop.permute.xlu0 %2298  ;;  %v7142_v24 = vor.u32 %v3358_v55, %v3355_v9  ;;  %v2992_v55 = vsel %vm8480_vm6, %v4253_v0, %v7120_v54  ;;  %vm8487_vm13 = vmmov %vm8475_vm1  ;;  %vm8495_vm6 = vcmask 261120  }
 0x16b   : > { %vm8488_vm7 = vmmov %vm8476_vm9 }
 0x16c   : > { %v2313_v34 = vpop.permute.xlu1 %2312  ;;  %v3360_v3 = vsel %vm8463_vm4, %v3351_v52, %v7142_v24  ;;  %vm8484_vm4 = vmmov %vm8474_vm3 }
 0x16d   : > { %4431 = vmatmul.mubr.msk.bf16.gmra.mxu1 %vm8464_vm15, %v3360_v3  ;;  %v3030_v7 = vsel %vm8482_vm0, %v2992_v55, %v2313_v34  ;;  %vm8485_vm15 = vmmov %vm8474_vm3  ;;  %vm8497_vm0 = vcmask 31744  }
 0x16e   : > { %v2414_v40 = vpop.permute.xlu0 %2413 }
 0x16f   : > { %v3049_v5 = vsel %vm8474_vm3, %v3014_v10, %v2414_v40  ;;  %vm8489_vm3 = vmmov %vm8488_vm7 }
 0x170   : > { %v7147_v13 = vpop.permute.xlu1 %2314 }
 0x172   : > { %v2416_v25 = vpop.permute.xlu0 %2415 }
 0x174   : > { %v2430_v30 = vpop.permute.xlu1 %2429 }
 0x176   : > { %v2462_v44 = vpop.permute.xlu0 %2461 }
 0x177   : > { %v3084_v21 = vsel %vm8475_vm1, %v3049_v5, %v2462_v44  ;;  %v2971_v44 = vsel %vm8481_vm10, %v4246_v32, %v7122_v12  ;;  %vm8490_vm1 = vmmov %vm8477_vm12  ;;  %vm8496_vm10 = vcmask 293888  }
 0x178   : > { %v7149_v38 = vpop.permute.xlu1 %2431 }
 0x17a   : > { %v2464_v27 = vpop.permute.xlu0 %2463 }
 0x17c   : > { %v2478_v16 = vpop.permute.xlu1 %2477 }
 0x17e   : > { %v2612_v2 = vpop.permute.xlu0 %2611 }
 0x17f   : > { %v3119_v45 = vsel %vm8476_vm9, %v3084_v21, %v2612_v2  ;;  %v3016_v2 = vsel %vm8483_vm14, %v2971_v44, %v2299_v15  ;;  %vm8491_vm9 = vmmov %vm8490_vm1 }
 0x180   : > { %v7151_v62 = vpop.permute.xlu1 %2479  ;;  %v3051_v14 = vsel %vm8485_vm15, %v3016_v2, %v2416_v25  ;;  %vm8498_vm14 = vmmov %vm8495_vm6 }
 0x181   : > { %v3086_v54 = vsel %vm8487_vm13, %v3051_v14, %v2464_v27  ;;  %vm8500_vm13 = vmmov %vm8489_vm3 }
 0x182   : > { %v2614_v28 = vpop.permute.xlu0 %2613 }
 0x183   : > { %v3121_v34 = vsel %vm8489_vm3, %v3086_v54, %v2614_v28  ;;  %v2995_v28 = vsel %vm8497_vm0, %v6856_v51, %v7140_v37 }
 0x184   : > { %v2628_v50 = vpop.permute.xlu1 %2627 }
 0x186   : > { %v2729_v20 = vpop.permute.xlu0 %2728 }
 0x187   : > { %v3154_v4 = vsel %vm8477_vm12, %v3119_v45, %v2729_v20  ;;  %v3065_v20 = vsel %vm8484_vm4, %v3030_v7, %v2430_v30  ;;  %vm8492_vm12 = vmmov %vm8478_vm5  ;;  %vm8499_vm4 = vcmask 64512  }
 0x188   : > { %v7159_v49 = vpop.permute.xlu1 %2629  ;;  %v3100_v35 = vsel %vm8486_vm2, %v3065_v20, %v2478_v16  ;;  %v3032_v53 = vsel %vm8499_vm4, %v2995_v28, %v7147_v13 }
 0x189   : > { %v3067_v48 = vsel %vm8485_vm15, %v3032_v53, %v7149_v38 }
 0x18a   : > { %v2731_v39 = vpop.permute.xlu0 %2730  ;;  %v3102_v19 = vsel %vm8486_vm2, %v3067_v48, %v7151_v62 }
 0x18b   : > { %v3156_v30 = vsel %vm8491_vm9, %v3121_v34, %v2731_v39  ;;  %v3137_v26 = vsel %vm8500_vm13, %v3102_v19, %v7159_v49  ;;  %vm8504_vm9 = vmmov %vm8495_vm6 }
 0x18c   : > { %v2745_v42 = vpop.permute.xlu1 %2744 }
 0x18e   : > { %v2777_v56 = vpop.permute.xlu0 %2776 }
 0x18f   : > { %v3189_v46 = vsel %vm8478_vm5, %v3154_v4, %v2777_v56  ;;  %v3135_v56 = vsel %vm8488_vm7, %v3100_v35, %v2628_v50  ;;  %vm8493_vm5 = vsmask.f32 4352  ;;  %vm8501_vm7 = vmmov %vm8490_vm1 }
 0x190   : > { %v2747_v52 = vpop.permute.xlu1 %2746  ;;  %v3170_v15 = vsel %vm8490_vm1, %v3135_v56, %v2745_v42  ;;  %vm8503_vm1 = vmmov %vm8493_vm5 }
 0x191   : > { %v3172_v13 = vsel %vm8501_vm7, %v3137_v26, %v2747_v52  ;;  %vm8514_vm7 = vmmov %vm8497_vm0 }
 0x192   : > { %v2779_v43 = vpop.permute.xlu0 %2778 }
 0x194   : > { %v2793_v6 = vpop.permute.xlu1 %2792 }
 0x195   : > { %v3205_v22 = vsel %vm8492_vm12, %v3170_v15, %v2793_v6 }
 0x196   : > { %v2927_v1 = vpop.permute.xlu0 %2926 }
 0x197   : > { %v3224_v9 = vsel %vm8479_vm11, %v3189_v46, %v2927_v1  ;;  %vm8494_vm11 = vmmov %vm8492_vm12 }
 0x198   : > { %v3297_v3 = vshrl.u32 %v3224_v9, 16  ;;  %v3300_v40 = vshll.u32 %v3224_v9, 16  ;;  %v2795_v60 = vpop.permute.xlu1 %2794  ;;  %v3191_v16 = vsel %vm8494_vm11, %v3156_v30, %v2779_v43  ;;  %vm8502_vm3 = vmmov %vm8494_vm11 }
 0x199   : > { %v3207_v5 = vsel %vm8502_vm3, %v3172_v13, %v2795_v60  ;;  %vm8505_vm12 = vmmov %vm8496_vm10 }
 0x19a   : > { %v3299_v57 = vrot.slane %v3297_v3, 3  ;;  %v3302_v18 = vrot.slane %v3300_v40, 4  ;;  %v7191_v11 = vpop.permute.xlu0 %2149  ;;  %vm8507_vm11 = vmmov %vm8496_vm10 }
 0x19c   : > { %v3303_v12 = vor.u32 %v3302_v18, %v3299_v57  ;;  %v2943_v59 = vpop.permute.xlu1 %2942  ;;  %v4585_v18 = vld [vmem:[%s4661_s17 + $0x80] sm:$0xf] }
 0x19d   : > { %v3240_v17 = vsel %vm8495_vm6, %v3205_v22, %v2943_v59  ;;  %vm8508_vm6 = vmmov %vm8503_vm1  ;;  %v1171_v14 = vsel %vm1138_vm8, %v4585_v18, 0  ;;  %vm8513_vm8 = vcmask 162816  }
 0x19e   : > { %v3304_v25 = vsel %vm8493_vm5, %v7128_v8, %v3303_v12  ;;  %v2929_v27 = vpop.permute.xlu0 %2928  ;;  %v3361_v50 = vshrl.u32 %v3240_v17, 16  ;;  %v3364_v42 = vshll.u32 %v3240_v17, 16  ;;  %vm8506_vm5 = vmmov %vm8503_vm1  ;;  %v4256_v56 = vcombine.low %v1171_v14, %v1171_v14 }
 0x19f   : > { %4418 = vmatprep.mubr.msk.bf16.mxu0 %vm8496_vm10, %v3304_v25  ;;  %v3226_v39 = vsel %vm8498_vm14, %v3191_v16, %v2929_v27  ;;  %vm8509_vm14 = vmmov %vm8499_vm4 }
 0x1a0   : > { %v3305_v29 = vshrl.u32 %v3226_v39, 16  ;;  %v3308_v8 = vshll.u32 %v3226_v39, 16  ;;  %v3363_v47 = vrot.slane %v3361_v50, 3  ;;  %v3366_v10 = vrot.slane %v3364_v42, 4  ;;  %v2166_v36 = vpop.permute.xlu1 %2165  ;;  %vm8510_vm4 = vmmov %vm8485_vm15 }
 0x1a1   : > { %v2998_v54 = vsel %vm8497_vm0, %v6878_v41, %v2166_v36  ;;  %vm8511_vm15 = vmmov %vm8497_vm0 }
 0x1a2   : > { %v3307_v31 = vrot.slane %v3305_v29, 3  ;;  %v3310_v51 = vrot.slane %v3308_v8, 4  ;;  %v2168_v37 = vpop.permute.xlu0 %2167  ;;  %v3367_v33 = vor.u32 %v3366_v10, %v3363_v47  ;;  %v2974_v22 = vsel %vm8511_vm15, %v6876_v58, %v7191_v11  ;;  %vm8512_vm13 = vmmov %vm8509_vm14 }
 0x1a3   : > { %v3001_v16 = vsel %vm8514_vm7, %v4256_v56, %v2168_v37  ;;  %vm8515_vm3 = vmmov %vm8510_vm4 }
 0x1a4   : > { %v7217_v23 = vor.u32 %v3310_v51, %v3307_v31  ;;  %v2945_v38 = vpop.permute.xlu1 %2944  ;;  %v3368_v43 = vsel %vm8503_vm1, %v7142_v24, %v3367_v33  ;;  %vm8516_vm1 = vcmask 195584   ;;  %vm8523_vm0 = vmmov %vm8515_vm3 }
 0x1a5   : > { %v3242_v21 = vsel %vm8504_vm9, %v3207_v5, %v2945_v38  ;;  %4434 = vmatprep.mubr.msk.bf16.mxu1 %vm8505_vm12, %v3368_v43  ;;  %vm8517_vm9 = vmmov %vm8486_vm2  ;;  %vm8518_vm12 = vcmask 228352  }
 0x1a6   : > { %v2317_v62 = vpop.permute.xlu0 %2316  ;;  %v3312_v0 = vsel %vm8506_vm5, %v3303_v12, %v7217_v23  ;;  %v3369_v49 = vshrl.u32 %v3242_v21, 16  ;;  %v3372_v45 = vshll.u32 %v3242_v21, 16  ;;  %vm8519_vm5 = vmmov %vm8513_vm8 }
 0x1a7   : > { %4419 = vmatmul.mubr.msk.bf16.gmra.mxu0 %vm8507_vm11, %v3312_v0  ;;  %v3034_v12 = vsel %vm8509_vm14, %v2998_v54, %v2317_v62  ;;  %vm8520_vm11 = vcmask 261120   ;;  %vm8524_vm14 = vmmov %vm8518_vm12 }
 0x1a8   : > { %v3371_v52 = vrot.slane %v3369_v49, 3  ;;  %v3374_v32 = vrot.slane %v3372_v45, 4  ;;  %v2301_v4 = vpop.permute.xlu1 %2300  ;;  %vm8526_vm15 = vmmov %vm8520_vm11 }
 0x1a9   : > { %v3018_v61 = vsel %vm8512_vm13, %v2974_v22, %v2301_v4  ;;  %vm8530_vm7 = vmmov %vm8520_vm11 }
 0x1aa   : > { %v2418_v46 = vpop.permute.xlu0 %2417  ;;  %v3375_v6 = vor.u32 %v3374_v32, %v3371_v52 }
 0x1ab   : > { %v3053_v41 = vsel %vm8515_vm3, %v3018_v61, %v2418_v46  ;;  %vm8531_vm3 = vsmask.f32 4352 }
 0x1ac   : > { %v2319_v1 = vpop.permute.xlu1 %2318  ;;  %v3376_v24 = vsel %vm8508_vm6, %v3367_v33, %v3375_v6  ;;  %vm8521_vm6 = vmmov %vm8512_vm13 }
 0x1ad   : > { %4435 = vmatmul.mubr.msk.bf16.gmra.mxu1 %vm8496_vm10, %v3376_v24  ;;  %v3036_v39 = vsel %vm8521_vm6, %v3001_v16, %v2319_v1  ;;  %vm8522_vm10 = vmmov %vm8516_vm1 }
 0x1ae   : > { %v2436_v9 = vpop.permute.xlu0 %2435  ;;  %vm8528_vm13 = vmmov %vm8516_vm1 }
 0x1af   : > { %v3071_v48 = vsel %vm8523_vm0, %v3036_v39, %v2436_v9  ;;  %vm8537_vm6 = vmmov %vm8531_vm3 }
 0x1b0   : > { %v2434_v55 = vpop.permute.xlu1 %2433  ;;  %vm8539_vm0 = vmmov %vm8530_vm7 }
 0x1b1   : > { %v3069_v15 = vsel %vm8510_vm4, %v3034_v12, %v2434_v55  ;;  %vm8525_vm4 = vmmov %vm8486_vm2  ;;  %v7272_v55 = vld [vmem:[%s7807_s2] ss:$0 sm:$0xff] }
 0x1b2   : > { %v2482_v3 = vpop.permute.xlu0 %2481 }
 0x1b3   : > { %v3104_v59 = vsel %vm8486_vm2, %v3069_v15, %v2482_v3  ;;  %vm8527_vm2 = vmmov %vm8519_vm5 }
 0x1b4   : > { %v2466_v40 = vpop.permute.xlu1 %2465 }
 0x1b5   : > { %v3088_v28 = vsel %vm8517_vm9, %v3053_v41, %v2466_v40  ;;  %vm8533_vm9 = vmmov %vm8531_vm3 }
 0x1b6   : > { %v2616_v44 = vpop.permute.xlu0 %2615 }
 0x1b7   : > { %v3123_v58 = vsel %vm8519_vm5, %v3088_v28, %v2616_v44 }
 0x1b8   : > { %v2484_v7 = vpop.permute.xlu1 %2483 }
 0x1b9   : > { %v3106_v36 = vsel %vm8525_vm4, %v3071_v48, %v2484_v7  ;;  %vm8541_vm4 = vmmov %vm8539_vm0 }
 0x1ba   : > { %v2634_v2 = vpop.permute.xlu0 %2633 }
 0x1bb   : > { %v3141_v37 = vsel %vm8527_vm2, %v3106_v36, %v2634_v2  ;;  %vm8543_vm2 = vmmov %vm8539_vm0 }
 0x1bc   : > { %v2632_v20 = vpop.permute.xlu1 %2631 }
 0x1bd   : > { %v3139_v25 = vsel %vm8513_vm8, %v3104_v59, %v2632_v20  ;;  %vm8529_vm8 = vmmov %vm8518_vm12 }
 0x1be   : > { %v2749_v60 = vpop.permute.xlu0 %2748 }
 0x1bf   : > { %v3174_v17 = vsel %vm8516_vm1, %v3139_v25, %v2749_v60  ;;  %vm8532_vm1 = vcmask 293888  }
 0x1c0   : > { %v2733_v57 = vpop.permute.xlu1 %2732  ;;  %vm8535_vm5 = vmmov %vm8532_vm1 }
 0x1c1   : > { %v3158_v53 = vsel %vm8522_vm10, %v3123_v58, %v2733_v57  ;;  %vm8538_vm10 = vmmov %vm8532_vm1 }
 0x1c2   : > { %v2781_v35 = vpop.permute.xlu0 %2780 }
 0x1c3   : > { %v3193_v47 = vsel %vm8524_vm14, %v3158_v53, %v2781_v35  ;;  %vm8540_vm14 = vmmov %vm8539_vm0 }
 0x1c4   : > { %v2751_v34 = vpop.permute.xlu1 %2750 }
 0x1c5   : > { %v3176_v13 = vsel %vm8528_vm13, %v3141_v37, %v2751_v34  ;;  %vm8544_vm13 = vmmov %vm8539_vm0 }
 0x1c6   : > { %v2799_v30 = vpop.permute.xlu0 %2798 }
 0x1c7   : > { %v3211_v38 = vsel %vm8529_vm8, %v3176_v13, %v2799_v30  ;;  %vm8545_vm8 = vmmov %vm8539_vm0 }
 0x1c8   : > { %v2797_v27 = vpop.permute.xlu1 %2796 }
 0x1c9   : > { %v3209_v50 = vsel %vm8518_vm12, %v3174_v17, %v2797_v27  ;;  %vm8534_vm12 = vmmov %vm8531_vm3 }
 0x1ca   : > { %v2947_v42 = vpop.permute.xlu0 %2946 }
 0x1cb   : > { %v3244_v11 = vsel %vm8520_vm11, %v3209_v50, %v2947_v42  ;;  %vm8536_vm11 = vmmov %vm8532_vm1 }
 0x1cc   : > { %v3377_v29 = vshrl.u32 %v3244_v11, 16  ;;  %v3380_v8 = vshll.u32 %v3244_v11, 16  ;;  %v2931_v10 = vpop.permute.xlu1 %2930 }
 0x1cd   : > { %v3228_v19 = vsel %vm8526_vm15, %v3193_v47, %v2931_v10  ;;  %vm8542_vm15 = vmmov %vm8539_vm0 }
 0x1ce   : > { %v3379_v31 = vrot.slane %v3377_v29, 3  ;;  %v3382_v51 = vrot.slane %v3380_v8, 4  ;;  %v3313_v26 = vshrl.u32 %v3228_v19, 16  ;;  %v3316_v33 = vshll.u32 %v3228_v19, 16 }
 0x1d0   : > { %v3383_v5 = vor.u32 %v3382_v51, %v3379_v31  ;;  %v3315_v43 = vrot.slane %v3313_v26, 3  ;;  %v3318_v21 = vrot.slane %v3316_v33, 4  ;;  %v2949_v62 = vpop.permute.xlu1 %2948 }
 0x1d1   : > { %v3246_v0 = vsel %vm8530_vm7, %v3211_v38, %v2949_v62  ;;  %vm8546_vm7 = vmmov %vm8539_vm0 }
 0x1d2   : > { %v3384_v49 = vsel %vm8531_vm3, %v3375_v6, %v3383_v5  ;;  %v3319_v45 = vor.u32 %v3318_v21, %v3315_v43  ;;  %v3385_v52 = vshrl.u32 %v3246_v0, 16  ;;  %v3388_v32 = vshll.u32 %v3246_v0, 16  ;;  %vm8547_vm3 = vmmov %vm8539_vm0 }
 0x1d3   : > { %4438 = vmatprep.mubr.msk.bf16.mxu1 %vm8532_vm1, %v3384_v49  ;;  %vm8548_vm1 = vmmov %vm8539_vm0 }
 0x1d4   : > { %v3387_v4 = vrot.slane %v3385_v52, 3  ;;  %v3390_v46 = vrot.slane %v3388_v32, 4  ;;  %v3320_v1 = vsel %vm8533_vm9, %v7217_v23, %v3319_v45  ;;  %v3328_v24 = vsel %vm8534_vm12, %v3319_v45, %v6778_v63  ;;  %vm8549_vm9 = vmmov %vm8539_vm0 }
 0x1d5   : > { %4422 = vmatprep.mubr.msk.bf16.mxu0 %vm8535_vm5, %v3320_v1  ;;  %vm8550_vm12 = vmmov %vm8539_vm0 }
 0x1d6   : > { %v3391_v9 = vor.u32 %v3390_v46, %v3387_v4  ;;  %4423 = vmatmul.mubr.msk.bf16.gmra.mxu0 %vm8536_vm11, %v3328_v24  ;;  %vm8551_vm5 = vmmov %vm8539_vm0 }
 0x1d7   : > { %vm8552_vm11 = vmmov %vm8539_vm0 }
 0x1d8   : > { %v3392_v6 = vsel %vm8537_vm6, %v3383_v5, %v3391_v9  ;;  %vm8553_vm6 = vmmov %vm8539_vm0 }
 0x1d9   : > { %4439 = vmatmul.mubr.msk.bf16.gmra.mxu1 %vm8538_vm10, %v3392_v6  ;;  %vm8554_vm10 = vmmov %vm8539_vm0 }
 0x1ea   : > { %v4412_v3 = vpop.f32.mrf.mxu0 }
 0x1eb   : > { %v7275_v23 = vadd.f32 %v4412_v3, %v7272_v55 }
 0x1ec   : > { %v3495_v40 = vpop.f32.mrf.mxu0 }
 0x1ed   : > { %v7278_v63 = vadd.f32 %v7272_v55, %v3495_v40  ;;  %v3628_v44 = vsel %vm8539_vm0, %v7275_v23, 0.0 }
 0x1ee   : > { %3629 = vadd.xlane.f32.xlu0 %v3628_v44  ;;  %v4413_v7 = vpop.f32.mrf.mxu0 }
 0x1ef   : > { %v7283_v20 = vadd.f32 %v4413_v7, %v7272_v55  ;;  %v3622_v60 = vsel %vm8540_vm14, %v7278_v63, 0.0  ;;  %vm8555_vm14 = vmmov %vm8539_vm0 }
 0x1f0   : > { %v3498_v56 = vpop.f32.mrf.mxu0 }
 0x1f1   : > { %v3631_v12 = vsel %vm8542_vm15, %v7283_v20, 0.0  ;;  %v7301_v30 = vadd.f32 %v7272_v55, %v3498_v56  ;;  %vm8557_vm15 = vmmov %vm8539_vm0 }
 0x1f2   : > { %v4428_v2 = vpop.f32.mrf.mxu1  ;;  %3623 = vadd.xlane.f32.xlu0 %v3622_v60 }
 0x1f3   : > { %v7288_v57 = vadd.f32 %v4428_v2, %v7272_v55  ;;  %v3625_v25 = vsel %vm8545_vm8, %v7301_v30, 0.0  ;;  %vm8560_vm8 = vmmov %vm8539_vm0 }
 0x1f4   : > { %v3559_v18 = vpop.f32.mrf.mxu1 }
 0x1f5   : > { %v7291_v14 = vadd.f32 %v7272_v55, %v3559_v18  ;;  %v3676_v35 = vsel %vm8541_vm4, %v7288_v57, 0.0  ;;  %vm8556_vm4 = vmmov %vm8539_vm0 }
 0x1f6   : > { %3677 = vadd.xlane.f32.xlu1 %v3676_v35  ;;  %v4429_v54 = vpop.f32.mrf.mxu1  ;;  %3632 = vadd.xlane.f32.xlu0 %v3631_v12 }
 0x1f7   : > { %v7298_v34 = vadd.f32 %v4429_v54, %v7272_v55  ;;  %v3670_v22 = vsel %vm8543_vm2, %v7291_v14, 0.0  ;;  %vm8558_vm2 = vmmov %vm8539_vm0 }
 0x1f8   : > { %v3562_v15 = vpop.f32.mrf.mxu1 }
 0x1f9   : > { %v7306_v59 = vadd.f32 %v7272_v55, %v3562_v15  ;;  %v3679_v61 = vsel %vm8544_vm13, %v7298_v34, 0.0  ;;  %vm8559_vm13 = vmmov %vm8539_vm0 }
 0x1fa   : > { %3671 = vadd.xlane.f32.xlu1 %v3670_v22  ;;  %3680 = vadd.xlane.f32.xlu0 %v3679_v61 }
 0x1fb   : > { %v3673_v16 = vsel %vm8546_vm7, %v7306_v59, 0.0  ;;  %vm8561_vm7 = vmmov %vm8539_vm0 }
 0x1fe   : > { %3626 = vadd.xlane.f32.xlu1 %v3625_v25  ;;  %3674 = vadd.xlane.f32.xlu0 %v3673_v16 }
 0x227   : > { %v4416_v41 = vpop.f32.mrf.mxu0 }
 0x228   : > { %v7315_v17 = vadd.f32 %v4416_v41, %v7272_v55 }
 0x229   : > { %v3511_v27 = vpop.f32.mrf.mxu0 }
 0x22a   : > { %v3640_v28 = vsel %vm8547_vm3, %v7315_v17, 0.0  ;;  %v7328_v29 = vadd.f32 %v7272_v55, %v3511_v27  ;;  %vm8562_vm3 = vmmov %vm8539_vm0 }
 0x22b   : > { %v4417_v50 = vpop.f32.mrf.mxu0  ;;  %3641 = vadd.xlane.f32.xlu1 %v3640_v28 }
 0x22c   : > { %v7320_v42 = vadd.f32 %v4417_v50, %v7272_v55  ;;  %v3634_v31 = vsel %vm8550_vm12, %v7328_v29, 0.0  ;;  %vm8565_vm12 = vmmov %vm8539_vm0 }
 0x22d   : > { %v4432_v11 = vpop.f32.mrf.mxu1  ;;  %v3514_v47 = vpop.f32.mrf.mxu0 }
 0x22e   : > { %v3643_v58 = vsel %vm8548_vm1, %v7320_v42, 0.0  ;;  %v7325_v39 = vadd.f32 %v4432_v11, %v7272_v55  ;;  %v7339_v19 = vadd.f32 %v7272_v55, %v3514_v47  ;;  %vm8563_vm1 = vmmov %vm8539_vm0 }
 0x22f   : > { %3644 = vadd.xlane.f32.xlu0 %v3643_v58  ;;  %v3575_v53 = vpop.f32.mrf.mxu1 }
 0x230   : > { %v3688_v8 = vsel %vm8549_vm9, %v7325_v39, 0.0  ;;  %v7336_v36 = vadd.f32 %v7272_v55, %v3575_v53  ;;  %v3637_v13 = vsel %vm8553_vm6, %v7339_v19, 0.0  ;;  %vm8564_vm9 = vmmov %vm8539_vm0 }
 0x231   : > { %v4433_v48 = vpop.f32.mrf.mxu1  ;;  %3689 = vadd.xlane.f32.xlu1 %v3688_v8  ;;  %vm8568_vm6 = vmmov %vm8539_vm0 }
 0x232   : > { %v7333_v10 = vadd.f32 %v4433_v48, %v7272_v55  ;;  %v3682_v33 = vsel %vm8552_vm11, %v7336_v36, 0.0  ;;  %vm8567_vm11 = vmmov %vm8539_vm0 }
 0x233   : > { %v3578_v37 = vpop.f32.mrf.mxu1 }
 0x234   : > { %v3691_v51 = vsel %vm8551_vm5, %v7333_v10, 0.0  ;;  %v7346_v26 = vadd.f32 %v7272_v55, %v3578_v37  ;;  %vm8566_vm5 = vmmov %vm8539_vm0 }
 0x235   : > { %3635 = vadd.xlane.f32.xlu1 %v3634_v31  ;;  %3692 = vadd.xlane.f32.xlu0 %v3691_v51 }
 0x236   : > { %v3685_v5 = vsel %vm8554_vm10, %v7346_v26, 0.0  ;;  %vm8569_vm10 = vmmov %vm8539_vm0 }
 0x239   : > { %3683 = vadd.xlane.f32.xlu1 %v3682_v33  ;;  %3638 = vadd.xlane.f32.xlu0 %v3637_v13 }
 0x23d   : > { %3686 = vadd.xlane.f32.xlu0 %v3685_v5 }
 0x267   : > { %v4420_v38 = vpop.f32.mrf.mxu0 }
 0x268   : > { %v7355_v43 = vadd.f32 %v4420_v38, %v7272_v55 }
 0x269   : > { %v3527_v21 = vpop.f32.mrf.mxu0 }
 0x26a   : > { %v3652_v62 = vsel %vm8539_vm0, %v7355_v43, 0.0  ;;  %v7368_v46 = vadd.f32 %v7272_v55, %v3527_v21 }
 0x26b   : > { %v4421_v0 = vpop.f32.mrf.mxu0  ;;  %3653 = vadd.xlane.f32.xlu1 %v3652_v62 }
 0x26c   : > { %v7360_v49 = vadd.f32 %v4421_v0, %v7272_v55  ;;  %v3646_v44 = vsel %vm8557_vm15, %v7368_v46, 0.0  ;;  %vm8572_vm15 = vmmov %vm8539_vm0 }
 0x26d   : > { %v4436_v45 = vpop.f32.mrf.mxu1  ;;  %v3530_v9 = vpop.f32.mrf.mxu0 }
 0x26e   : > { %v3655_v52 = vsel %vm8555_vm14, %v7360_v49, 0.0  ;;  %v7365_v32 = vadd.f32 %v4436_v45, %v7272_v55  ;;  %v7379_v40 = vadd.f32 %v7272_v55, %v3530_v9  ;;  %vm8570_vm14 = vmmov %vm8539_vm0 }
 0x26f   : > { %3656 = vadd.xlane.f32.xlu0 %v3655_v52  ;;  %v3591_v4 = vpop.f32.mrf.mxu1 }
 0x270   : > { %v3700_v1 = vsel %vm8556_vm4, %v7365_v32, 0.0  ;;  %v7376_v3 = vadd.f32 %v7272_v55, %v3591_v4  ;;  %v3649_v35 = vsel %vm8560_vm8, %v7379_v40, 0.0  ;;  %vm8571_vm4 = vmmov %vm8539_vm0 }
 0x271   : > { %v4437_v24 = vpop.f32.mrf.mxu1  ;;  %3701 = vadd.xlane.f32.xlu1 %v3700_v1  ;;  %vm8575_vm8 = vmmov %vm8539_vm0 }
 0x272   : > { %v7373_v6 = vadd.f32 %v4437_v24, %v7272_v55  ;;  %v3694_v18 = vsel %vm8559_vm13, %v7376_v3, 0.0  ;;  %vm8574_vm13 = vmmov %vm8539_vm0 }
 0x273   : > { %v3594_v2 = vpop.f32.mrf.mxu1 }
 0x274   : > { %v3703_v7 = vsel %vm8558_vm2, %v7373_v6, 0.0  ;;  %v7386_v60 = vadd.f32 %v7272_v55, %v3594_v2  ;;  %vm8573_vm2 = vmmov %vm8539_vm0 }
 0x275   : > { %3647 = vadd.xlane.f32.xlu1 %v3646_v44  ;;  %3704 = vadd.xlane.f32.xlu0 %v3703_v7 }
 0x276   : > { %v3697_v54 = vsel %vm8561_vm7, %v7386_v60, 0.0  ;;  %vm8576_vm7 = vmmov %vm8539_vm0 }
 0x277   : > { %v3630_v56 = vpop.xlane.xlu0 %3629 }
 0x278   : > { %v3721_v11 = vmul.f32 0.03125, %v3630_v56 }
 0x279   : > { %3695 = vadd.xlane.f32.xlu1 %v3694_v18  ;;  %3650 = vadd.xlane.f32.xlu0 %v3649_v35 }
 0x27a   : > { %v7416_v13 = vsub.f32 %v7275_v23, %v3721_v11 }
 0x27b   : > { %v3624_v12 = vpop.xlane.xlu0 %3623 }
 0x27c   : > { %v3719_v1 = vmul.f32 0.03125, %v3624_v12  ;;  %v3785_v9 = vmul.f32 %v7416_v13, %v7416_v13 }
 0x27d   : > { %3698 = vadd.xlane.f32.xlu0 %v3697_v54 }
 0x27e   : > { %v3821_v54 = vsel %vm8569_vm10, %v3785_v9, 0.0  ;;  %vm8584_vm10 = vmmov %vm8539_vm0 }
 0x27f   : > { %v3678_v27 = vpop.xlane.xlu1 %3677  ;;  %v3633_v53 = vpop.xlane.xlu0 %3632 }
 0x280   : > { %v3737_v5 = vmul.f32 0.03125, %v3678_v27  ;;  %v3722_v21 = vmul.f32 0.03125, %v3633_v53 }
 0x282   : > { %v7429_v23 = vsub.f32 %v7288_v57, %v3737_v5  ;;  %v7432_v24 = vsub.f32 %v7283_v20, %v3722_v21  ;;  %v7444_v57 = vsub.f32 %v7278_v63, %v3719_v1 }
 0x283   : > { %v3672_v38 = vpop.xlane.xlu1 %3671  ;;  %v3681_v4 = vpop.xlane.xlu0 %3680 }
 0x284   : > { %v3738_v44 = vmul.f32 0.03125, %v3681_v4  ;;  %v3735_v20 = vmul.f32 0.03125, %v3672_v38  ;;  %v3801_v56 = vmul.f32 %v7429_v23, %v7429_v23  ;;  %v3783_v27 = vmul.f32 %v7444_v57, %v7444_v57 }
 0x286   : > { %v7450_v12 = vsub.f32 %v7298_v34, %v3738_v44  ;;  %v7457_v63 = vsub.f32 %v7291_v14, %v3735_v20  ;;  %v3815_v53 = vsel %vm8572_vm15, %v3783_v27, 0.0  ;;  %vm8587_vm15 = vmmov %vm8539_vm0 }
 0x287   : > { %v3627_v35 = vpop.xlane.xlu1 %3626 }
 0x288   : > { %v3802_v11 = vmul.f32 %v7450_v12, %v7450_v12 }
 0x296   : > { %v4424_v15 = vpop.f32.mrf.mxu0 }
 0x297   : > { %v7395_v22 = vadd.f32 %v4424_v15, %v7272_v55 }
 0x298   : > { %v3543_v61 = vpop.f32.mrf.mxu0 }
 0x299   : > { %v7398_v25 = vadd.f32 %v7272_v55, %v3543_v61  ;;  %v4440_v16 = vpop.f32.mrf.mxu1  ;;  %v3664_v41 = vsel %vm8562_vm3, %v7395_v22, 0.0  ;;  %v3786_v61 = vmul.f32 %v7432_v24, %v7432_v24  ;;  %vm8577_vm3 = vmmov %vm8539_vm0 }
 0x29a   : > { %v4425_v28 = vpop.f32.mrf.mxu0  ;;  %3665 = vadd.xlane.f32.xlu1 %v3664_v41  ;;  %v7419_v62 = vadd.f32 %v4440_v16, %v7272_v55  ;;  %v3675_v16 = vpop.xlane.xlu0 %3674  ;;  %v3869_v41 = vsel %vm8570_vm14, %v3801_v56, 0.0  ;;  %vm8585_vm14 = vmmov %vm8539_vm0 }
 0x29b   : > { %v7403_v50 = vadd.f32 %v4425_v28, %v7272_v55  ;;  %v3607_v58 = vpop.f32.mrf.mxu1  ;;  %v3658_v51 = vsel %vm8563_vm1, %v7398_v25, 0.0  ;;  %v3736_v28 = vmul.f32 0.03125, %v3675_v16  ;;  %vm8578_vm1 = vmmov %vm8539_vm0 }
 0x29c   : > { %v3546_v8 = vpop.f32.mrf.mxu0  ;;  %v7406_v48 = vadd.f32 %v7272_v55, %v3607_v58  ;;  %v3712_v2 = vsel %vm8567_vm11, %v7419_v62, 0.0  ;;  %v3824_v58 = vsel %vm8571_vm4, %v3786_v61, 0.0  ;;  %vm8582_vm11 = vmmov %vm8539_vm0 }
 0x29d   : > { %v7409_v47 = vadd.f32 %v7272_v55, %v3546_v8  ;;  %v4441_v31 = vpop.f32.mrf.mxu1  ;;  %v3667_v37 = vsel %vm8564_vm9, %v7403_v50, 0.0  ;;  %v7470_v14 = vsub.f32 %v7306_v59, %v3736_v28  ;;  %v3872_v8 = vsel %vm8573_vm2, %v3802_v11, 0.0  ;;  %vm8579_vm9 = vmmov %vm8539_vm0 }
 0x29e   : > { %3659 = vadd.xlane.f32.xlu1 %v3658_v51  ;;  %3668 = vadd.xlane.f32.xlu0 %v3667_v37  ;;  %v3706_v45 = vsel %vm8565_vm12, %v7406_v48, 0.0  ;;  %v7437_v7 = vadd.f32 %v4441_v31, %v7272_v55  ;;  %v3799_v31 = vmul.f32 %v7457_v63, %v7457_v63  ;;  %vm8580_vm12 = vmmov %vm8539_vm0 }
 0x29f   : > { %v3610_v33 = vpop.f32.mrf.mxu1  ;;  %v3661_v52 = vsel %vm8566_vm5, %v7409_v47, 0.0  ;;  %v3800_v59 = vmul.f32 %v7470_v14, %v7470_v14  ;;  %vm8581_vm5 = vmmov %vm8539_vm0 }
 0x2a0   : > { %v7422_v0 = vadd.f32 %v7272_v55, %v3610_v33  ;;  %v3720_v55 = vmul.f32 0.03125, %v3627_v35  ;;  %v3715_v15 = vsel %vm8539_vm0, %v7437_v7, 0.0  ;;  %v3863_v33 = vsel %vm8574_vm13, %v3799_v31, 0.0  ;;  %vm8586_vm4 = vmmov %vm8539_vm0 }
 0x2a1   : > { %v3866_v4 = vsel %vm8576_vm7, %v3800_v59, 0.0  ;;  %vm8588_vm2 = vmmov %vm8539_vm0 }
 0x2a2   : > { %3707 = vadd.xlane.f32.xlu1 %v3706_v45  ;;  %3662 = vadd.xlane.f32.xlu0 %v3661_v52  ;;  %v3709_v18 = vsel %vm8568_vm6, %v7422_v0, 0.0  ;;  %v7463_v34 = vsub.f32 %v7301_v30, %v3720_v55  ;;  %vm8583_vm6 = vmmov %vm8539_vm0 }
 0x2a3   : > { %vm8589_vm13 = vmmov %vm8539_vm0 }
 0x2a4   : > { %v3784_v30 = vmul.f32 %v7463_v34, %v7463_v34  ;;  %vm8591_vm7 = vmmov %vm8539_vm0 }
 0x2a6   : > { %3713 = vadd.xlane.f32.xlu1 %v3712_v2  ;;  %3710 = vadd.xlane.f32.xlu0 %v3709_v18  ;;  %v3818_v5 = vsel %vm8575_vm8, %v3784_v30, 0.0  ;;  %vm8590_vm8 = vmmov %vm8539_vm0 }
 0x2aa   : > { %3822 = vadd.xlane.f32.xlu1 %v3821_v54  ;;  %3716 = vadd.xlane.f32.xlu0 %v3715_v15 }
 0x2ae   : > { %3870 = vadd.xlane.f32.xlu1 %v3869_v41  ;;  %3825 = vadd.xlane.f32.xlu0 %v3824_v58 }
 0x2b2   : > { %3816 = vadd.xlane.f32.xlu1 %v3815_v53  ;;  %3873 = vadd.xlane.f32.xlu0 %v3872_v8 }
 0x2b4   : > { %v3642_v51 = vpop.xlane.xlu1 %3641 }
 0x2b5   : > { %v3725_v37 = vmul.f32 0.03125, %v3642_v51 }
 0x2b6   : > { %3864 = vadd.xlane.f32.xlu1 %v3863_v33  ;;  %3819 = vadd.xlane.f32.xlu0 %v3818_v5 }
 0x2b7   : > { %v7480_v38 = vsub.f32 %v7315_v17, %v3725_v37 }
 0x2b8   : > { %v3645_v21 = vpop.xlane.xlu0 %3644 }
 0x2b9   : > { %v3726_v45 = vmul.f32 0.03125, %v3645_v21  ;;  %v3789_v52 = vmul.f32 %v7480_v38, %v7480_v38 }
 0x2ba   : > { %3867 = vadd.xlane.f32.xlu0 %v3866_v4  ;;  %v3690_v17 = vpop.xlane.xlu1 %3689 }
 0x2bb   : > { %v7488_v1 = vsub.f32 %v7320_v42, %v3726_v45  ;;  %v3833_v9 = vsel %vm8577_vm3, %v3789_v52, 0.0  ;;  %v3741_v44 = vmul.f32 0.03125, %v3690_v17  ;;  %vm8592_vm3 = vmmov %vm8539_vm0 }
 0x2bc   : > { %3834 = vadd.xlane.f32.xlu1 %v3833_v9 }
 0x2bd   : > { %v3790_v2 = vmul.f32 %v7488_v1, %v7488_v1  ;;  %v7494_v18 = vsub.f32 %v7325_v39, %v3741_v44 }
 0x2be   : > { %v3636_v20 = vpop.xlane.xlu1 %3635  ;;  %v3693_v54 = vpop.xlane.xlu0 %3692 }
 0x2bf   : > { %v3836_v35 = vsel %vm8578_vm1, %v3790_v2, 0.0  ;;  %v3723_v56 = vmul.f32 0.03125, %v3636_v20  ;;  %v3742_v42 = vmul.f32 0.03125, %v3693_v54  ;;  %v3805_v55 = vmul.f32 %v7494_v18, %v7494_v18  ;;  %vm8593_vm1 = vmmov %vm8539_vm0 }
 0x2c0   : > { %3837 = vadd.xlane.f32.xlu0 %v3836_v35 }
 0x2c1   : > { %v7500_v15 = vsub.f32 %v7328_v29, %v3723_v56  ;;  %v7503_v61 = vsub.f32 %v7333_v10, %v3742_v42  ;;  %v3881_v16 = vsel %vm8579_vm9, %v3805_v55, 0.0  ;;  %vm8594_vm9 = vmmov %vm8539_vm0 }
 0x2c2   : > { %v3684_v39 = vpop.xlane.xlu1 %3683  ;;  %3882 = vadd.xlane.f32.xlu1 %v3881_v16  ;;  %v3639_v41 = vpop.xlane.xlu0 %3638 }
 0x2c3   : > { %v3739_v27 = vmul.f32 0.03125, %v3684_v39  ;;  %v3724_v28 = vmul.f32 0.03125, %v3639_v41  ;;  %v3787_v58 = vmul.f32 %v7500_v15, %v7500_v15  ;;  %v3806_v11 = vmul.f32 %v7503_v61, %v7503_v61 }
 0x2c5   : > { %v7511_v53 = vsub.f32 %v7336_v36, %v3739_v27  ;;  %v7514_v29 = vsub.f32 %v7339_v19, %v3724_v28  ;;  %v3827_v10 = vsel %vm8580_vm12, %v3787_v58, 0.0  ;;  %v3884_v8 = vsel %vm8581_vm5, %v3806_v11, 0.0  ;;  %vm8595_vm12 = vmmov %vm8539_vm0 }
 0x2c6   : > { %3828 = vadd.xlane.f32.xlu1 %v3827_v10  ;;  %3885 = vadd.xlane.f32.xlu0 %v3884_v8  ;;  %v3687_v31 = vpop.xlane.xlu0 %3686  ;;  %vm8596_vm5 = vmmov %vm8539_vm0 }
 0x2c7   : > { %v3740_v30 = vmul.f32 0.03125, %v3687_v31  ;;  %v3803_v51 = vmul.f32 %v7511_v53, %v7511_v53  ;;  %v3788_v37 = vmul.f32 %v7514_v29, %v7514_v29 }
 0x2c9   : > { %v7523_v36 = vsub.f32 %v7346_v26, %v3740_v30  ;;  %v3875_v19 = vsel %vm8582_vm11, %v3803_v51, 0.0  ;;  %v3830_v33 = vsel %vm8583_vm6, %v3788_v37, 0.0  ;;  %vm8597_vm11 = vmmov %vm8539_vm0 }
 0x2ca   : > { %3876 = vadd.xlane.f32.xlu1 %v3875_v19  ;;  %3831 = vadd.xlane.f32.xlu0 %v3830_v33  ;;  %vm8598_vm6 = vmmov %vm8539_vm0 }
 0x2cb   : > { %v3804_v5 = vmul.f32 %v7523_v36, %v7523_v36 }
 0x2cd   : > { %v3878_v59 = vsel %vm8584_vm10, %v3804_v5, 0.0  ;;  %vm8599_vm10 = vmmov %vm8539_vm0 }
 0x2ce   : > { %3879 = vadd.xlane.f32.xlu0 %v3878_v59 }
 0x2f4   : > { %v3654_v21 = vpop.xlane.xlu1 %3653 }
 0x2f5   : > { %v3729_v45 = vmul.f32 0.03125, %v3654_v21 }
 0x2f7   : > { %v7531_v52 = vsub.f32 %v7355_v43, %v3729_v45 }
 0x2f8   : > { %v3657_v4 = vpop.xlane.xlu0 %3656 }
 0x2f9   : > { %v3730_v26 = vmul.f32 0.03125, %v3657_v4  ;;  %v3793_v9 = vmul.f32 %v7531_v52, %v7531_v52 }
 0x2fa   : > { %v3702_v17 = vpop.xlane.xlu1 %3701 }
 0x2fb   : > { %v7536_v44 = vsub.f32 %v7360_v49, %v3730_v26  ;;  %v3845_v2 = vsel %vm8539_vm0, %v3793_v9, 0.0  ;;  %v3745_v35 = vmul.f32 0.03125, %v3702_v17 }
 0x2fc   : > { %3846 = vadd.xlane.f32.xlu1 %v3845_v2 }
 0x2fd   : > { %v3794_v20 = vmul.f32 %v7536_v44, %v7536_v44  ;;  %v7542_v54 = vsub.f32 %v7365_v32, %v3745_v35 }
 0x2fe   : > { %v3648_v43 = vpop.xlane.xlu1 %3647  ;;  %v3705_v56 = vpop.xlane.xlu0 %3704 }
 0x2ff   : > { %v3848_v42 = vsel %vm8585_vm14, %v3794_v20, 0.0  ;;  %v3727_v55 = vmul.f32 0.03125, %v3648_v43  ;;  %v3746_v16 = vmul.f32 0.03125, %v3705_v56  ;;  %v3809_v49 = vmul.f32 %v7542_v54, %v7542_v54  ;;  %vm8600_vm14 = vmmov %vm8539_vm0 }
 0x300   : > { %3849 = vadd.xlane.f32.xlu0 %v3848_v42 }
 0x301   : > { %v7548_v39 = vsub.f32 %v7368_v46, %v3727_v55  ;;  %v7551_v41 = vsub.f32 %v7373_v6, %v3746_v16  ;;  %v3893_v27 = vsel %vm8586_vm4, %v3809_v49, 0.0  ;;  %vm8601_vm4 = vmmov %vm8539_vm0 }
 0x302   : > { %v3696_v32 = vpop.xlane.xlu1 %3695  ;;  %3894 = vadd.xlane.f32.xlu1 %v3893_v27  ;;  %v3651_v28 = vpop.xlane.xlu0 %3650 }
 0x303   : > { %v3743_v58 = vmul.f32 0.03125, %v3696_v32  ;;  %v3728_v11 = vmul.f32 0.03125, %v3651_v28  ;;  %v3791_v10 = vmul.f32 %v7548_v39, %v7548_v39  ;;  %v3810_v8 = vmul.f32 %v7551_v41, %v7551_v41 }
 0x305   : > { %v7559_v31 = vsub.f32 %v7376_v3, %v3743_v58  ;;  %v7562_v46 = vsub.f32 %v7379_v40, %v3728_v11  ;;  %v3839_v6 = vsel %vm8587_vm15, %v3791_v10, 0.0  ;;  %v3896_v30 = vsel %vm8588_vm2, %v3810_v8, 0.0  ;;  %vm8602_vm15 = vmmov %vm8539_vm0 }
 0x306   : > { %3840 = vadd.xlane.f32.xlu1 %v3839_v6  ;;  %3897 = vadd.xlane.f32.xlu0 %v3896_v30  ;;  %v3699_v51 = vpop.xlane.xlu0 %3698  ;;  %vm8603_vm2 = vmmov %vm8539_vm0 }
 0x307   : > { %v3744_v37 = vmul.f32 0.03125, %v3699_v51  ;;  %v3807_v19 = vmul.f32 %v7559_v31, %v7559_v31  ;;  %v3792_v33 = vmul.f32 %v7562_v46, %v7562_v46 }
 0x309   : > { %v7571_v3 = vsub.f32 %v7386_v60, %v3744_v37  ;;  %v3887_v40 = vsel %vm8589_vm13, %v3807_v19, 0.0  ;;  %v3842_v5 = vsel %vm8590_vm8, %v3792_v33, 0.0  ;;  %vm8604_vm13 = vmmov %vm8539_vm0 }
 0x30a   : > { %3888 = vadd.xlane.f32.xlu1 %v3887_v40  ;;  %3843 = vadd.xlane.f32.xlu0 %v3842_v5  ;;  %vm8605_vm8 = vmmov %vm8539_vm0 }
 0x30b   : > { %v3808_v59 = vmul.f32 %v7571_v3, %v7571_v3 }
 0x30d   : > { %v3890_v21 = vsel %vm8591_vm7, %v3808_v59, 0.0  ;;  %vm8606_vm7 = vmmov %vm8539_vm0 }
 0x30e   : > { %3891 = vadd.xlane.f32.xlu0 %v3890_v21 }
 0x323   : > { %v3666_v45 = vpop.xlane.xlu1 %3665 }
 0x324   : > { %v3733_v4 = vmul.f32 0.03125, %v3666_v45 }
 0x326   : > { %v7579_v26 = vsub.f32 %v7395_v22, %v3733_v4 }
 0x327   : > { %v3660_v9 = vpop.xlane.xlu1 %3659  ;;  %v3669_v60 = vpop.xlane.xlu0 %3668 }
 0x328   : > { %v3731_v17 = vmul.f32 0.03125, %v3660_v9  ;;  %v3734_v2 = vmul.f32 0.03125, %v3669_v60  ;;  %v3797_v35 = vmul.f32 %v7579_v26, %v7579_v26 }
 0x32a   : > { %v7584_v20 = vsub.f32 %v7398_v25, %v3731_v17  ;;  %v7587_v43 = vsub.f32 %v7403_v50, %v3734_v2  ;;  %v3857_v56 = vsel %vm8592_vm3, %v3797_v35, 0.0  ;;  %vm8607_vm3 = vmmov %vm8539_vm0 }
 0x32b   : > { %v3708_v42 = vpop.xlane.xlu1 %3707  ;;  %3858 = vadd.xlane.f32.xlu1 %v3857_v56  ;;  %v3663_v55 = vpop.xlane.xlu0 %3662 }
 0x32c   : > { %v3747_v22 = vmul.f32 0.03125, %v3708_v42  ;;  %v3732_v16 = vmul.f32 0.03125, %v3663_v55  ;;  %v3795_v49 = vmul.f32 %v7584_v20, %v7584_v20  ;;  %v3798_v27 = vmul.f32 %v7587_v43, %v7587_v43 }
 0x32e   : > { %v7595_v32 = vsub.f32 %v7406_v48, %v3747_v22  ;;  %v7598_v25 = vsub.f32 %v7409_v47, %v3732_v16  ;;  %v3851_v50 = vsel %vm8593_vm1, %v3795_v49, 0.0  ;;  %v3860_v28 = vsel %vm8594_vm9, %v3798_v27, 0.0  ;;  %vm8608_vm1 = vmmov %vm8539_vm0 }
 0x32f   : > { %v3714_v58 = vpop.xlane.xlu1 %3713  ;;  %3852 = vadd.xlane.f32.xlu1 %v3851_v50  ;;  %3861 = vadd.xlane.f32.xlu0 %v3860_v28  ;;  %v3711_v11 = vpop.xlane.xlu0 %3710  ;;  %vm8609_vm9 = vmmov %vm8539_vm0 }
 0x330   : > { %v3749_v10 = vmul.f32 0.03125, %v3714_v58  ;;  %v3748_v8 = vmul.f32 0.03125, %v3711_v11  ;;  %v3811_v6 = vmul.f32 %v7595_v32, %v7595_v32  ;;  %v3796_v48 = vmul.f32 %v7598_v25, %v7598_v25 }
 0x332   : > { %v7607_v30 = vsub.f32 %v7419_v62, %v3749_v10  ;;  %v7610_v47 = vsub.f32 %v7422_v0, %v3748_v8  ;;  %v3899_v51 = vsel %vm8595_vm12, %v3811_v6, 0.0  ;;  %v3854_v37 = vsel %vm8596_vm5, %v3796_v48, 0.0  ;;  %vm8610_vm12 = vmmov %vm8539_vm0 }
 0x333   : > { %v3823_v19 = vpop.xlane.xlu1 %3822  ;;  %3900 = vadd.xlane.f32.xlu1 %v3899_v51  ;;  %3855 = vadd.xlane.f32.xlu0 %v3854_v37  ;;  %v3717_v33 = vpop.xlane.xlu0 %3716  ;;  %vm8611_vm5 = vmmov %vm8539_vm0 }
 0x334   : > { %v3913_v40 = vmul.f32 0.03125, %v3823_v19  ;;  %v3750_v5 = vmul.f32 0.03125, %v3717_v33  ;;  %v3813_v59 = vmul.f32 %v7607_v30, %v7607_v30  ;;  %v3812_v62 = vmul.f32 %v7610_v47, %v7610_v47 }
 0x336   : > { %v3945_v21 = vadd.f32 1e-05, %v3913_v40  ;;  %v7619_v0 = vsub.f32 %v7437_v7, %v3750_v5  ;;  %v3905_v45 = vsel %vm8597_vm11, %v3813_v59, 0.0  ;;  %v3902_v4 = vsel %vm8598_vm6, %v3812_v62, 0.0  ;;  %v7629_v40 = vld [vmem:[%s7807_s2 + $0x1] ss:$0 sm:$0xff]  ;;  %vm8612_vm11 = vmmov %vm8539_vm0 }
 0x337   : > { %v3871_v9 = vpop.xlane.xlu1 %3870  ;;  %3906 = vadd.xlane.f32.xlu1 %v3905_v45  ;;  %3903 = vadd.xlane.f32.xlu0 %v3902_v4  ;;  %v3826_v60 = vpop.xlane.xlu0 %3825  ;;  %vm8613_vm6 = vmmov %vm8539_vm0 }
 0x338   : > { %4490 = vrsqrt.f32 %v3945_v21  ;;  %v3929_v17 = vmul.f32 0.03125, %v3871_v9  ;;  %v3914_v2 = vmul.f32 0.03125, %v3826_v60  ;;  %v3814_v35 = vmul.f32 %v7619_v0, %v7619_v0  ;;  %v7635_v21 = vld [vmem:[%s7807_s2 + $0x2] ss:$0 sm:$0xff] }
 0x33a   : > { %v3961_v56 = vadd.f32 1e-05, %v3929_v17  ;;  %v3946_v42 = vadd.f32 1e-05, %v3914_v2  ;;  %v3908_v55 = vsel %vm8599_vm10, %v3814_v35, 0.0  ;;  %vm8614_vm10 = vmmov %vm8539_vm0 }
 0x33b   : > { %v3817_v7 = vpop.xlane.xlu1 %3816  ;;  %3909 = vadd.xlane.f32.xlu0 %v3908_v55  ;;  %v3874_v22 = vpop.xlane.xlu0 %3873 }
 0x33c   : > { %4492 = vrsqrt.f32 %v3961_v56  ;;  %v3911_v16 = vmul.f32 0.03125, %v3817_v7  ;;  %v3930_v49 = vmul.f32 0.03125, %v3874_v22 }
 0x33d   : > { %4494 = vrsqrt.f32 %v3946_v42 }
 0x33e   : > { %v3943_v27 = vadd.f32 1e-05, %v3911_v16  ;;  %v3962_v50 = vadd.f32 1e-05, %v3930_v49 }
 0x33f   : > { %v3865_v28 = vpop.xlane.xlu1 %3864  ;;  %v3820_v58 = vpop.xlane.xlu0 %3819 }
 0x340   : > { %4496 = vrsqrt.f32 %v3943_v27  ;;  %v3927_v11 = vmul.f32 0.03125, %v3865_v28  ;;  %v3912_v10 = vmul.f32 0.03125, %v3820_v58 }
 0x341   : > { %4498 = vrsqrt.f32 %v3962_v50 }
 0x342   : > { %v3959_v8 = vadd.f32 1e-05, %v3927_v11  ;;  %v3944_v6 = vadd.f32 1e-05, %v3912_v10 }
 0x343   : > { %v3868_v48 = vpop.xlane.xlu0 %3867 }
 0x344   : > { %4500 = vrsqrt.f32 %v3959_v8  ;;  %v3928_v37 = vmul.f32 0.03125, %v3868_v48 }
 0x345   : > { %v3835_v51 = vpop.xlane.xlu1 %3834  ;;  %v4491_v33 = vpop.eup %4490  ;;  %4502 = vrsqrt.f32 %v3944_v6 }
 0x346   : > { %v3917_v19 = vmul.f32 0.03125, %v3835_v51  ;;  %v4009_v5 = vmul.f32 %v4491_v33, %v7416_v13  ;;  %v3960_v59 = vadd.f32 1e-05, %v3928_v37 }
 0x348   : > { %v3949_v62 = vadd.f32 1e-05, %v3917_v19  ;;  %v4046_v4 = vmul.f32 %v7629_v40, %v4009_v5  ;;  %4504 = vrsqrt.f32 %v3960_v59 }
 0x349   : > { %v3838_v45 = vpop.xlane.xlu0 %3837  ;;  %v4493_v60 = vpop.eup %4492 }
 0x34a   : > { %v3918_v9 = vmul.f32 0.03125, %v3838_v45  ;;  %4506 = vrsqrt.f32 %v3949_v62  ;;  %v4495_v17 = vpop.eup %4494  ;;  %v4083_v2 = vadd.f32 %v7635_v21, %v4046_v4  ;;  %v4025_v13 = vmul.f32 %v4493_v60, %v7429_v23 }
 0x34b   : > { %v4010_v56 = vmul.f32 %v4495_v17, %v7432_v24  ;;  %v3883_v42 = vpop.xlane.xlu1 %3882 }
 0x34c   : > { %v3950_v35 = vadd.f32 1e-05, %v3918_v9  ;;  %v4115_v55 = vmax.f32 %v4083_v2, 0.0  ;;  %v4062_v7 = vmul.f32 %v7629_v40, %v4025_v13  ;;  %v3933_v22 = vmul.f32 0.03125, %v3883_v42 }
 0x34d   : > { %v4497_v16 = vpop.eup %4496  ;;  %v4047_v49 = vmul.f32 %v7629_v40, %v4010_v56 }
 0x34e   : > { %4508 = vrsqrt.f32 %v3950_v35  ;;  %v4499_v27 = vpop.eup %4498  ;;  %4147 = vst.msk [vmem:[%s7644_s16 + $0x10] sm:$0xff] %vm8539_vm0, %v4115_v55  ;;  %v4099_v23 = vadd.f32 %v7635_v21, %v4062_v7  ;;  %v4007_v50 = vmul.f32 %v4497_v16, %v7444_v57  ;;  %v3965_v28 = vadd.f32 1e-05, %v3933_v22 }
 0x34f   : > { %v4084_v24 = vadd.f32 %v7635_v21, %v4047_v49  ;;  %v4026_v58 = vmul.f32 %v4499_v27, %v7450_v12  ;;  %v3829_v11 = vpop.xlane.xlu1 %3828  ;;  %v3886_v10 = vpop.xlane.xlu0 %3885 }
 0x350   : > { %v4131_v8 = vmax.f32 %v4099_v23, 0.0  ;;  %v4044_v6 = vmul.f32 %v7629_v40, %v4007_v50  ;;  %4510 = vrsqrt.f32 %v3965_v28  ;;  %v3915_v48 = vmul.f32 0.03125, %v3829_v11 }
 0x351   : > { %v4501_v51 = vpop.eup %4500  ;;  %v4116_v37 = vmax.f32 %v4084_v24, 0.0  ;;  %v4063_v19 = vmul.f32 %v7629_v40, %v4026_v58  ;;  %v3934_v33 = vmul.f32 0.03125, %v3886_v10 }
 0x352   : > { %v4503_v5 = vpop.eup %4502  ;;  %4163 = vst.msk [vmem:[%s7644_s16 + $0x90] sm:$0xff] %vm8600_vm14, %v4131_v8  ;;  %v4081_v57 = vadd.f32 %v7635_v21, %v4044_v6  ;;  %v4023_v12 = vmul.f32 %v4501_v51, %v7457_v63  ;;  %v3947_v59 = vadd.f32 1e-05, %v3915_v48  ;;  %vm8615_vm14 = vmmov %vm8539_vm0 }
 0x353   : > { %4148 = vst.msk [vmem:[%s7644_s16 + $0x18] sm:$0xff] %vm8601_vm4, %v4116_v37  ;;  %v4100_v62 = vadd.f32 %v7635_v21, %v4063_v19  ;;  %v4008_v45 = vmul.f32 %v4503_v5, %v7463_v34  ;;  %v3966_v4 = vadd.f32 1e-05, %v3934_v33  ;;  %v3877_v9 = vpop.xlane.xlu1 %3876  ;;  %v3832_v60 = vpop.xlane.xlu0 %3831  ;;  %vm8616_vm4 = vmmov %vm8539_vm0 }
 0x354   : > { %v4113_v17 = vmax.f32 %v4081_v57, 0.0  ;;  %v4060_v2 = vmul.f32 %v7629_v40, %v4023_v12  ;;  %4512 = vrsqrt.f32 %v3947_v59  ;;  %v3931_v13 = vmul.f32 0.03125, %v3877_v9 }
 0x355   : > { %v4505_v35 = vpop.eup %4504  ;;  %v4132_v56 = vmax.f32 %v4100_v62, 0.0  ;;  %v4045_v63 = vmul.f32 %v7629_v40, %v4008_v45  ;;  %4514 = vrsqrt.f32 %v3966_v4  ;;  %v3916_v42 = vmul.f32 0.03125, %v3832_v60 }
 0x356   : > { %4145 = vst.msk [vmem:[%s7644_s16] sm:$0xff] %vm8602_vm15, %v4113_v17  ;;  %v4097_v34 = vadd.f32 %v7635_v21, %v4060_v2  ;;  %v4024_v7 = vmul.f32 %v4505_v35, %v7470_v14  ;;  %v3963_v22 = vadd.f32 1e-05, %v3931_v13  ;;  %vm8617_vm15 = vmmov %vm8539_vm0 }
 0x357   : > { %v4507_v55 = vpop.eup %4506  ;;  %4164 = vst.msk [vmem:[%s7644_s16 + $0x98] sm:$0xff] %vm8603_vm2, %v4132_v56  ;;  %v4082_v16 = vadd.f32 %v7635_v21, %v4045_v63  ;;  %v3948_v27 = vadd.f32 1e-05, %v3916_v42  ;;  %v3880_v23 = vpop.xlane.xlu0 %3879  ;;  %vm8618_vm2 = vmmov %vm8539_vm0 }
 0x358   : > { %v4013_v49 = vmul.f32 %v4507_v55, %v7480_v38  ;;  %v4129_v50 = vmax.f32 %v4097_v34, 0.0  ;;  %v4061_v28 = vmul.f32 %v7629_v40, %v4024_v7  ;;  %4516 = vrsqrt.f32 %v3963_v22 }
 0x359   : > { %v3932_v24 = vmul.f32 0.03125, %v3880_v23  ;;  %v4114_v11 = vmax.f32 %v4082_v16, 0.0  ;;  %4518 = vrsqrt.f32 %v3948_v27 }
 0x35a   : > { %v4050_v14 = vmul.f32 %v7629_v40, %v4013_v49  ;;  %4161 = vst.msk [vmem:[%s7644_s16 + $0x80] sm:$0xff] %vm8604_vm13, %v4129_v50  ;;  %v4098_v10 = vadd.f32 %v7635_v21, %v4061_v28  ;;  %vm8619_vm13 = vmmov %vm8539_vm0 }
 0x35b   : > { %v4509_v58 = vpop.eup %4508  ;;  %v3964_v8 = vadd.f32 1e-05, %v3932_v24  ;;  %4146 = vst.msk [vmem:[%s7644_s16 + $0x8] sm:$0xff] %vm8605_vm8, %v4114_v11  ;;  %vm8620_vm8 = vmmov %vm8539_vm0 }
 0x35c   : > { %v4014_v38 = vmul.f32 %v4509_v58, %v7488_v1  ;;  %v4087_v6 = vadd.f32 %v7635_v21, %v4050_v14  ;;  %v4130_v48 = vmax.f32 %v4098_v10, 0.0 }
 0x35d   : > { %4520 = vrsqrt.f32 %v3964_v8  ;;  %v4511_v37 = vpop.eup %4510 }
 0x35e   : > { %v4051_v51 = vmul.f32 %v7629_v40, %v4014_v38  ;;  %v4119_v19 = vmax.f32 %v4087_v6, 0.0  ;;  %4162 = vst.msk [vmem:[%s7644_s16 + $0x88] sm:$0xff] %vm8606_vm7, %v4130_v48  ;;  %v4029_v33 = vmul.f32 %v4511_v37, %v7494_v18  ;;  %vm8621_vm7 = vmmov %vm8539_vm0 }
 0x360   : > { %v4088_v5 = vadd.f32 %v7635_v21, %v4051_v51  ;;  %4151 = vst.msk [vmem:[%s7644_s16 + $0x30] sm:$0xff] %vm8607_vm3, %v4119_v19  ;;  %v4066_v1 = vmul.f32 %v7629_v40, %v4029_v33  ;;  %vm8622_vm3 = vmmov %vm8539_vm0 }
 0x361   : > { %v4513_v12 = vpop.eup %4512 }
 0x362   : > { %v4120_v57 = vmax.f32 %v4088_v5, 0.0  ;;  %v4515_v59 = vpop.eup %4514  ;;  %v4103_v62 = vadd.f32 %v7635_v21, %v4066_v1  ;;  %v4011_v45 = vmul.f32 %v4513_v12, %v7500_v15 }
 0x363   : > { %v4030_v4 = vmul.f32 %v4515_v59, %v7503_v61 }
 0x364   : > { %4152 = vst.msk [vmem:[%s7644_s16 + $0x38] sm:$0xff] %vm8608_vm1, %v4120_v57  ;;  %v4135_v18 = vmax.f32 %v4103_v62, 0.0  ;;  %v4048_v9 = vmul.f32 %v7629_v40, %v4011_v45  ;;  %vm8623_vm1 = vmmov %vm8539_vm0 }
 0x365   : > { %v4517_v60 = vpop.eup %4516  ;;  %v4067_v17 = vmul.f32 %v7629_v40, %v4030_v4 }
 0x366   : > { %v4519_v2 = vpop.eup %4518  ;;  %4167 = vst.msk [vmem:[%s7644_s16 + $0xb0] sm:$0xff] %vm8609_vm9, %v4135_v18  ;;  %v4085_v13 = vadd.f32 %v7635_v21, %v4048_v9  ;;  %v4027_v35 = vmul.f32 %v4517_v60, %v7511_v53  ;;  %vm8624_vm9 = vmmov %vm8539_vm0 }
 0x367   : > { %v4104_v15 = vadd.f32 %v7635_v21, %v4067_v17  ;;  %v4012_v61 = vmul.f32 %v4519_v2, %v7514_v29 }
 0x368   : > { %v4117_v56 = vmax.f32 %v4085_v13, 0.0  ;;  %v4064_v63 = vmul.f32 %v7629_v40, %v4027_v35 }
 0x369   : > { %v4136_v55 = vmax.f32 %v4104_v15, 0.0  ;;  %v4049_v34 = vmul.f32 %v7629_v40, %v4012_v61 }
 0x36a   : > { %v4521_v42 = vpop.eup %4520  ;;  %4149 = vst.msk [vmem:[%s7644_s16 + $0x20] sm:$0xff] %vm8610_vm12, %v4117_v56  ;;  %v4101_v7 = vadd.f32 %v7635_v21, %v4064_v63  ;;  %vm8625_vm12 = vmmov %vm8539_vm0 }
 0x36b   : > { %v4028_v53 = vmul.f32 %v4521_v42, %v7523_v36  ;;  %4168 = vst.msk [vmem:[%s7644_s16 + $0xb8] sm:$0xff] %vm8611_vm5, %v4136_v55  ;;  %v4086_v22 = vadd.f32 %v7635_v21, %v4049_v34  ;;  %vm8626_vm5 = vmmov %vm8539_vm0 }
 0x36c   : > { %v4133_v29 = vmax.f32 %v4101_v7, 0.0 }
 0x36d   : > { %v4065_v16 = vmul.f32 %v7629_v40, %v4028_v53  ;;  %v4118_v49 = vmax.f32 %v4086_v22, 0.0 }
 0x36e   : > { %4165 = vst.msk [vmem:[%s7644_s16 + $0xa0] sm:$0xff] %vm8612_vm11, %v4133_v29  ;;  %vm8627_vm11 = vmmov %vm8539_vm0 }
 0x36f   : > { %v4102_v27 = vadd.f32 %v7635_v21, %v4065_v16  ;;  %4150 = vst.msk [vmem:[%s7644_s16 + $0x28] sm:$0xff] %vm8613_vm6, %v4118_v49  ;;  %vm8628_vm6 = vmmov %vm8539_vm0 }
 0x371   : > { %v4134_v23 = vmax.f32 %v4102_v27, 0.0 }
 0x373   : > { %4166 = vst.msk [vmem:[%s7644_s16 + $0xa8] sm:$0xff] %vm8614_vm10, %v4134_v23  ;;  %vm8629_vm10 = vmmov %vm8539_vm0 }
 0x385   : > { %v3847_v50 = vpop.xlane.xlu1 %3846 }
 0x386   : > { %v3921_v28 = vmul.f32 0.03125, %v3847_v50 }
 0x388   : > { %v3953_v36 = vadd.f32 1e-05, %v3921_v28 }
 0x389   : > { %v3850_v24 = vpop.xlane.xlu0 %3849 }
 0x38a   : > { %4522 = vrsqrt.f32 %v3953_v36  ;;  %v3922_v58 = vmul.f32 0.03125, %v3850_v24 }
 0x38b   : > { %v3895_v11 = vpop.xlane.xlu1 %3894 }
 0x38c   : > { %v3954_v14 = vadd.f32 1e-05, %v3922_v58  ;;  %v3937_v10 = vmul.f32 0.03125, %v3895_v11 }
 0x38e   : > { %4524 = vrsqrt.f32 %v3954_v14  ;;  %v3969_v38 = vadd.f32 1e-05, %v3937_v10 }
 0x38f   : > { %v3841_v8 = vpop.xlane.xlu1 %3840  ;;  %v3898_v6 = vpop.xlane.xlu0 %3897 }
 0x390   : > { %4526 = vrsqrt.f32 %v3969_v38  ;;  %v3919_v48 = vmul.f32 0.03125, %v3841_v8  ;;  %v3938_v51 = vmul.f32 0.03125, %v3898_v6 }
 0x392   : > { %v3951_v37 = vadd.f32 1e-05, %v3919_v48  ;;  %v3970_v19 = vadd.f32 1e-05, %v3938_v51 }
 0x393   : > { %v3889_v33 = vpop.xlane.xlu1 %3888  ;;  %v3844_v5 = vpop.xlane.xlu0 %3843 }
 0x394   : > { %4528 = vrsqrt.f32 %v3951_v37  ;;  %v3935_v1 = vmul.f32 0.03125, %v3889_v33  ;;  %v3920_v57 = vmul.f32 0.03125, %v3844_v5 }
 0x395   : > { %4530 = vrsqrt.f32 %v3970_v19 }
 0x396   : > { %v3967_v59 = vadd.f32 1e-05, %v3935_v1  ;;  %v3952_v62 = vadd.f32 1e-05, %v3920_v57 }
 0x397   : > { %v4523_v12 = vpop.eup %4522  ;;  %v3892_v4 = vpop.xlane.xlu0 %3891 }
 0x398   : > { %v4017_v45 = vmul.f32 %v4523_v12, %v7531_v52  ;;  %4532 = vrsqrt.f32 %v3967_v59  ;;  %v3936_v18 = vmul.f32 0.03125, %v3892_v4 }
 0x399   : > { %4534 = vrsqrt.f32 %v3952_v62 }
 0x39a   : > { %v4054_v9 = vmul.f32 %v7629_v40, %v4017_v45  ;;  %v3968_v17 = vadd.f32 1e-05, %v3936_v18 }
 0x39b   : > { %v4525_v60 = vpop.eup %4524 }
 0x39c   : > { %v4091_v2 = vadd.f32 %v7635_v21, %v4054_v9  ;;  %v4018_v13 = vmul.f32 %v4525_v60, %v7536_v44  ;;  %4536 = vrsqrt.f32 %v3968_v17 }
 0x39d   : > { %v4527_v35 = vpop.eup %4526 }
 0x39e   : > { %v4123_v15 = vmax.f32 %v4091_v2, 0.0  ;;  %v4055_v61 = vmul.f32 %v7629_v40, %v4018_v13  ;;  %v4033_v52 = vmul.f32 %v4527_v35, %v7542_v54 }
 0x3a0   : > { %4155 = vst.msk [vmem:[%s7644_s16 + $0x50] sm:$0xff] %vm8539_vm0, %v4123_v15  ;;  %v4092_v56 = vadd.f32 %v7635_v21, %v4055_v61  ;;  %v4070_v63 = vmul.f32 %v7629_v40, %v4033_v52 }
 0x3a1   : > { %v4529_v42 = vpop.eup %4528 }
 0x3a2   : > { %v4124_v55 = vmax.f32 %v4092_v56, 0.0  ;;  %v4531_v34 = vpop.eup %4530  ;;  %v4107_v7 = vadd.f32 %v7635_v21, %v4070_v63  ;;  %v4015_v44 = vmul.f32 %v4529_v42, %v7548_v39 }
 0x3a3   : > { %v4034_v53 = vmul.f32 %v4531_v34, %v7551_v41 }
 0x3a4   : > { %4156 = vst.msk [vmem:[%s7644_s16 + $0x58] sm:$0xff] %vm8615_vm14, %v4124_v55  ;;  %v4139_v54 = vmax.f32 %v4107_v7, 0.0  ;;  %v4052_v22 = vmul.f32 %v7629_v40, %v4015_v44 }
 0x3a5   : > { %v4533_v29 = vpop.eup %4532  ;;  %v4071_v16 = vmul.f32 %v7629_v40, %v4034_v53 }
 0x3a6   : > { %v4535_v49 = vpop.eup %4534  ;;  %4171 = vst.msk [vmem:[%s7644_s16 + $0xd0] sm:$0xff] %vm8616_vm4, %v4139_v54  ;;  %v4089_v27 = vadd.f32 %v7635_v21, %v4052_v22  ;;  %v4031_v23 = vmul.f32 %v4533_v29, %v7559_v31 }
 0x3a7   : > { %v4108_v39 = vadd.f32 %v7635_v21, %v4071_v16  ;;  %v4016_v41 = vmul.f32 %v4535_v49, %v7562_v46 }
 0x3a8   : > { %v4121_v50 = vmax.f32 %v4089_v27, 0.0  ;;  %v4068_v28 = vmul.f32 %v7629_v40, %v4031_v23 }
 0x3a9   : > { %v4537_v36 = vpop.eup %4536  ;;  %v4140_v24 = vmax.f32 %v4108_v39, 0.0  ;;  %v4053_v58 = vmul.f32 %v7629_v40, %v4016_v41 }
 0x3aa   : > { %4153 = vst.msk [vmem:[%s7644_s16 + $0x40] sm:$0xff] %vm8617_vm15, %v4121_v50  ;;  %v4105_v11 = vadd.f32 %v7635_v21, %v4068_v28  ;;  %v4032_v31 = vmul.f32 %v4537_v36, %v7571_v3 }
 0x3ab   : > { %4172 = vst.msk [vmem:[%s7644_s16 + $0xd8] sm:$0xff] %vm8618_vm2, %v4140_v24  ;;  %v4090_v14 = vadd.f32 %v7635_v21, %v4053_v58 }
 0x3ac   : > { %v4137_v46 = vmax.f32 %v4105_v11, 0.0  ;;  %v4069_v10 = vmul.f32 %v7629_v40, %v4032_v31 }
 0x3ad   : > { %v4122_v38 = vmax.f32 %v4090_v14, 0.0 }
 0x3ae   : > { %4169 = vst.msk [vmem:[%s7644_s16 + $0xc0] sm:$0xff] %vm8619_vm13, %v4137_v46  ;;  %v4106_v8 = vadd.f32 %v7635_v21, %v4069_v10 }
 0x3af   : > { %4154 = vst.msk [vmem:[%s7644_s16 + $0x48] sm:$0xff] %vm8620_vm8, %v4122_v38 }
 0x3b0   : > { %v4138_v6 = vmax.f32 %v4106_v8, 0.0 }
 0x3b2   : > { %4170 = vst.msk [vmem:[%s7644_s16 + $0xc8] sm:$0xff] %vm8621_vm7, %v4138_v6 }
 0x3b4   : > { %v3859_v48 = vpop.xlane.xlu1 %3858 }
 0x3b5   : > { %v3925_v51 = vmul.f32 0.03125, %v3859_v48 }
 0x3b7   : > { %v3957_v3 = vadd.f32 1e-05, %v3925_v51 }
 0x3b8   : > { %v3853_v37 = vpop.xlane.xlu1 %3852  ;;  %v3862_v19 = vpop.xlane.xlu0 %3861 }
 0x3b9   : > { %4538 = vrsqrt.f32 %v3957_v3  ;;  %v3923_v33 = vmul.f32 0.03125, %v3853_v37  ;;  %v3926_v5 = vmul.f32 0.03125, %v3862_v19 }
 0x3bb   : > { %v3955_v1 = vadd.f32 1e-05, %v3923_v33  ;;  %v3958_v57 = vadd.f32 1e-05, %v3926_v5 }
 0x3bc   : > { %v3901_v12 = vpop.xlane.xlu1 %3900  ;;  %v3856_v59 = vpop.xlane.xlu0 %3855 }
 0x3bd   : > { %4540 = vrsqrt.f32 %v3955_v1  ;;  %v3939_v62 = vmul.f32 0.03125, %v3901_v12  ;;  %v3924_v45 = vmul.f32 0.03125, %v3856_v59 }
 0x3be   : > { %4542 = vrsqrt.f32 %v3958_v57 }
 0x3bf   : > { %v3971_v4 = vadd.f32 1e-05, %v3939_v62  ;;  %v3956_v18 = vadd.f32 1e-05, %v3924_v45 }
 0x3c0   : > { %v3907_v9 = vpop.xlane.xlu1 %3906  ;;  %v3904_v60 = vpop.xlane.xlu0 %3903 }
 0x3c1   : > { %4544 = vrsqrt.f32 %v3971_v4  ;;  %v3941_v17 = vmul.f32 0.03125, %v3907_v9  ;;  %v3940_v2 = vmul.f32 0.03125, %v3904_v60 }
 0x3c2   : > { %4546 = vrsqrt.f32 %v3956_v18 }
 0x3c3   : > { %v3973_v13 = vadd.f32 1e-05, %v3941_v17  ;;  %v3972_v35 = vadd.f32 1e-05, %v3940_v2 }
 0x3c4   : > { %v3910_v15 = vpop.xlane.xlu0 %3909 }
 0x3c5   : > { %4548 = vrsqrt.f32 %v3973_v13  ;;  %v3942_v61 = vmul.f32 0.03125, %v3910_v15 }
 0x3c6   : > { %v4539_v52 = vpop.eup %4538  ;;  %4550 = vrsqrt.f32 %v3972_v35 }
 0x3c7   : > { %v4021_v56 = vmul.f32 %v4539_v52, %v7579_v26  ;;  %v3974_v63 = vadd.f32 1e-05, %v3942_v61 }
 0x3c9   : > { %v4058_v42 = vmul.f32 %v7629_v40, %v4021_v56  ;;  %4552 = vrsqrt.f32 %v3974_v63 }
 0x3ca   : > { %v4541_v55 = vpop.eup %4540 }
 0x3cb   : > { %v4543_v34 = vpop.eup %4542  ;;  %v4095_v7 = vadd.f32 %v7635_v21, %v4058_v42  ;;  %v4019_v44 = vmul.f32 %v4541_v55, %v7584_v20 }
 0x3cc   : > { %v4022_v53 = vmul.f32 %v4543_v34, %v7587_v43 }
 0x3cd   : > { %v4127_v54 = vmax.f32 %v4095_v7, 0.0  ;;  %v4056_v22 = vmul.f32 %v7629_v40, %v4019_v44 }
 0x3ce   : > { %v4545_v29 = vpop.eup %4544  ;;  %v4059_v16 = vmul.f32 %v7629_v40, %v4022_v53 }
 0x3cf   : > { %v4547_v26 = vpop.eup %4546  ;;  %4159 = vst.msk [vmem:[%s7644_s16 + $0x70] sm:$0xff] %vm8622_vm3, %v4127_v54  ;;  %v4093_v49 = vadd.f32 %v7635_v21, %v4056_v22  ;;  %v4035_v27 = vmul.f32 %v4545_v29, %v7595_v32 }
 0x3d0   : > { %v4096_v23 = vadd.f32 %v7635_v21, %v4059_v16  ;;  %v4020_v20 = vmul.f32 %v4547_v26, %v7598_v25 }
 0x3d1   : > { %v4125_v43 = vmax.f32 %v4093_v49, 0.0  ;;  %v4072_v39 = vmul.f32 %v7629_v40, %v4035_v27 }
 0x3d2   : > { %v4549_v41 = vpop.eup %4548  ;;  %v4128_v50 = vmax.f32 %v4096_v23, 0.0  ;;  %v4057_v28 = vmul.f32 %v7629_v40, %v4020_v20 }
 0x3d3   : > { %v4551_v36 = vpop.eup %4550  ;;  %4157 = vst.msk [vmem:[%s7644_s16 + $0x60] sm:$0xff] %vm8623_vm1, %v4125_v43  ;;  %v4109_v24 = vadd.f32 %v7635_v21, %v4072_v39  ;;  %v4037_v32 = vmul.f32 %v4549_v41, %v7607_v30 }
 0x3d4   : > { %4160 = vst.msk [vmem:[%s7644_s16 + $0x78] sm:$0xff] %vm8624_vm9, %v4128_v50  ;;  %v4094_v25 = vadd.f32 %v7635_v21, %v4057_v28  ;;  %v4036_v58 = vmul.f32 %v4551_v36, %v7610_v47 }
 0x3d5   : > { %v4141_v11 = vmax.f32 %v4109_v24, 0.0  ;;  %v4074_v31 = vmul.f32 %v7629_v40, %v4037_v32 }
 0x3d6   : > { %v4553_v14 = vpop.eup %4552  ;;  %v4126_v46 = vmax.f32 %v4094_v25, 0.0  ;;  %v4073_v10 = vmul.f32 %v7629_v40, %v4036_v58 }
 0x3d7   : > { %4173 = vst.msk [vmem:[%s7644_s16 + $0xe0] sm:$0xff] %vm8625_vm12, %v4141_v11  ;;  %v4111_v30 = vadd.f32 %v7635_v21, %v4074_v31  ;;  %v4038_v38 = vmul.f32 %v4553_v14, %v7619_v0 }
 0x3d8   : > { %4158 = vst.msk [vmem:[%s7644_s16 + $0x68] sm:$0xff] %vm8626_vm5, %v4126_v46  ;;  %v4110_v8 = vadd.f32 %v7635_v21, %v4073_v10 }
 0x3d9   : > { %v4143_v47 = vmax.f32 %v4111_v30, 0.0  ;;  %v4075_v6 = vmul.f32 %v7629_v40, %v4038_v38 }
 0x3da   : > { %v4142_v48 = vmax.f32 %v4110_v8, 0.0 }
 0x3db   : > { %4175 = vst.msk [vmem:[%s7644_s16 + $0xf0] sm:$0xff] %vm8627_vm11, %v4143_v47  ;;  %v4112_v51 = vadd.f32 %v7635_v21, %v4075_v6 }
 0x3dc   : > { %4174 = vst.msk [vmem:[%s7644_s16 + $0xe8] sm:$0xff] %vm8628_vm6, %v4142_v48 }
 0x3dd   : > { %v4144_v3 = vmax.f32 %v4112_v51, 0.0 }
 0x3df   : > { %4176 = vst.msk [vmem:[%s7644_s16 + $0xf8] sm:$0xff] %vm8629_vm10, %v4144_v3 }
 0x3e0 PF: > { %s13_s12 = sadd.s32 1, %s4592_s12  }
 0x3e1   : > { %p10_p4 = scmp.ge.s32.totalorder %s13_s12, 4  }
 0x3e3   :  { %12 = sbr.rel (!%p10_p4) target bundleno = 1 (0x1), region = 62 }

</bundles_post_ra>
